<compile_context>
chip_gen: v7x
topology: tpu7x:2x2x1
jax: 0.10.0
libtpu: 0.0.40
codegen_flags: <defaults>
</compile_context>

<pallas_src>
import functools

import jax
import jax.numpy as jnp
from jax import lax
from jax.experimental import pallas as pl
from jax.experimental.pallas import tpu as pltpu


# ----------------------------------------------------------------------------
# Fused encoder kernel (no grid): everything lives in VMEM for the whole call.
# ----------------------------------------------------------------------------
def _encoder_kernel(x_ref,
                    wih1_ref, whh1_ref, b1_ref,
                    wih2_ref, whh2_ref, b2_ref,
                    wih3_ref, whh3_ref, b3_ref,
                    wlin_ref, blin_ref,
                    out_ref,
                    xp_a_ref, xp_b_ref, xp3_ref,
                    *, seq_len, n_features):
    f32 = jnp.float32
    B = x_ref.shape[0]
    hid = whh1_ref.shape[0]          # whh is (H, 4H)
    emb = whh3_ref.shape[0]

    def lstm_cell(pre, c, h_size):
        # Lane-dense activations over the full (B, 4H) pre-activation block (EUP slot
        # is idle while the MXU h-chain dominates), then static lane slices pick the
        # PyTorch-ordered gates [i, f, g, o].
        sp = jax.nn.sigmoid(pre)
        tp = jnp.tanh(pre)
        i_t = sp[:, 0 * h_size:1 * h_size]
        f_t = sp[:, 1 * h_size:2 * h_size]
        g_t = tp[:, 2 * h_size:3 * h_size]
        o_t = sp[:, 3 * h_size:4 * h_size]
        c_new = f_t * c + i_t * g_t
        h_new = o_t * jnp.tanh(c_new)
        return h_new, c_new

    # x_ref is (B, S*F): x_all[:, t*F:(t+1)*F] == original x[:, t, :].
    x_all = x_ref[...]

    # ---------------- rnn1 ----------------------------------------------------
    # Gate-fused recurrence: ONE (B, hid) x (hid, 4*hid) matmul on the serial
    # h-chain per step.  The layer-1 input projection (depends only on x) and the
    # NEXT layer's input projection (depends only on the fresh h_t) are interleaved
    # into the same step so independent MXU work hides the chain's latency.
    h = jnp.zeros((B, hid), f32)
    c = jnp.zeros((B, hid), f32)
    for t in range(seq_len):           # S is small & static: fully unrolled.
        x_t = x_all[:, t * n_features:(t + 1) * n_features]
        pre = (jnp.dot(x_t, wih1_ref[...], preferred_element_type=f32)
               + b1_ref[...]
               + jnp.dot(h, whh1_ref[...], preferred_element_type=f32))
        h, c = lstm_cell(pre, c, hid)
        # rnn2 (first pass) input projection for step t (bias folded in).
        xp_a_ref[t] = (jnp.dot(h, wih2_ref[...], preferred_element_type=f32)
                       + b2_ref[...])

    # ---------------- rnn2, first pass ----------------------------------------
    h = jnp.zeros((B, hid), f32)
    c = jnp.zeros((B, hid), f32)
    for t in range(seq_len):
        pre = xp_a_ref[t] + jnp.dot(h, whh2_ref[...], preferred_element_type=f32)
        h, c = lstm_cell(pre, c, hid)
        # rnn2 (second pass, same weights — matches the PyTorch forward).
        xp_b_ref[t] = (jnp.dot(h, wih2_ref[...], preferred_element_type=f32)
                       + b2_ref[...])

    # ---------------- rnn2, second pass ----------------------------------------
    h = jnp.zeros((B, hid), f32)
    c = jnp.zeros((B, hid), f32)
    for t in range(seq_len):
        pre = xp_b_ref[t] + jnp.dot(h, whh2_ref[...], preferred_element_type=f32)
        h, c = lstm_cell(pre, c, hid)
        # rnn3 input projection for step t.
        xp3_ref[t] = (jnp.dot(h, wih3_ref[...], preferred_element_type=f32)
                      + b3_ref[...])

    # ---------------- rnn3: only the final hidden state is needed --------------
    h = jnp.zeros((B, emb), f32)
    c = jnp.zeros((B, emb), f32)
    for t in range(seq_len):
        pre = xp3_ref[t] + jnp.dot(h, whh3_ref[...], preferred_element_type=f32)
        h, c = lstm_cell(pre, c, emb)

    # ---------------- fused head: Linear -> ReLU -> same Linear -> ReLU --------
    # (dropout = eval-mode identity)
    w = wlin_ref[...]
    b = blin_ref[...]
    y = jnp.maximum(jnp.dot(h, w, preferred_element_type=f32) + b, 0.0)
    y = jnp.maximum(jnp.dot(y, w, preferred_element_type=f32) + b, 0.0)
    out_ref[...] = y


# ----------------------------------------------------------------------------
# Parameter construction (deterministic, PyTorch-style uniform(-k, k) init).
# Weights are gate-FUSED and pre-transposed: wih (F_in, 4H), whh (H, 4H),
# b (1, 4H), with columns ordered [i | f | g | o] exactly as PyTorch stacks them.
# ----------------------------------------------------------------------------
def init_lstm_params(key, input_size, hidden_size):
    k = 1.0 / (hidden_size ** 0.5)
    k1, k2, k3, k4 = jax.random.split(key, 4)
    w_ih = jax.random.uniform(k1, (4 * hidden_size, input_size), jnp.float32, -k, k)
    w_hh = jax.random.uniform(k2, (4 * hidden_size, hidden_size), jnp.float32, -k, k)
    b_ih = jax.random.uniform(k3, (4 * hidden_size,), jnp.float32, -k, k)
    b_hh = jax.random.uniform(k4, (4 * hidden_size,), jnp.float32, -k, k)
    return dict(
        wih=jnp.transpose(w_ih),                        # (F_in, 4H)
        whh=jnp.transpose(w_hh),                        # (H, 4H)
        b=(b_ih + b_hh).reshape(1, 4 * hidden_size),    # (1, 4H)
    )


def init_linear_params(key, dim):
    k = 1.0 / (dim ** 0.5)
    k1, k2 = jax.random.split(key)
    w = jax.random.uniform(k1, (dim, dim), jnp.float32, -k, k)
    b = jax.random.uniform(k2, (dim,), jnp.float32, -k, k)
    return dict(w_t=w.T, b=b.reshape(1, dim))


def init_encoder_params(key, n_features, embedding_dim):
    hidden_dim = 2 * embedding_dim
    k1, k2, k3, k4 = jax.random.split(key, 4)
    return dict(
        rnn1=init_lstm_params(k1, n_features, hidden_dim),
        rnn2=init_lstm_params(k2, hidden_dim, hidden_dim),
        rnn3=init_lstm_params(k3, hidden_dim, embedding_dim),
        linear=init_linear_params(k4, embedding_dim),
    )


# ----------------------------------------------------------------------------
# Encoder forward: single fused pallas_call; only wrapper op is a bitcast reshape.
# ----------------------------------------------------------------------------
@jax.jit
def encoder_forward(params, x_bf):
    """x_bf: (B, S, F) batch-first float32, as in PyTorch. Returns (B, E)."""
    B, S, F = x_bf.shape
    hid = params["rnn1"]["whh"].shape[0]
    emb = params["rnn3"]["whh"].shape[0]

    # Contiguous-dim merge only (no transpose / pad / output-slice launches).
    x2d = x_bf.reshape(B, S * F)

    kernel = functools.partial(_encoder_kernel, seq_len=S, n_features=F)
    out = pl.pallas_call(
        kernel,
        out_shape=jax.ShapeDtypeStruct((B, emb), jnp.float32),
        scratch_shapes=[
            pltpu.VMEM((S, B, 4 * hid), jnp.float32),   # per-step projections for rnn2 (pass 1)
            pltpu.VMEM((S, B, 4 * hid), jnp.float32),   # per-step projections for rnn2 (pass 2)
            pltpu.VMEM((S, B, 4 * emb), jnp.float32),   # per-step projections for rnn3
        ],
    )(x2d,
      params["rnn1"]["wih"], params["rnn1"]["whh"], params["rnn1"]["b"],
      params["rnn2"]["wih"], params["rnn2"]["whh"], params["rnn2"]["b"],
      params["rnn3"]["wih"], params["rnn3"]["whh"], params["rnn3"]["b"],
      params["linear"]["w_t"], params["linear"]["b"])
    return out


# ----------------------------------------------------------------------------
# Pure-JAX reference (for correctness check against the fused kernel).
# ----------------------------------------------------------------------------
def _lstm_ref(x_tm, p):
    B = x_tm.shape[1]
    H = p["whh"].shape[0]

    def step(carry, x_t):
        h, c = carry
        pre = x_t @ p["wih"] + h @ p["whh"] + p["b"]
        i_t = jax.nn.sigmoid(pre[:, 0 * H:1 * H])
        f_t = jax.nn.sigmoid(pre[:, 1 * H:2 * H])
        g_t = jnp.tanh(pre[:, 2 * H:3 * H])
        o_t = jax.nn.sigmoid(pre[:, 3 * H:4 * H])
        c = f_t * c + i_t * g_t
        h = o_t * jnp.tanh(c)
        return (h, c), h

    init = (jnp.zeros((B, H), jnp.float32), jnp.zeros((B, H), jnp.float32))
    (h_n, _), hs = lax.scan(step, init, x_tm)
    return hs, h_n


def encoder_reference(params, x_bf):
    x = jnp.transpose(x_bf, (1, 0, 2)).astype(jnp.float32)
    x, _ = _lstm_ref(x, params["rnn1"])
    x, _ = _lstm_ref(x, params["rnn2"])
    x, _ = _lstm_ref(x, params["rnn2"])
    _, h_n = _lstm_ref(x, params["rnn3"])
    w, b = params["linear"]["w_t"], params["linear"]["b"]
    y = jnp.maximum(h_n @ w + b, 0.0)
    y = jnp.maximum(y @ w + b, 0.0)
    return y


if __name__ == "__main__":
    batch, seq_len, n_features, embedding_dim = 2, 8, 4, 32

    key = jax.random.PRNGKey(0)
    pkey, xkey = jax.random.split(key)
    params = init_encoder_params(pkey, n_features, embedding_dim)
    x = jax.random.normal(xkey, (batch, seq_len, n_features), dtype=jnp.float32)

    out = jax.block_until_ready(encoder_forward(params, x))
    ref = jax.block_until_ready(encoder_reference(params, x))

    assert out.shape == (batch, embedding_dim), out.shape
    assert bool(jnp.all(jnp.isfinite(out)))
    assert bool(jnp.allclose(out, ref, atol=1e-3, rtol=1e-3)), float(
        jnp.max(jnp.abs(out - ref)))
    print("KERNEL_OK")
</pallas_src>

<mosaic_0001>
module attributes {stable_mosaic.version = 11 : i64} {
  func.func @_encoder_kernel(%arg0: memref<2x32xf32, #tpu.memory_space<vmem>>, %arg1: memref<4x256xf32, #tpu.memory_space<vmem>>, %arg2: memref<64x256xf32, #tpu.memory_space<vmem>>, %arg3: memref<1x256xf32, #tpu.memory_space<vmem>>, %arg4: memref<64x256xf32, #tpu.memory_space<vmem>>, %arg5: memref<64x256xf32, #tpu.memory_space<vmem>>, %arg6: memref<1x256xf32, #tpu.memory_space<vmem>>, %arg7: memref<64x128xf32, #tpu.memory_space<vmem>>, %arg8: memref<32x128xf32, #tpu.memory_space<vmem>>, %arg9: memref<1x128xf32, #tpu.memory_space<vmem>>, %arg10: memref<32x32xf32, #tpu.memory_space<vmem>>, %arg11: memref<1x32xf32, #tpu.memory_space<vmem>>, %arg12: memref<2x32xf32, #tpu.memory_space<vmem>>, %arg13: memref<8x2x256xf32, #tpu.memory_space<vmem>>, %arg14: memref<8x2x256xf32, #tpu.memory_space<vmem>>, %arg15: memref<8x2x128xf32, #tpu.memory_space<vmem>>) attributes {dimension_semantics = [], scalar_prefetch = 0 : i64, scratch_operands = 3 : i64, tpu.core_type = #tpu.core_type<tc>} {
    %c0 = arith.constant 0 : index
    %c0_0 = arith.constant 0 : index
    %0 = vector.load %arg0[%c0, %c0_0] : memref<2x32xf32, #tpu.memory_space<vmem>>, vector<2x32xf32>
    %cst = arith.constant 0.000000e+00 : f32
    %1 = vector.broadcast %cst : f32 to vector<2x64xf32>
    %cst_1 = arith.constant 0.000000e+00 : f32
    %2 = vector.broadcast %cst_1 : f32 to vector<2x64xf32>
    %3 = vector.extract_strided_slice %0 {offsets = [0, 0], sizes = [2, 4], strides = [1, 1]} : vector<2x32xf32> to vector<2x4xf32>
    %c0_2 = arith.constant 0 : index
    %c0_3 = arith.constant 0 : index
    %4 = vector.load %arg1[%c0_2, %c0_3] : memref<4x256xf32, #tpu.memory_space<vmem>>, vector<4x256xf32>
    %cst_4 = arith.constant dense<0.000000e+00> : vector<2x256xf32>
    %5 = tpu.matmul %3, %4, %cst_4 {dimension_numbers = #tpu.dot_dimension_numbers<[1], [0], [0], [1], [0, 0, 1, 1], [], []>} : vector<2x4xf32>, vector<4x256xf32>, vector<2x256xf32> -> vector<2x256xf32>
    %c0_5 = arith.constant 0 : index
    %c0_6 = arith.constant 0 : index
    %6 = vector.load %arg3[%c0_5, %c0_6] : memref<1x256xf32, #tpu.memory_space<vmem>>, vector<1x256xf32>
    %7 = vector.broadcast %6 : vector<1x256xf32> to vector<2x256xf32>
    %8 = arith.addf %5, %7 : vector<2x256xf32>
    %c0_7 = arith.constant 0 : index
    %c0_8 = arith.constant 0 : index
    %9 = vector.load %arg2[%c0_7, %c0_8] : memref<64x256xf32, #tpu.memory_space<vmem>>, vector<64x256xf32>
    %cst_9 = arith.constant dense<0.000000e+00> : vector<2x256xf32>
    %10 = tpu.matmul %1, %9, %cst_9 {dimension_numbers = #tpu.dot_dimension_numbers<[1], [0], [0], [1], [0, 0, 1, 1], [], []>} : vector<2x64xf32>, vector<64x256xf32>, vector<2x256xf32> -> vector<2x256xf32>
    %11 = arith.addf %8, %10 : vector<2x256xf32>
    %12 = arith.negf %11 : vector<2x256xf32>
    %13 = math.exp %12 : vector<2x256xf32>
    %cst_10 = arith.constant 1.000000e+00 : f32
    %14 = vector.broadcast %cst_10 : f32 to vector<2x256xf32>
    %15 = arith.addf %14, %13 : vector<2x256xf32>
    %16 = arith.divf %14, %15 : vector<2x256xf32>
    %17 = math.tanh %11 : vector<2x256xf32>
    %18 = vector.extract_strided_slice %16 {offsets = [0, 0], sizes = [2, 64], strides = [1, 1]} : vector<2x256xf32> to vector<2x64xf32>
    %19 = vector.extract_strided_slice %16 {offsets = [0, 64], sizes = [2, 64], strides = [1, 1]} : vector<2x256xf32> to vector<2x64xf32>
    %20 = vector.extract_strided_slice %17 {offsets = [0, 128], sizes = [2, 64], strides = [1, 1]} : vector<2x256xf32> to vector<2x64xf32>
    %21 = vector.extract_strided_slice %16 {offsets = [0, 192], sizes = [2, 64], strides = [1, 1]} : vector<2x256xf32> to vector<2x64xf32>
    %22 = arith.mulf %19, %2 : vector<2x64xf32>
    %23 = arith.mulf %18, %20 : vector<2x64xf32>
    %24 = arith.addf %22, %23 : vector<2x64xf32>
    %25 = math.tanh %24 : vector<2x64xf32>
    %26 = arith.mulf %21, %25 : vector<2x64xf32>
    %c0_11 = arith.constant 0 : index
    %c0_12 = arith.constant 0 : index
    %27 = vector.load %arg4[%c0_11, %c0_12] : memref<64x256xf32, #tpu.memory_space<vmem>>, vector<64x256xf32>
    %cst_13 = arith.constant dense<0.000000e+00> : vector<2x256xf32>
    %28 = tpu.matmul %26, %27, %cst_13 {dimension_numbers = #tpu.dot_dimension_numbers<[1], [0], [0], [1], [0, 0, 1, 1], [], []>} : vector<2x64xf32>, vector<64x256xf32>, vector<2x256xf32> -> vector<2x256xf32>
    %c0_14 = arith.constant 0 : index
    %c0_15 = arith.constant 0 : index
    %29 = vector.load %arg6[%c0_14, %c0_15] : memref<1x256xf32, #tpu.memory_space<vmem>>, vector<1x256xf32>
    %30 = vector.broadcast %29 : vector<1x256xf32> to vector<2x256xf32>
    %31 = arith.addf %28, %30 : vector<2x256xf32>
    %c0_16 = arith.constant 0 : index
    %c0_17 = arith.constant 0 : index
    %c0_18 = arith.constant 0 : index
    %32 = vector.load %arg13[%c0_16, %c0_17, %c0_18] : memref<8x2x256xf32, #tpu.memory_space<vmem>>, vector<1x2x256xf32>
    %33 = vector.shape_cast %32 : vector<1x2x256xf32> to vector<2x256xf32>
    %34 = vector.shape_cast %31 : vector<2x256xf32> to vector<1x2x256xf32>
    tpu.vector_store %arg13[%c0_16, %c0_17, %c0_18], %34 {strides = array<i32>} : memref<8x2x256xf32, #tpu.memory_space<vmem>>, vector<1x2x256xf32>,
    %35 = vector.extract_strided_slice %0 {offsets = [0, 4], sizes = [2, 4], strides = [1, 1]} : vector<2x32xf32> to vector<2x4xf32>
    %c0_19 = arith.constant 0 : index
    %c0_20 = arith.constant 0 : index
    %36 = vector.load %arg1[%c0_19, %c0_20] : memref<4x256xf32, #tpu.memory_space<vmem>>, vector<4x256xf32>
    %cst_21 = arith.constant dense<0.000000e+00> : vector<2x256xf32>
    %37 = tpu.matmul %35, %36, %cst_21 {dimension_numbers = #tpu.dot_dimension_numbers<[1], [0], [0], [1], [0, 0, 1, 1], [], []>} : vector<2x4xf32>, vector<4x256xf32>, vector<2x256xf32> -> vector<2x256xf32>
    %c0_22 = arith.constant 0 : index
    %c0_23 = arith.constant 0 : index
    %38 = vector.load %arg3[%c0_22, %c0_23] : memref<1x256xf32, #tpu.memory_space<vmem>>, vector<1x256xf32>
    %39 = vector.broadcast %38 : vector<1x256xf32> to vector<2x256xf32>
    %40 = arith.addf %37, %39 : vector<2x256xf32>
    %c0_24 = arith.constant 0 : index
    %c0_25 = arith.constant 0 : index
    %41 = vector.load %arg2[%c0_24, %c0_25] : memref<64x256xf32, #tpu.memory_space<vmem>>, vector<64x256xf32>
    %cst_26 = arith.constant dense<0.000000e+00> : vector<2x256xf32>
    %42 = tpu.matmul %26, %41, %cst_26 {dimension_numbers = #tpu.dot_dimension_numbers<[1], [0], [0], [1], [0, 0, 1, 1], [], []>} : vector<2x64xf32>, vector<64x256xf32>, vector<2x256xf32> -> vector<2x256xf32>
    %43 = arith.addf %40, %42 : vector<2x256xf32>
    %44 = arith.negf %43 : vector<2x256xf32>
    %45 = math.exp %44 : vector<2x256xf32>
    %cst_27 = arith.constant 1.000000e+00 : f32
    %46 = vector.broadcast %cst_27 : f32 to vector<2x256xf32>
    %47 = arith.addf %46, %45 : vector<2x256xf32>
    %48 = arith.divf %46, %47 : vector<2x256xf32>
    %49 = math.tanh %43 : vector<2x256xf32>
    %50 = vector.extract_strided_slice %48 {offsets = [0, 0], sizes = [2, 64], strides = [1, 1]} : vector<2x256xf32> to vector<2x64xf32>
    %51 = vector.extract_strided_slice %48 {offsets = [0, 64], sizes = [2, 64], strides = [1, 1]} : vector<2x256xf32> to vector<2x64xf32>
    %52 = vector.extract_strided_slice %49 {offsets = [0, 128], sizes = [2, 64], strides = [1, 1]} : vector<2x256xf32> to vector<2x64xf32>
    %53 = vector.extract_strided_slice %48 {offsets = [0, 192], sizes = [2, 64], strides = [1, 1]} : vector<2x256xf32> to vector<2x64xf32>
    %54 = arith.mulf %51, %24 : vector<2x64xf32>
    %55 = arith.mulf %50, %52 : vector<2x64xf32>
    %56 = arith.addf %54, %55 : vector<2x64xf32>
    %57 = math.tanh %56 : vector<2x64xf32>
    %58 = arith.mulf %53, %57 : vector<2x64xf32>
    %c0_28 = arith.constant 0 : index
    %c0_29 = arith.constant 0 : index
    %59 = vector.load %arg4[%c0_28, %c0_29] : memref<64x256xf32, #tpu.memory_space<vmem>>, vector<64x256xf32>
    %cst_30 = arith.constant dense<0.000000e+00> : vector<2x256xf32>
    %60 = tpu.matmul %58, %59, %cst_30 {dimension_numbers = #tpu.dot_dimension_numbers<[1], [0], [0], [1], [0, 0, 1, 1], [], []>} : vector<2x64xf32>, vector<64x256xf32>, vector<2x256xf32> -> vector<2x256xf32>
    %c0_31 = arith.constant 0 : index
    %c0_32 = arith.constant 0 : index
    %61 = vector.load %arg6[%c0_31, %c0_32] : memref<1x256xf32, #tpu.memory_space<vmem>>, vector<1x256xf32>
    %62 = vector.broadcast %61 : vector<1x256xf32> to vector<2x256xf32>
    %63 = arith.addf %60, %62 : vector<2x256xf32>
    %c1 = arith.constant 1 : index
    %c0_33 = arith.constant 0 : index
    %c0_34 = arith.constant 0 : index
    %64 = vector.load %arg13[%c1, %c0_33, %c0_34] : memref<8x2x256xf32, #tpu.memory_space<vmem>>, vector<1x2x256xf32>
    %65 = vector.shape_cast %64 : vector<1x2x256xf32> to vector<2x256xf32>
    %66 = vector.shape_cast %63 : vector<2x256xf32> to vector<1x2x256xf32>
    tpu.vector_store %arg13[%c1, %c0_33, %c0_34], %66 {strides = array<i32>} : memref<8x2x256xf32, #tpu.memory_space<vmem>>, vector<1x2x256xf32>,
    %67 = vector.extract_strided_slice %0 {offsets = [0, 8], sizes = [2, 4], strides = [1, 1]} : vector<2x32xf32> to vector<2x4xf32>
    %c0_35 = arith.constant 0 : index
    %c0_36 = arith.constant 0 : index
    %68 = vector.load %arg1[%c0_35, %c0_36] : memref<4x256xf32, #tpu.memory_space<vmem>>, vector<4x256xf32>
    %cst_37 = arith.constant dense<0.000000e+00> : vector<2x256xf32>
    %69 = tpu.matmul %67, %68, %cst_37 {dimension_numbers = #tpu.dot_dimension_numbers<[1], [0], [0], [1], [0, 0, 1, 1], [], []>} : vector<2x4xf32>, vector<4x256xf32>, vector<2x256xf32> -> vector<2x256xf32>
    %c0_38 = arith.constant 0 : index
    %c0_39 = arith.constant 0 : index
    %70 = vector.load %arg3[%c0_38, %c0_39] : memref<1x256xf32, #tpu.memory_space<vmem>>, vector<1x256xf32>
    %71 = vector.broadcast %70 : vector<1x256xf32> to vector<2x256xf32>
    %72 = arith.addf %69, %71 : vector<2x256xf32>
    %c0_40 = arith.constant 0 : index
    %c0_41 = arith.constant 0 : index
    %73 = vector.load %arg2[%c0_40, %c0_41] : memref<64x256xf32, #tpu.memory_space<vmem>>, vector<64x256xf32>
    %cst_42 = arith.constant dense<0.000000e+00> : vector<2x256xf32>
    %74 = tpu.matmul %58, %73, %cst_42 {dimension_numbers = #tpu.dot_dimension_numbers<[1], [0], [0], [1], [0, 0, 1, 1], [], []>} : vector<2x64xf32>, vector<64x256xf32>, vector<2x256xf32> -> vector<2x256xf32>
    %75 = arith.addf %72, %74 : vector<2x256xf32>
    %76 = arith.negf %75 : vector<2x256xf32>
    %77 = math.exp %76 : vector<2x256xf32>
    %cst_43 = arith.constant 1.000000e+00 : f32
    %78 = vector.broadcast %cst_43 : f32 to vector<2x256xf32>
    %79 = arith.addf %78, %77 : vector<2x256xf32>
    %80 = arith.divf %78, %79 : vector<2x256xf32>
    %81 = math.tanh %75 : vector<2x256xf32>
    %82 = vector.extract_strided_slice %80 {offsets = [0, 0], sizes = [2, 64], strides = [1, 1]} : vector<2x256xf32> to vector<2x64xf32>
    %83 = vector.extract_strided_slice %80 {offsets = [0, 64], sizes = [2, 64], strides = [1, 1]} : vector<2x256xf32> to vector<2x64xf32>
    %84 = vector.extract_strided_slice %81 {offsets = [0, 128], sizes = [2, 64], strides = [1, 1]} : vector<2x256xf32> to vector<2x64xf32>
    %85 = vector.extract_strided_slice %80 {offsets = [0, 192], sizes = [2, 64], strides = [1, 1]} : vector<2x256xf32> to vector<2x64xf32>
    %86 = arith.mulf %83, %56 : vector<2x64xf32>
    %87 = arith.mulf %82, %84 : vector<2x64xf32>
    %88 = arith.addf %86, %87 : vector<2x64xf32>
    %89 = math.tanh %88 : vector<2x64xf32>
    %90 = arith.mulf %85, %89 : vector<2x64xf32>
    %c0_44 = arith.constant 0 : index
    %c0_45 = arith.constant 0 : index
    %91 = vector.load %arg4[%c0_44, %c0_45] : memref<64x256xf32, #tpu.memory_space<vmem>>, vector<64x256xf32>
    %cst_46 = arith.constant dense<0.000000e+00> : vector<2x256xf32>
    %92 = tpu.matmul %90, %91, %cst_46 {dimension_numbers = #tpu.dot_dimension_numbers<[1], [0], [0], [1], [0, 0, 1, 1], [], []>} : vector<2x64xf32>, vector<64x256xf32>, vector<2x256xf32> -> vector<2x256xf32>
    %c0_47 = arith.constant 0 : index
    %c0_48 = arith.constant 0 : index
    %93 = vector.load %arg6[%c0_47, %c0_48] : memref<1x256xf32, #tpu.memory_space<vmem>>, vector<1x256xf32>
    %94 = vector.broadcast %93 : vector<1x256xf32> to vector<2x256xf32>
    %95 = arith.addf %92, %94 : vector<2x256xf32>
    %c2 = arith.constant 2 : index
    %c0_49 = arith.constant 0 : index
    %c0_50 = arith.constant 0 : index
    %96 = vector.load %arg13[%c2, %c0_49, %c0_50] : memref<8x2x256xf32, #tpu.memory_space<vmem>>, vector<1x2x256xf32>
    %97 = vector.shape_cast %96 : vector<1x2x256xf32> to vector<2x256xf32>
    %98 = vector.shape_cast %95 : vector<2x256xf32> to vector<1x2x256xf32>
    tpu.vector_store %arg13[%c2, %c0_49, %c0_50], %98 {strides = array<i32>} : memref<8x2x256xf32, #tpu.memory_space<vmem>>, vector<1x2x256xf32>,
    %99 = vector.extract_strided_slice %0 {offsets = [0, 12], sizes = [2, 4], strides = [1, 1]} : vector<2x32xf32> to vector<2x4xf32>
    %c0_51 = arith.constant 0 : index
    %c0_52 = arith.constant 0 : index
    %100 = vector.load %arg1[%c0_51, %c0_52] : memref<4x256xf32, #tpu.memory_space<vmem>>, vector<4x256xf32>
    %cst_53 = arith.constant dense<0.000000e+00> : vector<2x256xf32>
    %101 = tpu.matmul %99, %100, %cst_53 {dimension_numbers = #tpu.dot_dimension_numbers<[1], [0], [0], [1], [0, 0, 1, 1], [], []>} : vector<2x4xf32>, vector<4x256xf32>, vector<2x256xf32> -> vector<2x256xf32>
    %c0_54 = arith.constant 0 : index
    %c0_55 = arith.constant 0 : index
    %102 = vector.load %arg3[%c0_54, %c0_55] : memref<1x256xf32, #tpu.memory_space<vmem>>, vector<1x256xf32>
    %103 = vector.broadcast %102 : vector<1x256xf32> to vector<2x256xf32>
    %104 = arith.addf %101, %103 : vector<2x256xf32>
    %c0_56 = arith.constant 0 : index
    %c0_57 = arith.constant 0 : index
    %105 = vector.load %arg2[%c0_56, %c0_57] : memref<64x256xf32, #tpu.memory_space<vmem>>, vector<64x256xf32>
    %cst_58 = arith.constant dense<0.000000e+00> : vector<2x256xf32>
    %106 = tpu.matmul %90, %105, %cst_58 {dimension_numbers = #tpu.dot_dimension_numbers<[1], [0], [0], [1], [0, 0, 1, 1], [], []>} : vector<2x64xf32>, vector<64x256xf32>, vector<2x256xf32> -> vector<2x256xf32>
    %107 = arith.addf %104, %106 : vector<2x256xf32>
    %108 = arith.negf %107 : vector<2x256xf32>
    %109 = math.exp %108 : vector<2x256xf32>
    %cst_59 = arith.constant 1.000000e+00 : f32
    %110 = vector.broadcast %cst_59 : f32 to vector<2x256xf32>
    %111 = arith.addf %110, %109 : vector<2x256xf32>
    %112 = arith.divf %110, %111 : vector<2x256xf32>
    %113 = math.tanh %107 : vector<2x256xf32>
    %114 = vector.extract_strided_slice %112 {offsets = [0, 0], sizes = [2, 64], strides = [1, 1]} : vector<2x256xf32> to vector<2x64xf32>
    %115 = vector.extract_strided_slice %112 {offsets = [0, 64], sizes = [2, 64], strides = [1, 1]} : vector<2x256xf32> to vector<2x64xf32>
    %116 = vector.extract_strided_slice %113 {offsets = [0, 128], sizes = [2, 64], strides = [1, 1]} : vector<2x256xf32> to vector<2x64xf32>
    %117 = vector.extract_strided_slice %112 {offsets = [0, 192], sizes = [2, 64], strides = [1, 1]} : vector<2x256xf32> to vector<2x64xf32>
    %118 = arith.mulf %115, %88 : vector<2x64xf32>
    %119 = arith.mulf %114, %116 : vector<2x64xf32>
    %120 = arith.addf %118, %119 : vector<2x64xf32>
    %121 = math.tanh %120 : vector<2x64xf32>
    %122 = arith.mulf %117, %121 : vector<2x64xf32>
    %c0_60 = arith.constant 0 : index
    %c0_61 = arith.constant 0 : index
    %123 = vector.load %arg4[%c0_60, %c0_61] : memref<64x256xf32, #tpu.memory_space<vmem>>, vector<64x256xf32>
    %cst_62 = arith.constant dense<0.000000e+00> : vector<2x256xf32>
    %124 = tpu.matmul %122, %123, %cst_62 {dimension_numbers = #tpu.dot_dimension_numbers<[1], [0], [0], [1], [0, 0, 1, 1], [], []>} : vector<2x64xf32>, vector<64x256xf32>, vector<2x256xf32> -> vector<2x256xf32>
    %c0_63 = arith.constant 0 : index
    %c0_64 = arith.constant 0 : index
    %125 = vector.load %arg6[%c0_63, %c0_64] : memref<1x256xf32, #tpu.memory_space<vmem>>, vector<1x256xf32>
    %126 = vector.broadcast %125 : vector<1x256xf32> to vector<2x256xf32>
    %127 = arith.addf %124, %126 : vector<2x256xf32>
    %c3 = arith.constant 3 : index
    %c0_65 = arith.constant 0 : index
    %c0_66 = arith.constant 0 : index
    %128 = vector.load %arg13[%c3, %c0_65, %c0_66] : memref<8x2x256xf32, #tpu.memory_space<vmem>>, vector<1x2x256xf32>
    %129 = vector.shape_cast %128 : vector<1x2x256xf32> to vector<2x256xf32>
    %130 = vector.shape_cast %127 : vector<2x256xf32> to vector<1x2x256xf32>
    tpu.vector_store %arg13[%c3, %c0_65, %c0_66], %130 {strides = array<i32>} : memref<8x2x256xf32, #tpu.memory_space<vmem>>, vector<1x2x256xf32>,
    %131 = vector.extract_strided_slice %0 {offsets = [0, 16], sizes = [2, 4], strides = [1, 1]} : vector<2x32xf32> to vector<2x4xf32>
    %c0_67 = arith.constant 0 : index
    %c0_68 = arith.constant 0 : index
    %132 = vector.load %arg1[%c0_67, %c0_68] : memref<4x256xf32, #tpu.memory_space<vmem>>, vector<4x256xf32>
    %cst_69 = arith.constant dense<0.000000e+00> : vector<2x256xf32>
    %133 = tpu.matmul %131, %132, %cst_69 {dimension_numbers = #tpu.dot_dimension_numbers<[1], [0], [0], [1], [0, 0, 1, 1], [], []>} : vector<2x4xf32>, vector<4x256xf32>, vector<2x256xf32> -> vector<2x256xf32>
    %c0_70 = arith.constant 0 : index
    %c0_71 = arith.constant 0 : index
    %134 = vector.load %arg3[%c0_70, %c0_71] : memref<1x256xf32, #tpu.memory_space<vmem>>, vector<1x256xf32>
    %135 = vector.broadcast %134 : vector<1x256xf32> to vector<2x256xf32>
    %136 = arith.addf %133, %135 : vector<2x256xf32>
    %c0_72 = arith.constant 0 : index
    %c0_73 = arith.constant 0 : index
    %137 = vector.load %arg2[%c0_72, %c0_73] : memref<64x256xf32, #tpu.memory_space<vmem>>, vector<64x256xf32>
    %cst_74 = arith.constant dense<0.000000e+00> : vector<2x256xf32>
    %138 = tpu.matmul %122, %137, %cst_74 {dimension_numbers = #tpu.dot_dimension_numbers<[1], [0], [0], [1], [0, 0, 1, 1], [], []>} : vector<2x64xf32>, vector<64x256xf32>, vector<2x256xf32> -> vector<2x256xf32>
    %139 = arith.addf %136, %138 : vector<2x256xf32>
    %140 = arith.negf %139 : vector<2x256xf32>
    %141 = math.exp %140 : vector<2x256xf32>
    %cst_75 = arith.constant 1.000000e+00 : f32
    %142 = vector.broadcast %cst_75 : f32 to vector<2x256xf32>
    %143 = arith.addf %142, %141 : vector<2x256xf32>
    %144 = arith.divf %142, %143 : vector<2x256xf32>
    %145 = math.tanh %139 : vector<2x256xf32>
    %146 = vector.extract_strided_slice %144 {offsets = [0, 0], sizes = [2, 64], strides = [1, 1]} : vector<2x256xf32> to vector<2x64xf32>
    %147 = vector.extract_strided_slice %144 {offsets = [0, 64], sizes = [2, 64], strides = [1, 1]} : vector<2x256xf32> to vector<2x64xf32>
    %148 = vector.extract_strided_slice %145 {offsets = [0, 128], sizes = [2, 64], strides = [1, 1]} : vector<2x256xf32> to vector<2x64xf32>
    %149 = vector.extract_strided_slice %144 {offsets = [0, 192], sizes = [2, 64], strides = [1, 1]} : vector<2x256xf32> to vector<2x64xf32>
    %150 = arith.mulf %147, %120 : vector<2x64xf32>
    %151 = arith.mulf %146, %148 : vector<2x64xf32>
    %152 = arith.addf %150, %151 : vector<2x64xf32>
    %153 = math.tanh %152 : vector<2x64xf32>
    %154 = arith.mulf %149, %153 : vector<2x64xf32>
    %c0_76 = arith.constant 0 : index
    %c0_77 = arith.constant 0 : index
    %155 = vector.load %arg4[%c0_76, %c0_77] : memref<64x256xf32, #tpu.memory_space<vmem>>, vector<64x256xf32>
    %cst_78 = arith.constant dense<0.000000e+00> : vector<2x256xf32>
    %156 = tpu.matmul %154, %155, %cst_78 {dimension_numbers = #tpu.dot_dimension_numbers<[1], [0], [0], [1], [0, 0, 1, 1], [], []>} : vector<2x64xf32>, vector<64x256xf32>, vector<2x256xf32> -> vector<2x256xf32>
    %c0_79 = arith.constant 0 : index
    %c0_80 = arith.constant 0 : index
    %157 = vector.load %arg6[%c0_79, %c0_80] : memref<1x256xf32, #tpu.memory_space<vmem>>, vector<1x256xf32>
    %158 = vector.broadcast %157 : vector<1x256xf32> to vector<2x256xf32>
    %159 = arith.addf %156, %158 : vector<2x256xf32>
    %c4 = arith.constant 4 : index
    %c0_81 = arith.constant 0 : index
    %c0_82 = arith.constant 0 : index
    %160 = vector.load %arg13[%c4, %c0_81, %c0_82] : memref<8x2x256xf32, #tpu.memory_space<vmem>>, vector<1x2x256xf32>
    %161 = vector.shape_cast %160 : vector<1x2x256xf32> to vector<2x256xf32>
    %162 = vector.shape_cast %159 : vector<2x256xf32> to vector<1x2x256xf32>
    tpu.vector_store %arg13[%c4, %c0_81, %c0_82], %162 {strides = array<i32>} : memref<8x2x256xf32, #tpu.memory_space<vmem>>, vector<1x2x256xf32>,
    %163 = vector.extract_strided_slice %0 {offsets = [0, 20], sizes = [2, 4], strides = [1, 1]} : vector<2x32xf32> to vector<2x4xf32>
    %c0_83 = arith.constant 0 : index
    %c0_84 = arith.constant 0 : index
    %164 = vector.load %arg1[%c0_83, %c0_84] : memref<4x256xf32, #tpu.memory_space<vmem>>, vector<4x256xf32>
    %cst_85 = arith.constant dense<0.000000e+00> : vector<2x256xf32>
    %165 = tpu.matmul %163, %164, %cst_85 {dimension_numbers = #tpu.dot_dimension_numbers<[1], [0], [0], [1], [0, 0, 1, 1], [], []>} : vector<2x4xf32>, vector<4x256xf32>, vector<2x256xf32> -> vector<2x256xf32>
    %c0_86 = arith.constant 0 : index
    %c0_87 = arith.constant 0 : index
    %166 = vector.load %arg3[%c0_86, %c0_87] : memref<1x256xf32, #tpu.memory_space<vmem>>, vector<1x256xf32>
    %167 = vector.broadcast %166 : vector<1x256xf32> to vector<2x256xf32>
    %168 = arith.addf %165, %167 : vector<2x256xf32>
    %c0_88 = arith.constant 0 : index
    %c0_89 = arith.constant 0 : index
    %169 = vector.load %arg2[%c0_88, %c0_89] : memref<64x256xf32, #tpu.memory_space<vmem>>, vector<64x256xf32>
    %cst_90 = arith.constant dense<0.000000e+00> : vector<2x256xf32>
    %170 = tpu.matmul %154, %169, %cst_90 {dimension_numbers = #tpu.dot_dimension_numbers<[1], [0], [0], [1], [0, 0, 1, 1], [], []>} : vector<2x64xf32>, vector<64x256xf32>, vector<2x256xf32> -> vector<2x256xf32>
    %171 = arith.addf %168, %170 : vector<2x256xf32>
    %172 = arith.negf %171 : vector<2x256xf32>
    %173 = math.exp %172 : vector<2x256xf32>
    %cst_91 = arith.constant 1.000000e+00 : f32
    %174 = vector.broadcast %cst_91 : f32 to vector<2x256xf32>
    %175 = arith.addf %174, %173 : vector<2x256xf32>
    %176 = arith.divf %174, %175 : vector<2x256xf32>
    %177 = math.tanh %171 : vector<2x256xf32>
    %178 = vector.extract_strided_slice %176 {offsets = [0, 0], sizes = [2, 64], strides = [1, 1]} : vector<2x256xf32> to vector<2x64xf32>
    %179 = vector.extract_strided_slice %176 {offsets = [0, 64], sizes = [2, 64], strides = [1, 1]} : vector<2x256xf32> to vector<2x64xf32>
    %180 = vector.extract_strided_slice %177 {offsets = [0, 128], sizes = [2, 64], strides = [1, 1]} : vector<2x256xf32> to vector<2x64xf32>
    %181 = vector.extract_strided_slice %176 {offsets = [0, 192], sizes = [2, 64], strides = [1, 1]} : vector<2x256xf32> to vector<2x64xf32>
    %182 = arith.mulf %179, %152 : vector<2x64xf32>
    %183 = arith.mulf %178, %180 : vector<2x64xf32>
    %184 = arith.addf %182, %183 : vector<2x64xf32>
    %185 = math.tanh %184 : vector<2x64xf32>
    %186 = arith.mulf %181, %185 : vector<2x64xf32>
    %c0_92 = arith.constant 0 : index
    %c0_93 = arith.constant 0 : index
    %187 = vector.load %arg4[%c0_92, %c0_93] : memref<64x256xf32, #tpu.memory_space<vmem>>, vector<64x256xf32>
    %cst_94 = arith.constant dense<0.000000e+00> : vector<2x256xf32>
    %188 = tpu.matmul %186, %187, %cst_94 {dimension_numbers = #tpu.dot_dimension_numbers<[1], [0], [0], [1], [0, 0, 1, 1], [], []>} : vector<2x64xf32>, vector<64x256xf32>, vector<2x256xf32> -> vector<2x256xf32>
    %c0_95 = arith.constant 0 : index
    %c0_96 = arith.constant 0 : index
    %189 = vector.load %arg6[%c0_95, %c0_96] : memref<1x256xf32, #tpu.memory_space<vmem>>, vector<1x256xf32>
    %190 = vector.broadcast %189 : vector<1x256xf32> to vector<2x256xf32>
    %191 = arith.addf %188, %190 : vector<2x256xf32>
    %c5 = arith.constant 5 : index
    %c0_97 = arith.constant 0 : index
    %c0_98 = arith.constant 0 : index
    %192 = vector.load %arg13[%c5, %c0_97, %c0_98] : memref<8x2x256xf32, #tpu.memory_space<vmem>>, vector<1x2x256xf32>
    %193 = vector.shape_cast %192 : vector<1x2x256xf32> to vector<2x256xf32>
    %194 = vector.shape_cast %191 : vector<2x256xf32> to vector<1x2x256xf32>
    tpu.vector_store %arg13[%c5, %c0_97, %c0_98], %194 {strides = array<i32>} : memref<8x2x256xf32, #tpu.memory_space<vmem>>, vector<1x2x256xf32>,
    %195 = vector.extract_strided_slice %0 {offsets = [0, 24], sizes = [2, 4], strides = [1, 1]} : vector<2x32xf32> to vector<2x4xf32>
    %c0_99 = arith.constant 0 : index
    %c0_100 = arith.constant 0 : index
    %196 = vector.load %arg1[%c0_99, %c0_100] : memref<4x256xf32, #tpu.memory_space<vmem>>, vector<4x256xf32>
    %cst_101 = arith.constant dense<0.000000e+00> : vector<2x256xf32>
    %197 = tpu.matmul %195, %196, %cst_101 {dimension_numbers = #tpu.dot_dimension_numbers<[1], [0], [0], [1], [0, 0, 1, 1], [], []>} : vector<2x4xf32>, vector<4x256xf32>, vector<2x256xf32> -> vector<2x256xf32>
    %c0_102 = arith.constant 0 : index
    %c0_103 = arith.constant 0 : index
    %198 = vector.load %arg3[%c0_102, %c0_103] : memref<1x256xf32, #tpu.memory_space<vmem>>, vector<1x256xf32>
    %199 = vector.broadcast %198 : vector<1x256xf32> to vector<2x256xf32>
    %200 = arith.addf %197, %199 : vector<2x256xf32>
    %c0_104 = arith.constant 0 : index
    %c0_105 = arith.constant 0 : index
    %201 = vector.load %arg2[%c0_104, %c0_105] : memref<64x256xf32, #tpu.memory_space<vmem>>, vector<64x256xf32>
    %cst_106 = arith.constant dense<0.000000e+00> : vector<2x256xf32>
    %202 = tpu.matmul %186, %201, %cst_106 {dimension_numbers = #tpu.dot_dimension_numbers<[1], [0], [0], [1], [0, 0, 1, 1], [], []>} : vector<2x64xf32>, vector<64x256xf32>, vector<2x256xf32> -> vector<2x256xf32>
    %203 = arith.addf %200, %202 : vector<2x256xf32>
    %204 = arith.negf %203 : vector<2x256xf32>
    %205 = math.exp %204 : vector<2x256xf32>
    %cst_107 = arith.constant 1.000000e+00 : f32
    %206 = vector.broadcast %cst_107 : f32 to vector<2x256xf32>
    %207 = arith.addf %206, %205 : vector<2x256xf32>
    %208 = arith.divf %206, %207 : vector<2x256xf32>
    %209 = math.tanh %203 : vector<2x256xf32>
    %210 = vector.extract_strided_slice %208 {offsets = [0, 0], sizes = [2, 64], strides = [1, 1]} : vector<2x256xf32> to vector<2x64xf32>
    %211 = vector.extract_strided_slice %208 {offsets = [0, 64], sizes = [2, 64], strides = [1, 1]} : vector<2x256xf32> to vector<2x64xf32>
    %212 = vector.extract_strided_slice %209 {offsets = [0, 128], sizes = [2, 64], strides = [1, 1]} : vector<2x256xf32> to vector<2x64xf32>
    %213 = vector.extract_strided_slice %208 {offsets = [0, 192], sizes = [2, 64], strides = [1, 1]} : vector<2x256xf32> to vector<2x64xf32>
    %214 = arith.mulf %211, %184 : vector<2x64xf32>
    %215 = arith.mulf %210, %212 : vector<2x64xf32>
    %216 = arith.addf %214, %215 : vector<2x64xf32>
    %217 = math.tanh %216 : vector<2x64xf32>
    %218 = arith.mulf %213, %217 : vector<2x64xf32>
    %c0_108 = arith.constant 0 : index
    %c0_109 = arith.constant 0 : index
    %219 = vector.load %arg4[%c0_108, %c0_109] : memref<64x256xf32, #tpu.memory_space<vmem>>, vector<64x256xf32>
    %cst_110 = arith.constant dense<0.000000e+00> : vector<2x256xf32>
    %220 = tpu.matmul %218, %219, %cst_110 {dimension_numbers = #tpu.dot_dimension_numbers<[1], [0], [0], [1], [0, 0, 1, 1], [], []>} : vector<2x64xf32>, vector<64x256xf32>, vector<2x256xf32> -> vector<2x256xf32>
    %c0_111 = arith.constant 0 : index
    %c0_112 = arith.constant 0 : index
    %221 = vector.load %arg6[%c0_111, %c0_112] : memref<1x256xf32, #tpu.memory_space<vmem>>, vector<1x256xf32>
    %222 = vector.broadcast %221 : vector<1x256xf32> to vector<2x256xf32>
    %223 = arith.addf %220, %222 : vector<2x256xf32>
    %c6 = arith.constant 6 : index
    %c0_113 = arith.constant 0 : index
    %c0_114 = arith.constant 0 : index
    %224 = vector.load %arg13[%c6, %c0_113, %c0_114] : memref<8x2x256xf32, #tpu.memory_space<vmem>>, vector<1x2x256xf32>
    %225 = vector.shape_cast %224 : vector<1x2x256xf32> to vector<2x256xf32>
    %226 = vector.shape_cast %223 : vector<2x256xf32> to vector<1x2x256xf32>
    tpu.vector_store %arg13[%c6, %c0_113, %c0_114], %226 {strides = array<i32>} : memref<8x2x256xf32, #tpu.memory_space<vmem>>, vector<1x2x256xf32>,
    %227 = vector.extract_strided_slice %0 {offsets = [0, 28], sizes = [2, 4], strides = [1, 1]} : vector<2x32xf32> to vector<2x4xf32>
    %c0_115 = arith.constant 0 : index
    %c0_116 = arith.constant 0 : index
    %228 = vector.load %arg1[%c0_115, %c0_116] : memref<4x256xf32, #tpu.memory_space<vmem>>, vector<4x256xf32>
    %cst_117 = arith.constant dense<0.000000e+00> : vector<2x256xf32>
    %229 = tpu.matmul %227, %228, %cst_117 {dimension_numbers = #tpu.dot_dimension_numbers<[1], [0], [0], [1], [0, 0, 1, 1], [], []>} : vector<2x4xf32>, vector<4x256xf32>, vector<2x256xf32> -> vector<2x256xf32>
    %c0_118 = arith.constant 0 : index
    %c0_119 = arith.constant 0 : index
    %230 = vector.load %arg3[%c0_118, %c0_119] : memref<1x256xf32, #tpu.memory_space<vmem>>, vector<1x256xf32>
    %231 = vector.broadcast %230 : vector<1x256xf32> to vector<2x256xf32>
    %232 = arith.addf %229, %231 : vector<2x256xf32>
    %c0_120 = arith.constant 0 : index
    %c0_121 = arith.constant 0 : index
    %233 = vector.load %arg2[%c0_120, %c0_121] : memref<64x256xf32, #tpu.memory_space<vmem>>, vector<64x256xf32>
    %cst_122 = arith.constant dense<0.000000e+00> : vector<2x256xf32>
    %234 = tpu.matmul %218, %233, %cst_122 {dimension_numbers = #tpu.dot_dimension_numbers<[1], [0], [0], [1], [0, 0, 1, 1], [], []>} : vector<2x64xf32>, vector<64x256xf32>, vector<2x256xf32> -> vector<2x256xf32>
    %235 = arith.addf %232, %234 : vector<2x256xf32>
    %236 = arith.negf %235 : vector<2x256xf32>
    %237 = math.exp %236 : vector<2x256xf32>
    %cst_123 = arith.constant 1.000000e+00 : f32
    %238 = vector.broadcast %cst_123 : f32 to vector<2x256xf32>
    %239 = arith.addf %238, %237 : vector<2x256xf32>
    %240 = arith.divf %238, %239 : vector<2x256xf32>
    %241 = math.tanh %235 : vector<2x256xf32>
    %242 = vector.extract_strided_slice %240 {offsets = [0, 0], sizes = [2, 64], strides = [1, 1]} : vector<2x256xf32> to vector<2x64xf32>
    %243 = vector.extract_strided_slice %240 {offsets = [0, 64], sizes = [2, 64], strides = [1, 1]} : vector<2x256xf32> to vector<2x64xf32>
    %244 = vector.extract_strided_slice %241 {offsets = [0, 128], sizes = [2, 64], strides = [1, 1]} : vector<2x256xf32> to vector<2x64xf32>
    %245 = vector.extract_strided_slice %240 {offsets = [0, 192], sizes = [2, 64], strides = [1, 1]} : vector<2x256xf32> to vector<2x64xf32>
    %246 = arith.mulf %243, %216 : vector<2x64xf32>
    %247 = arith.mulf %242, %244 : vector<2x64xf32>
    %248 = arith.addf %246, %247 : vector<2x64xf32>
    %249 = math.tanh %248 : vector<2x64xf32>
    %250 = arith.mulf %245, %249 : vector<2x64xf32>
    %c0_124 = arith.constant 0 : index
    %c0_125 = arith.constant 0 : index
    %251 = vector.load %arg4[%c0_124, %c0_125] : memref<64x256xf32, #tpu.memory_space<vmem>>, vector<64x256xf32>
    %cst_126 = arith.constant dense<0.000000e+00> : vector<2x256xf32>
    %252 = tpu.matmul %250, %251, %cst_126 {dimension_numbers = #tpu.dot_dimension_numbers<[1], [0], [0], [1], [0, 0, 1, 1], [], []>} : vector<2x64xf32>, vector<64x256xf32>, vector<2x256xf32> -> vector<2x256xf32>
    %c0_127 = arith.constant 0 : index
    %c0_128 = arith.constant 0 : index
    %253 = vector.load %arg6[%c0_127, %c0_128] : memref<1x256xf32, #tpu.memory_space<vmem>>, vector<1x256xf32>
    %254 = vector.broadcast %253 : vector<1x256xf32> to vector<2x256xf32>
    %255 = arith.addf %252, %254 : vector<2x256xf32>
    %c7 = arith.constant 7 : index
    %c0_129 = arith.constant 0 : index
    %c0_130 = arith.constant 0 : index
    %256 = vector.load %arg13[%c7, %c0_129, %c0_130] : memref<8x2x256xf32, #tpu.memory_space<vmem>>, vector<1x2x256xf32>
    %257 = vector.shape_cast %256 : vector<1x2x256xf32> to vector<2x256xf32>
    %258 = vector.shape_cast %255 : vector<2x256xf32> to vector<1x2x256xf32>
    tpu.vector_store %arg13[%c7, %c0_129, %c0_130], %258 {strides = array<i32>} : memref<8x2x256xf32, #tpu.memory_space<vmem>>, vector<1x2x256xf32>,
    %cst_131 = arith.constant 0.000000e+00 : f32
    %259 = vector.broadcast %cst_131 : f32 to vector<2x64xf32>
    %cst_132 = arith.constant 0.000000e+00 : f32
    %260 = vector.broadcast %cst_132 : f32 to vector<2x64xf32>
    %c0_133 = arith.constant 0 : index
    %c0_134 = arith.constant 0 : index
    %c0_135 = arith.constant 0 : index
    %261 = vector.load %arg13[%c0_133, %c0_134, %c0_135] : memref<8x2x256xf32, #tpu.memory_space<vmem>>, vector<1x2x256xf32>
    %262 = vector.shape_cast %261 : vector<1x2x256xf32> to vector<2x256xf32>
    %c0_136 = arith.constant 0 : index
    %c0_137 = arith.constant 0 : index
    %263 = vector.load %arg5[%c0_136, %c0_137] : memref<64x256xf32, #tpu.memory_space<vmem>>, vector<64x256xf32>
    %cst_138 = arith.constant dense<0.000000e+00> : vector<2x256xf32>
    %264 = tpu.matmul %259, %263, %cst_138 {dimension_numbers = #tpu.dot_dimension_numbers<[1], [0], [0], [1], [0, 0, 1, 1], [], []>} : vector<2x64xf32>, vector<64x256xf32>, vector<2x256xf32> -> vector<2x256xf32>
    %265 = arith.addf %262, %264 : vector<2x256xf32>
    %266 = arith.negf %265 : vector<2x256xf32>
    %267 = math.exp %266 : vector<2x256xf32>
    %cst_139 = arith.constant 1.000000e+00 : f32
    %268 = vector.broadcast %cst_139 : f32 to vector<2x256xf32>
    %269 = arith.addf %268, %267 : vector<2x256xf32>
    %270 = arith.divf %268, %269 : vector<2x256xf32>
    %271 = math.tanh %265 : vector<2x256xf32>
    %272 = vector.extract_strided_slice %270 {offsets = [0, 0], sizes = [2, 64], strides = [1, 1]} : vector<2x256xf32> to vector<2x64xf32>
    %273 = vector.extract_strided_slice %270 {offsets = [0, 64], sizes = [2, 64], strides = [1, 1]} : vector<2x256xf32> to vector<2x64xf32>
    %274 = vector.extract_strided_slice %271 {offsets = [0, 128], sizes = [2, 64], strides = [1, 1]} : vector<2x256xf32> to vector<2x64xf32>
    %275 = vector.extract_strided_slice %270 {offsets = [0, 192], sizes = [2, 64], strides = [1, 1]} : vector<2x256xf32> to vector<2x64xf32>
    %276 = arith.mulf %273, %260 : vector<2x64xf32>
    %277 = arith.mulf %272, %274 : vector<2x64xf32>
    %278 = arith.addf %276, %277 : vector<2x64xf32>
    %279 = math.tanh %278 : vector<2x64xf32>
    %280 = arith.mulf %275, %279 : vector<2x64xf32>
    %c0_140 = arith.constant 0 : index
    %c0_141 = arith.constant 0 : index
    %281 = vector.load %arg4[%c0_140, %c0_141] : memref<64x256xf32, #tpu.memory_space<vmem>>, vector<64x256xf32>
    %cst_142 = arith.constant dense<0.000000e+00> : vector<2x256xf32>
    %282 = tpu.matmul %280, %281, %cst_142 {dimension_numbers = #tpu.dot_dimension_numbers<[1], [0], [0], [1], [0, 0, 1, 1], [], []>} : vector<2x64xf32>, vector<64x256xf32>, vector<2x256xf32> -> vector<2x256xf32>
    %c0_143 = arith.constant 0 : index
    %c0_144 = arith.constant 0 : index
    %283 = vector.load %arg6[%c0_143, %c0_144] : memref<1x256xf32, #tpu.memory_space<vmem>>, vector<1x256xf32>
    %284 = vector.broadcast %283 : vector<1x256xf32> to vector<2x256xf32>
    %285 = arith.addf %282, %284 : vector<2x256xf32>
    %c0_145 = arith.constant 0 : index
    %c0_146 = arith.constant 0 : index
    %c0_147 = arith.constant 0 : index
    %286 = vector.load %arg14[%c0_145, %c0_146, %c0_147] : memref<8x2x256xf32, #tpu.memory_space<vmem>>, vector<1x2x256xf32>
    %287 = vector.shape_cast %286 : vector<1x2x256xf32> to vector<2x256xf32>
    %288 = vector.shape_cast %285 : vector<2x256xf32> to vector<1x2x256xf32>
    tpu.vector_store %arg14[%c0_145, %c0_146, %c0_147], %288 {strides = array<i32>} : memref<8x2x256xf32, #tpu.memory_space<vmem>>, vector<1x2x256xf32>,
    %c1_148 = arith.constant 1 : index
    %c0_149 = arith.constant 0 : index
    %c0_150 = arith.constant 0 : index
    %289 = vector.load %arg13[%c1_148, %c0_149, %c0_150] : memref<8x2x256xf32, #tpu.memory_space<vmem>>, vector<1x2x256xf32>
    %290 = vector.shape_cast %289 : vector<1x2x256xf32> to vector<2x256xf32>
    %c0_151 = arith.constant 0 : index
    %c0_152 = arith.constant 0 : index
    %291 = vector.load %arg5[%c0_151, %c0_152] : memref<64x256xf32, #tpu.memory_space<vmem>>, vector<64x256xf32>
    %cst_153 = arith.constant dense<0.000000e+00> : vector<2x256xf32>
    %292 = tpu.matmul %280, %291, %cst_153 {dimension_numbers = #tpu.dot_dimension_numbers<[1], [0], [0], [1], [0, 0, 1, 1], [], []>} : vector<2x64xf32>, vector<64x256xf32>, vector<2x256xf32> -> vector<2x256xf32>
    %293 = arith.addf %290, %292 : vector<2x256xf32>
    %294 = arith.negf %293 : vector<2x256xf32>
    %295 = math.exp %294 : vector<2x256xf32>
    %cst_154 = arith.constant 1.000000e+00 : f32
    %296 = vector.broadcast %cst_154 : f32 to vector<2x256xf32>
    %297 = arith.addf %296, %295 : vector<2x256xf32>
    %298 = arith.divf %296, %297 : vector<2x256xf32>
    %299 = math.tanh %293 : vector<2x256xf32>
    %300 = vector.extract_strided_slice %298 {offsets = [0, 0], sizes = [2, 64], strides = [1, 1]} : vector<2x256xf32> to vector<2x64xf32>
    %301 = vector.extract_strided_slice %298 {offsets = [0, 64], sizes = [2, 64], strides = [1, 1]} : vector<2x256xf32> to vector<2x64xf32>
    %302 = vector.extract_strided_slice %299 {offsets = [0, 128], sizes = [2, 64], strides = [1, 1]} : vector<2x256xf32> to vector<2x64xf32>
    %303 = vector.extract_strided_slice %298 {offsets = [0, 192], sizes = [2, 64], strides = [1, 1]} : vector<2x256xf32> to vector<2x64xf32>
    %304 = arith.mulf %301, %278 : vector<2x64xf32>
    %305 = arith.mulf %300, %302 : vector<2x64xf32>
    %306 = arith.addf %304, %305 : vector<2x64xf32>
    %307 = math.tanh %306 : vector<2x64xf32>
    %308 = arith.mulf %303, %307 : vector<2x64xf32>
    %c0_155 = arith.constant 0 : index
    %c0_156 = arith.constant 0 : index
    %309 = vector.load %arg4[%c0_155, %c0_156] : memref<64x256xf32, #tpu.memory_space<vmem>>, vector<64x256xf32>
    %cst_157 = arith.constant dense<0.000000e+00> : vector<2x256xf32>
    %310 = tpu.matmul %308, %309, %cst_157 {dimension_numbers = #tpu.dot_dimension_numbers<[1], [0], [0], [1], [0, 0, 1, 1], [], []>} : vector<2x64xf32>, vector<64x256xf32>, vector<2x256xf32> -> vector<2x256xf32>
    %c0_158 = arith.constant 0 : index
    %c0_159 = arith.constant 0 : index
    %311 = vector.load %arg6[%c0_158, %c0_159] : memref<1x256xf32, #tpu.memory_space<vmem>>, vector<1x256xf32>
    %312 = vector.broadcast %311 : vector<1x256xf32> to vector<2x256xf32>
    %313 = arith.addf %310, %312 : vector<2x256xf32>
    %c1_160 = arith.constant 1 : index
    %c0_161 = arith.constant 0 : index
    %c0_162 = arith.constant 0 : index
    %314 = vector.load %arg14[%c1_160, %c0_161, %c0_162] : memref<8x2x256xf32, #tpu.memory_space<vmem>>, vector<1x2x256xf32>
    %315 = vector.shape_cast %314 : vector<1x2x256xf32> to vector<2x256xf32>
    %316 = vector.shape_cast %313 : vector<2x256xf32> to vector<1x2x256xf32>
    tpu.vector_store %arg14[%c1_160, %c0_161, %c0_162], %316 {strides = array<i32>} : memref<8x2x256xf32, #tpu.memory_space<vmem>>, vector<1x2x256xf32>,
    %c2_163 = arith.constant 2 : index
    %c0_164 = arith.constant 0 : index
    %c0_165 = arith.constant 0 : index
    %317 = vector.load %arg13[%c2_163, %c0_164, %c0_165] : memref<8x2x256xf32, #tpu.memory_space<vmem>>, vector<1x2x256xf32>
    %318 = vector.shape_cast %317 : vector<1x2x256xf32> to vector<2x256xf32>
    %c0_166 = arith.constant 0 : index
    %c0_167 = arith.constant 0 : index
    %319 = vector.load %arg5[%c0_166, %c0_167] : memref<64x256xf32, #tpu.memory_space<vmem>>, vector<64x256xf32>
    %cst_168 = arith.constant dense<0.000000e+00> : vector<2x256xf32>
    %320 = tpu.matmul %308, %319, %cst_168 {dimension_numbers = #tpu.dot_dimension_numbers<[1], [0], [0], [1], [0, 0, 1, 1], [], []>} : vector<2x64xf32>, vector<64x256xf32>, vector<2x256xf32> -> vector<2x256xf32>
    %321 = arith.addf %318, %320 : vector<2x256xf32>
    %322 = arith.negf %321 : vector<2x256xf32>
    %323 = math.exp %322 : vector<2x256xf32>
    %cst_169 = arith.constant 1.000000e+00 : f32
    %324 = vector.broadcast %cst_169 : f32 to vector<2x256xf32>
    %325 = arith.addf %324, %323 : vector<2x256xf32>
    %326 = arith.divf %324, %325 : vector<2x256xf32>
    %327 = math.tanh %321 : vector<2x256xf32>
    %328 = vector.extract_strided_slice %326 {offsets = [0, 0], sizes = [2, 64], strides = [1, 1]} : vector<2x256xf32> to vector<2x64xf32>
    %329 = vector.extract_strided_slice %326 {offsets = [0, 64], sizes = [2, 64], strides = [1, 1]} : vector<2x256xf32> to vector<2x64xf32>
    %330 = vector.extract_strided_slice %327 {offsets = [0, 128], sizes = [2, 64], strides = [1, 1]} : vector<2x256xf32> to vector<2x64xf32>
    %331 = vector.extract_strided_slice %326 {offsets = [0, 192], sizes = [2, 64], strides = [1, 1]} : vector<2x256xf32> to vector<2x64xf32>
    %332 = arith.mulf %329, %306 : vector<2x64xf32>
    %333 = arith.mulf %328, %330 : vector<2x64xf32>
    %334 = arith.addf %332, %333 : vector<2x64xf32>
    %335 = math.tanh %334 : vector<2x64xf32>
    %336 = arith.mulf %331, %335 : vector<2x64xf32>
    %c0_170 = arith.constant 0 : index
    %c0_171 = arith.constant 0 : index
    %337 = vector.load %arg4[%c0_170, %c0_171] : memref<64x256xf32, #tpu.memory_space<vmem>>, vector<64x256xf32>
    %cst_172 = arith.constant dense<0.000000e+00> : vector<2x256xf32>
    %338 = tpu.matmul %336, %337, %cst_172 {dimension_numbers = #tpu.dot_dimension_numbers<[1], [0], [0], [1], [0, 0, 1, 1], [], []>} : vector<2x64xf32>, vector<64x256xf32>, vector<2x256xf32> -> vector<2x256xf32>
    %c0_173 = arith.constant 0 : index
    %c0_174 = arith.constant 0 : index
    %339 = vector.load %arg6[%c0_173, %c0_174] : memref<1x256xf32, #tpu.memory_space<vmem>>, vector<1x256xf32>
    %340 = vector.broadcast %339 : vector<1x256xf32> to vector<2x256xf32>
    %341 = arith.addf %338, %340 : vector<2x256xf32>
    %c2_175 = arith.constant 2 : index
    %c0_176 = arith.constant 0 : index
    %c0_177 = arith.constant 0 : index
    %342 = vector.load %arg14[%c2_175, %c0_176, %c0_177] : memref<8x2x256xf32, #tpu.memory_space<vmem>>, vector<1x2x256xf32>
    %343 = vector.shape_cast %342 : vector<1x2x256xf32> to vector<2x256xf32>
    %344 = vector.shape_cast %341 : vector<2x256xf32> to vector<1x2x256xf32>
    tpu.vector_store %arg14[%c2_175, %c0_176, %c0_177], %344 {strides = array<i32>} : memref<8x2x256xf32, #tpu.memory_space<vmem>>, vector<1x2x256xf32>,
    %c3_178 = arith.constant 3 : index
    %c0_179 = arith.constant 0 : index
    %c0_180 = arith.constant 0 : index
    %345 = vector.load %arg13[%c3_178, %c0_179, %c0_180] : memref<8x2x256xf32, #tpu.memory_space<vmem>>, vector<1x2x256xf32>
    %346 = vector.shape_cast %345 : vector<1x2x256xf32> to vector<2x256xf32>
    %c0_181 = arith.constant 0 : index
    %c0_182 = arith.constant 0 : index
    %347 = vector.load %arg5[%c0_181, %c0_182] : memref<64x256xf32, #tpu.memory_space<vmem>>, vector<64x256xf32>
    %cst_183 = arith.constant dense<0.000000e+00> : vector<2x256xf32>
    %348 = tpu.matmul %336, %347, %cst_183 {dimension_numbers = #tpu.dot_dimension_numbers<[1], [0], [0], [1], [0, 0, 1, 1], [], []>} : vector<2x64xf32>, vector<64x256xf32>, vector<2x256xf32> -> vector<2x256xf32>
    %349 = arith.addf %346, %348 : vector<2x256xf32>
    %350 = arith.negf %349 : vector<2x256xf32>
    %351 = math.exp %350 : vector<2x256xf32>
    %cst_184 = arith.constant 1.000000e+00 : f32
    %352 = vector.broadcast %cst_184 : f32 to vector<2x256xf32>
    %353 = arith.addf %352, %351 : vector<2x256xf32>
    %354 = arith.divf %352, %353 : vector<2x256xf32>
    %355 = math.tanh %349 : vector<2x256xf32>
    %356 = vector.extract_strided_slice %354 {offsets = [0, 0], sizes = [2, 64], strides = [1, 1]} : vector<2x256xf32> to vector<2x64xf32>
    %357 = vector.extract_strided_slice %354 {offsets = [0, 64], sizes = [2, 64], strides = [1, 1]} : vector<2x256xf32> to vector<2x64xf32>
    %358 = vector.extract_strided_slice %355 {offsets = [0, 128], sizes = [2, 64], strides = [1, 1]} : vector<2x256xf32> to vector<2x64xf32>
    %359 = vector.extract_strided_slice %354 {offsets = [0, 192], sizes = [2, 64], strides = [1, 1]} : vector<2x256xf32> to vector<2x64xf32>
    %360 = arith.mulf %357, %334 : vector<2x64xf32>
    %361 = arith.mulf %356, %358 : vector<2x64xf32>
    %362 = arith.addf %360, %361 : vector<2x64xf32>
    %363 = math.tanh %362 : vector<2x64xf32>
    %364 = arith.mulf %359, %363 : vector<2x64xf32>
    %c0_185 = arith.constant 0 : index
    %c0_186 = arith.constant 0 : index
    %365 = vector.load %arg4[%c0_185, %c0_186] : memref<64x256xf32, #tpu.memory_space<vmem>>, vector<64x256xf32>
    %cst_187 = arith.constant dense<0.000000e+00> : vector<2x256xf32>
    %366 = tpu.matmul %364, %365, %cst_187 {dimension_numbers = #tpu.dot_dimension_numbers<[1], [0], [0], [1], [0, 0, 1, 1], [], []>} : vector<2x64xf32>, vector<64x256xf32>, vector<2x256xf32> -> vector<2x256xf32>
    %c0_188 = arith.constant 0 : index
    %c0_189 = arith.constant 0 : index
    %367 = vector.load %arg6[%c0_188, %c0_189] : memref<1x256xf32, #tpu.memory_space<vmem>>, vector<1x256xf32>
    %368 = vector.broadcast %367 : vector<1x256xf32> to vector<2x256xf32>
    %369 = arith.addf %366, %368 : vector<2x256xf32>
    %c3_190 = arith.constant 3 : index
    %c0_191 = arith.constant 0 : index
    %c0_192 = arith.constant 0 : index
    %370 = vector.load %arg14[%c3_190, %c0_191, %c0_192] : memref<8x2x256xf32, #tpu.memory_space<vmem>>, vector<1x2x256xf32>
    %371 = vector.shape_cast %370 : vector<1x2x256xf32> to vector<2x256xf32>
    %372 = vector.shape_cast %369 : vector<2x256xf32> to vector<1x2x256xf32>
    tpu.vector_store %arg14[%c3_190, %c0_191, %c0_192], %372 {strides = array<i32>} : memref<8x2x256xf32, #tpu.memory_space<vmem>>, vector<1x2x256xf32>,
    %c4_193 = arith.constant 4 : index
    %c0_194 = arith.constant 0 : index
    %c0_195 = arith.constant 0 : index
    %373 = vector.load %arg13[%c4_193, %c0_194, %c0_195] : memref<8x2x256xf32, #tpu.memory_space<vmem>>, vector<1x2x256xf32>
    %374 = vector.shape_cast %373 : vector<1x2x256xf32> to vector<2x256xf32>
    %c0_196 = arith.constant 0 : index
    %c0_197 = arith.constant 0 : index
    %375 = vector.load %arg5[%c0_196, %c0_197] : memref<64x256xf32, #tpu.memory_space<vmem>>, vector<64x256xf32>
    %cst_198 = arith.constant dense<0.000000e+00> : vector<2x256xf32>
    %376 = tpu.matmul %364, %375, %cst_198 {dimension_numbers = #tpu.dot_dimension_numbers<[1], [0], [0], [1], [0, 0, 1, 1], [], []>} : vector<2x64xf32>, vector<64x256xf32>, vector<2x256xf32> -> vector<2x256xf32>
    %377 = arith.addf %374, %376 : vector<2x256xf32>
    %378 = arith.negf %377 : vector<2x256xf32>
    %379 = math.exp %378 : vector<2x256xf32>
    %cst_199 = arith.constant 1.000000e+00 : f32
    %380 = vector.broadcast %cst_199 : f32 to vector<2x256xf32>
    %381 = arith.addf %380, %379 : vector<2x256xf32>
    %382 = arith.divf %380, %381 : vector<2x256xf32>
    %383 = math.tanh %377 : vector<2x256xf32>
    %384 = vector.extract_strided_slice %382 {offsets = [0, 0], sizes = [2, 64], strides = [1, 1]} : vector<2x256xf32> to vector<2x64xf32>
    %385 = vector.extract_strided_slice %382 {offsets = [0, 64], sizes = [2, 64], strides = [1, 1]} : vector<2x256xf32> to vector<2x64xf32>
    %386 = vector.extract_strided_slice %383 {offsets = [0, 128], sizes = [2, 64], strides = [1, 1]} : vector<2x256xf32> to vector<2x64xf32>
    %387 = vector.extract_strided_slice %382 {offsets = [0, 192], sizes = [2, 64], strides = [1, 1]} : vector<2x256xf32> to vector<2x64xf32>
    %388 = arith.mulf %385, %362 : vector<2x64xf32>
    %389 = arith.mulf %384, %386 : vector<2x64xf32>
    %390 = arith.addf %388, %389 : vector<2x64xf32>
    %391 = math.tanh %390 : vector<2x64xf32>
    %392 = arith.mulf %387, %391 : vector<2x64xf32>
    %c0_200 = arith.constant 0 : index
    %c0_201 = arith.constant 0 : index
    %393 = vector.load %arg4[%c0_200, %c0_201] : memref<64x256xf32, #tpu.memory_space<vmem>>, vector<64x256xf32>
    %cst_202 = arith.constant dense<0.000000e+00> : vector<2x256xf32>
    %394 = tpu.matmul %392, %393, %cst_202 {dimension_numbers = #tpu.dot_dimension_numbers<[1], [0], [0], [1], [0, 0, 1, 1], [], []>} : vector<2x64xf32>, vector<64x256xf32>, vector<2x256xf32> -> vector<2x256xf32>
    %c0_203 = arith.constant 0 : index
    %c0_204 = arith.constant 0 : index
    %395 = vector.load %arg6[%c0_203, %c0_204] : memref<1x256xf32, #tpu.memory_space<vmem>>, vector<1x256xf32>
    %396 = vector.broadcast %395 : vector<1x256xf32> to vector<2x256xf32>
    %397 = arith.addf %394, %396 : vector<2x256xf32>
    %c4_205 = arith.constant 4 : index
    %c0_206 = arith.constant 0 : index
    %c0_207 = arith.constant 0 : index
    %398 = vector.load %arg14[%c4_205, %c0_206, %c0_207] : memref<8x2x256xf32, #tpu.memory_space<vmem>>, vector<1x2x256xf32>
    %399 = vector.shape_cast %398 : vector<1x2x256xf32> to vector<2x256xf32>
    %400 = vector.shape_cast %397 : vector<2x256xf32> to vector<1x2x256xf32>
    tpu.vector_store %arg14[%c4_205, %c0_206, %c0_207], %400 {strides = array<i32>} : memref<8x2x256xf32, #tpu.memory_space<vmem>>, vector<1x2x256xf32>,
    %c5_208 = arith.constant 5 : index
    %c0_209 = arith.constant 0 : index
    %c0_210 = arith.constant 0 : index
    %401 = vector.load %arg13[%c5_208, %c0_209, %c0_210] : memref<8x2x256xf32, #tpu.memory_space<vmem>>, vector<1x2x256xf32>
    %402 = vector.shape_cast %401 : vector<1x2x256xf32> to vector<2x256xf32>
    %c0_211 = arith.constant 0 : index
    %c0_212 = arith.constant 0 : index
    %403 = vector.load %arg5[%c0_211, %c0_212] : memref<64x256xf32, #tpu.memory_space<vmem>>, vector<64x256xf32>
    %cst_213 = arith.constant dense<0.000000e+00> : vector<2x256xf32>
    %404 = tpu.matmul %392, %403, %cst_213 {dimension_numbers = #tpu.dot_dimension_numbers<[1], [0], [0], [1], [0, 0, 1, 1], [], []>} : vector<2x64xf32>, vector<64x256xf32>, vector<2x256xf32> -> vector<2x256xf32>
    %405 = arith.addf %402, %404 : vector<2x256xf32>
    %406 = arith.negf %405 : vector<2x256xf32>
    %407 = math.exp %406 : vector<2x256xf32>
    %cst_214 = arith.constant 1.000000e+00 : f32
    %408 = vector.broadcast %cst_214 : f32 to vector<2x256xf32>
    %409 = arith.addf %408, %407 : vector<2x256xf32>
    %410 = arith.divf %408, %409 : vector<2x256xf32>
    %411 = math.tanh %405 : vector<2x256xf32>
    %412 = vector.extract_strided_slice %410 {offsets = [0, 0], sizes = [2, 64], strides = [1, 1]} : vector<2x256xf32> to vector<2x64xf32>
    %413 = vector.extract_strided_slice %410 {offsets = [0, 64], sizes = [2, 64], strides = [1, 1]} : vector<2x256xf32> to vector<2x64xf32>
    %414 = vector.extract_strided_slice %411 {offsets = [0, 128], sizes = [2, 64], strides = [1, 1]} : vector<2x256xf32> to vector<2x64xf32>
    %415 = vector.extract_strided_slice %410 {offsets = [0, 192], sizes = [2, 64], strides = [1, 1]} : vector<2x256xf32> to vector<2x64xf32>
    %416 = arith.mulf %413, %390 : vector<2x64xf32>
    %417 = arith.mulf %412, %414 : vector<2x64xf32>
    %418 = arith.addf %416, %417 : vector<2x64xf32>
    %419 = math.tanh %418 : vector<2x64xf32>
    %420 = arith.mulf %415, %419 : vector<2x64xf32>
    %c0_215 = arith.constant 0 : index
    %c0_216 = arith.constant 0 : index
    %421 = vector.load %arg4[%c0_215, %c0_216] : memref<64x256xf32, #tpu.memory_space<vmem>>, vector<64x256xf32>
    %cst_217 = arith.constant dense<0.000000e+00> : vector<2x256xf32>
    %422 = tpu.matmul %420, %421, %cst_217 {dimension_numbers = #tpu.dot_dimension_numbers<[1], [0], [0], [1], [0, 0, 1, 1], [], []>} : vector<2x64xf32>, vector<64x256xf32>, vector<2x256xf32> -> vector<2x256xf32>
    %c0_218 = arith.constant 0 : index
    %c0_219 = arith.constant 0 : index
    %423 = vector.load %arg6[%c0_218, %c0_219] : memref<1x256xf32, #tpu.memory_space<vmem>>, vector<1x256xf32>
    %424 = vector.broadcast %423 : vector<1x256xf32> to vector<2x256xf32>
    %425 = arith.addf %422, %424 : vector<2x256xf32>
    %c5_220 = arith.constant 5 : index
    %c0_221 = arith.constant 0 : index
    %c0_222 = arith.constant 0 : index
    %426 = vector.load %arg14[%c5_220, %c0_221, %c0_222] : memref<8x2x256xf32, #tpu.memory_space<vmem>>, vector<1x2x256xf32>
    %427 = vector.shape_cast %426 : vector<1x2x256xf32> to vector<2x256xf32>
    %428 = vector.shape_cast %425 : vector<2x256xf32> to vector<1x2x256xf32>
    tpu.vector_store %arg14[%c5_220, %c0_221, %c0_222], %428 {strides = array<i32>} : memref<8x2x256xf32, #tpu.memory_space<vmem>>, vector<1x2x256xf32>,
    %c6_223 = arith.constant 6 : index
    %c0_224 = arith.constant 0 : index
    %c0_225 = arith.constant 0 : index
    %429 = vector.load %arg13[%c6_223, %c0_224, %c0_225] : memref<8x2x256xf32, #tpu.memory_space<vmem>>, vector<1x2x256xf32>
    %430 = vector.shape_cast %429 : vector<1x2x256xf32> to vector<2x256xf32>
    %c0_226 = arith.constant 0 : index
    %c0_227 = arith.constant 0 : index
    %431 = vector.load %arg5[%c0_226, %c0_227] : memref<64x256xf32, #tpu.memory_space<vmem>>, vector<64x256xf32>
    %cst_228 = arith.constant dense<0.000000e+00> : vector<2x256xf32>
    %432 = tpu.matmul %420, %431, %cst_228 {dimension_numbers = #tpu.dot_dimension_numbers<[1], [0], [0], [1], [0, 0, 1, 1], [], []>} : vector<2x64xf32>, vector<64x256xf32>, vector<2x256xf32> -> vector<2x256xf32>
    %433 = arith.addf %430, %432 : vector<2x256xf32>
    %434 = arith.negf %433 : vector<2x256xf32>
    %435 = math.exp %434 : vector<2x256xf32>
    %cst_229 = arith.constant 1.000000e+00 : f32
    %436 = vector.broadcast %cst_229 : f32 to vector<2x256xf32>
    %437 = arith.addf %436, %435 : vector<2x256xf32>
    %438 = arith.divf %436, %437 : vector<2x256xf32>
    %439 = math.tanh %433 : vector<2x256xf32>
    %440 = vector.extract_strided_slice %438 {offsets = [0, 0], sizes = [2, 64], strides = [1, 1]} : vector<2x256xf32> to vector<2x64xf32>
    %441 = vector.extract_strided_slice %438 {offsets = [0, 64], sizes = [2, 64], strides = [1, 1]} : vector<2x256xf32> to vector<2x64xf32>
    %442 = vector.extract_strided_slice %439 {offsets = [0, 128], sizes = [2, 64], strides = [1, 1]} : vector<2x256xf32> to vector<2x64xf32>
    %443 = vector.extract_strided_slice %438 {offsets = [0, 192], sizes = [2, 64], strides = [1, 1]} : vector<2x256xf32> to vector<2x64xf32>
    %444 = arith.mulf %441, %418 : vector<2x64xf32>
    %445 = arith.mulf %440, %442 : vector<2x64xf32>
    %446 = arith.addf %444, %445 : vector<2x64xf32>
    %447 = math.tanh %446 : vector<2x64xf32>
    %448 = arith.mulf %443, %447 : vector<2x64xf32>
    %c0_230 = arith.constant 0 : index
    %c0_231 = arith.constant 0 : index
    %449 = vector.load %arg4[%c0_230, %c0_231] : memref<64x256xf32, #tpu.memory_space<vmem>>, vector<64x256xf32>
    %cst_232 = arith.constant dense<0.000000e+00> : vector<2x256xf32>
    %450 = tpu.matmul %448, %449, %cst_232 {dimension_numbers = #tpu.dot_dimension_numbers<[1], [0], [0], [1], [0, 0, 1, 1], [], []>} : vector<2x64xf32>, vector<64x256xf32>, vector<2x256xf32> -> vector<2x256xf32>
    %c0_233 = arith.constant 0 : index
    %c0_234 = arith.constant 0 : index
    %451 = vector.load %arg6[%c0_233, %c0_234] : memref<1x256xf32, #tpu.memory_space<vmem>>, vector<1x256xf32>
    %452 = vector.broadcast %451 : vector<1x256xf32> to vector<2x256xf32>
    %453 = arith.addf %450, %452 : vector<2x256xf32>
    %c6_235 = arith.constant 6 : index
    %c0_236 = arith.constant 0 : index
    %c0_237 = arith.constant 0 : index
    %454 = vector.load %arg14[%c6_235, %c0_236, %c0_237] : memref<8x2x256xf32, #tpu.memory_space<vmem>>, vector<1x2x256xf32>
    %455 = vector.shape_cast %454 : vector<1x2x256xf32> to vector<2x256xf32>
    %456 = vector.shape_cast %453 : vector<2x256xf32> to vector<1x2x256xf32>
    tpu.vector_store %arg14[%c6_235, %c0_236, %c0_237], %456 {strides = array<i32>} : memref<8x2x256xf32, #tpu.memory_space<vmem>>, vector<1x2x256xf32>,
    %c7_238 = arith.constant 7 : index
    %c0_239 = arith.constant 0 : index
    %c0_240 = arith.constant 0 : index
    %457 = vector.load %arg13[%c7_238, %c0_239, %c0_240] : memref<8x2x256xf32, #tpu.memory_space<vmem>>, vector<1x2x256xf32>
    %458 = vector.shape_cast %457 : vector<1x2x256xf32> to vector<2x256xf32>
    %c0_241 = arith.constant 0 : index
    %c0_242 = arith.constant 0 : index
    %459 = vector.load %arg5[%c0_241, %c0_242] : memref<64x256xf32, #tpu.memory_space<vmem>>, vector<64x256xf32>
    %cst_243 = arith.constant dense<0.000000e+00> : vector<2x256xf32>
    %460 = tpu.matmul %448, %459, %cst_243 {dimension_numbers = #tpu.dot_dimension_numbers<[1], [0], [0], [1], [0, 0, 1, 1], [], []>} : vector<2x64xf32>, vector<64x256xf32>, vector<2x256xf32> -> vector<2x256xf32>
    %461 = arith.addf %458, %460 : vector<2x256xf32>
    %462 = arith.negf %461 : vector<2x256xf32>
    %463 = math.exp %462 : vector<2x256xf32>
    %cst_244 = arith.constant 1.000000e+00 : f32
    %464 = vector.broadcast %cst_244 : f32 to vector<2x256xf32>
    %465 = arith.addf %464, %463 : vector<2x256xf32>
    %466 = arith.divf %464, %465 : vector<2x256xf32>
    %467 = math.tanh %461 : vector<2x256xf32>
    %468 = vector.extract_strided_slice %466 {offsets = [0, 0], sizes = [2, 64], strides = [1, 1]} : vector<2x256xf32> to vector<2x64xf32>
    %469 = vector.extract_strided_slice %466 {offsets = [0, 64], sizes = [2, 64], strides = [1, 1]} : vector<2x256xf32> to vector<2x64xf32>
    %470 = vector.extract_strided_slice %467 {offsets = [0, 128], sizes = [2, 64], strides = [1, 1]} : vector<2x256xf32> to vector<2x64xf32>
    %471 = vector.extract_strided_slice %466 {offsets = [0, 192], sizes = [2, 64], strides = [1, 1]} : vector<2x256xf32> to vector<2x64xf32>
    %472 = arith.mulf %469, %446 : vector<2x64xf32>
    %473 = arith.mulf %468, %470 : vector<2x64xf32>
    %474 = arith.addf %472, %473 : vector<2x64xf32>
    %475 = math.tanh %474 : vector<2x64xf32>
    %476 = arith.mulf %471, %475 : vector<2x64xf32>
    %c0_245 = arith.constant 0 : index
    %c0_246 = arith.constant 0 : index
    %477 = vector.load %arg4[%c0_245, %c0_246] : memref<64x256xf32, #tpu.memory_space<vmem>>, vector<64x256xf32>
    %cst_247 = arith.constant dense<0.000000e+00> : vector<2x256xf32>
    %478 = tpu.matmul %476, %477, %cst_247 {dimension_numbers = #tpu.dot_dimension_numbers<[1], [0], [0], [1], [0, 0, 1, 1], [], []>} : vector<2x64xf32>, vector<64x256xf32>, vector<2x256xf32> -> vector<2x256xf32>
    %c0_248 = arith.constant 0 : index
    %c0_249 = arith.constant 0 : index
    %479 = vector.load %arg6[%c0_248, %c0_249] : memref<1x256xf32, #tpu.memory_space<vmem>>, vector<1x256xf32>
    %480 = vector.broadcast %479 : vector<1x256xf32> to vector<2x256xf32>
    %481 = arith.addf %478, %480 : vector<2x256xf32>
    %c7_250 = arith.constant 7 : index
    %c0_251 = arith.constant 0 : index
    %c0_252 = arith.constant 0 : index
    %482 = vector.load %arg14[%c7_250, %c0_251, %c0_252] : memref<8x2x256xf32, #tpu.memory_space<vmem>>, vector<1x2x256xf32>
    %483 = vector.shape_cast %482 : vector<1x2x256xf32> to vector<2x256xf32>
    %484 = vector.shape_cast %481 : vector<2x256xf32> to vector<1x2x256xf32>
    tpu.vector_store %arg14[%c7_250, %c0_251, %c0_252], %484 {strides = array<i32>} : memref<8x2x256xf32, #tpu.memory_space<vmem>>, vector<1x2x256xf32>,
    %cst_253 = arith.constant 0.000000e+00 : f32
    %485 = vector.broadcast %cst_253 : f32 to vector<2x64xf32>
    %cst_254 = arith.constant 0.000000e+00 : f32
    %486 = vector.broadcast %cst_254 : f32 to vector<2x64xf32>
    %c0_255 = arith.constant 0 : index
    %c0_256 = arith.constant 0 : index
    %c0_257 = arith.constant 0 : index
    %487 = vector.load %arg14[%c0_255, %c0_256, %c0_257] : memref<8x2x256xf32, #tpu.memory_space<vmem>>, vector<1x2x256xf32>
    %488 = vector.shape_cast %487 : vector<1x2x256xf32> to vector<2x256xf32>
    %c0_258 = arith.constant 0 : index
    %c0_259 = arith.constant 0 : index
    %489 = vector.load %arg5[%c0_258, %c0_259] : memref<64x256xf32, #tpu.memory_space<vmem>>, vector<64x256xf32>
    %cst_260 = arith.constant dense<0.000000e+00> : vector<2x256xf32>
    %490 = tpu.matmul %485, %489, %cst_260 {dimension_numbers = #tpu.dot_dimension_numbers<[1], [0], [0], [1], [0, 0, 1, 1], [], []>} : vector<2x64xf32>, vector<64x256xf32>, vector<2x256xf32> -> vector<2x256xf32>
    %491 = arith.addf %488, %490 : vector<2x256xf32>
    %492 = arith.negf %491 : vector<2x256xf32>
    %493 = math.exp %492 : vector<2x256xf32>
    %cst_261 = arith.constant 1.000000e+00 : f32
    %494 = vector.broadcast %cst_261 : f32 to vector<2x256xf32>
    %495 = arith.addf %494, %493 : vector<2x256xf32>
    %496 = arith.divf %494, %495 : vector<2x256xf32>
    %497 = math.tanh %491 : vector<2x256xf32>
    %498 = vector.extract_strided_slice %496 {offsets = [0, 0], sizes = [2, 64], strides = [1, 1]} : vector<2x256xf32> to vector<2x64xf32>
    %499 = vector.extract_strided_slice %496 {offsets = [0, 64], sizes = [2, 64], strides = [1, 1]} : vector<2x256xf32> to vector<2x64xf32>
    %500 = vector.extract_strided_slice %497 {offsets = [0, 128], sizes = [2, 64], strides = [1, 1]} : vector<2x256xf32> to vector<2x64xf32>
    %501 = vector.extract_strided_slice %496 {offsets = [0, 192], sizes = [2, 64], strides = [1, 1]} : vector<2x256xf32> to vector<2x64xf32>
    %502 = arith.mulf %499, %486 : vector<2x64xf32>
    %503 = arith.mulf %498, %500 : vector<2x64xf32>
    %504 = arith.addf %502, %503 : vector<2x64xf32>
    %505 = math.tanh %504 : vector<2x64xf32>
    %506 = arith.mulf %501, %505 : vector<2x64xf32>
    %c0_262 = arith.constant 0 : index
    %c0_263 = arith.constant 0 : index
    %507 = vector.load %arg7[%c0_262, %c0_263] : memref<64x128xf32, #tpu.memory_space<vmem>>, vector<64x128xf32>
    %cst_264 = arith.constant dense<0.000000e+00> : vector<2x128xf32>
    %508 = tpu.matmul %506, %507, %cst_264 {dimension_numbers = #tpu.dot_dimension_numbers<[1], [0], [0], [1], [0, 0, 1, 1], [], []>} : vector<2x64xf32>, vector<64x128xf32>, vector<2x128xf32> -> vector<2x128xf32>
    %c0_265 = arith.constant 0 : index
    %c0_266 = arith.constant 0 : index
    %509 = vector.load %arg9[%c0_265, %c0_266] : memref<1x128xf32, #tpu.memory_space<vmem>>, vector<1x128xf32>
    %510 = vector.broadcast %509 : vector<1x128xf32> to vector<2x128xf32>
    %511 = arith.addf %508, %510 : vector<2x128xf32>
    %c0_267 = arith.constant 0 : index
    %c0_268 = arith.constant 0 : index
    %c0_269 = arith.constant 0 : index
    %512 = vector.load %arg15[%c0_267, %c0_268, %c0_269] : memref<8x2x128xf32, #tpu.memory_space<vmem>>, vector<1x2x128xf32>
    %513 = vector.shape_cast %512 : vector<1x2x128xf32> to vector<2x128xf32>
    %514 = vector.shape_cast %511 : vector<2x128xf32> to vector<1x2x128xf32>
    tpu.vector_store %arg15[%c0_267, %c0_268, %c0_269], %514 {strides = array<i32>} : memref<8x2x128xf32, #tpu.memory_space<vmem>>, vector<1x2x128xf32>,
    %c1_270 = arith.constant 1 : index
    %c0_271 = arith.constant 0 : index
    %c0_272 = arith.constant 0 : index
    %515 = vector.load %arg14[%c1_270, %c0_271, %c0_272] : memref<8x2x256xf32, #tpu.memory_space<vmem>>, vector<1x2x256xf32>
    %516 = vector.shape_cast %515 : vector<1x2x256xf32> to vector<2x256xf32>
    %c0_273 = arith.constant 0 : index
    %c0_274 = arith.constant 0 : index
    %517 = vector.load %arg5[%c0_273, %c0_274] : memref<64x256xf32, #tpu.memory_space<vmem>>, vector<64x256xf32>
    %cst_275 = arith.constant dense<0.000000e+00> : vector<2x256xf32>
    %518 = tpu.matmul %506, %517, %cst_275 {dimension_numbers = #tpu.dot_dimension_numbers<[1], [0], [0], [1], [0, 0, 1, 1], [], []>} : vector<2x64xf32>, vector<64x256xf32>, vector<2x256xf32> -> vector<2x256xf32>
    %519 = arith.addf %516, %518 : vector<2x256xf32>
    %520 = arith.negf %519 : vector<2x256xf32>
    %521 = math.exp %520 : vector<2x256xf32>
    %cst_276 = arith.constant 1.000000e+00 : f32
    %522 = vector.broadcast %cst_276 : f32 to vector<2x256xf32>
    %523 = arith.addf %522, %521 : vector<2x256xf32>
    %524 = arith.divf %522, %523 : vector<2x256xf32>
    %525 = math.tanh %519 : vector<2x256xf32>
    %526 = vector.extract_strided_slice %524 {offsets = [0, 0], sizes = [2, 64], strides = [1, 1]} : vector<2x256xf32> to vector<2x64xf32>
    %527 = vector.extract_strided_slice %524 {offsets = [0, 64], sizes = [2, 64], strides = [1, 1]} : vector<2x256xf32> to vector<2x64xf32>
    %528 = vector.extract_strided_slice %525 {offsets = [0, 128], sizes = [2, 64], strides = [1, 1]} : vector<2x256xf32> to vector<2x64xf32>
    %529 = vector.extract_strided_slice %524 {offsets = [0, 192], sizes = [2, 64], strides = [1, 1]} : vector<2x256xf32> to vector<2x64xf32>
    %530 = arith.mulf %527, %504 : vector<2x64xf32>
    %531 = arith.mulf %526, %528 : vector<2x64xf32>
    %532 = arith.addf %530, %531 : vector<2x64xf32>
    %533 = math.tanh %532 : vector<2x64xf32>
    %534 = arith.mulf %529, %533 : vector<2x64xf32>
    %c0_277 = arith.constant 0 : index
    %c0_278 = arith.constant 0 : index
    %535 = vector.load %arg7[%c0_277, %c0_278] : memref<64x128xf32, #tpu.memory_space<vmem>>, vector<64x128xf32>
    %cst_279 = arith.constant dense<0.000000e+00> : vector<2x128xf32>
    %536 = tpu.matmul %534, %535, %cst_279 {dimension_numbers = #tpu.dot_dimension_numbers<[1], [0], [0], [1], [0, 0, 1, 1], [], []>} : vector<2x64xf32>, vector<64x128xf32>, vector<2x128xf32> -> vector<2x128xf32>
    %c0_280 = arith.constant 0 : index
    %c0_281 = arith.constant 0 : index
    %537 = vector.load %arg9[%c0_280, %c0_281] : memref<1x128xf32, #tpu.memory_space<vmem>>, vector<1x128xf32>
    %538 = vector.broadcast %537 : vector<1x128xf32> to vector<2x128xf32>
    %539 = arith.addf %536, %538 : vector<2x128xf32>
    %c1_282 = arith.constant 1 : index
    %c0_283 = arith.constant 0 : index
    %c0_284 = arith.constant 0 : index
    %540 = vector.load %arg15[%c1_282, %c0_283, %c0_284] : memref<8x2x128xf32, #tpu.memory_space<vmem>>, vector<1x2x128xf32>
    %541 = vector.shape_cast %540 : vector<1x2x128xf32> to vector<2x128xf32>
    %542 = vector.shape_cast %539 : vector<2x128xf32> to vector<1x2x128xf32>
    tpu.vector_store %arg15[%c1_282, %c0_283, %c0_284], %542 {strides = array<i32>} : memref<8x2x128xf32, #tpu.memory_space<vmem>>, vector<1x2x128xf32>,
    %c2_285 = arith.constant 2 : index
    %c0_286 = arith.constant 0 : index
    %c0_287 = arith.constant 0 : index
    %543 = vector.load %arg14[%c2_285, %c0_286, %c0_287] : memref<8x2x256xf32, #tpu.memory_space<vmem>>, vector<1x2x256xf32>
    %544 = vector.shape_cast %543 : vector<1x2x256xf32> to vector<2x256xf32>
    %c0_288 = arith.constant 0 : index
    %c0_289 = arith.constant 0 : index
    %545 = vector.load %arg5[%c0_288, %c0_289] : memref<64x256xf32, #tpu.memory_space<vmem>>, vector<64x256xf32>
    %cst_290 = arith.constant dense<0.000000e+00> : vector<2x256xf32>
    %546 = tpu.matmul %534, %545, %cst_290 {dimension_numbers = #tpu.dot_dimension_numbers<[1], [0], [0], [1], [0, 0, 1, 1], [], []>} : vector<2x64xf32>, vector<64x256xf32>, vector<2x256xf32> -> vector<2x256xf32>
    %547 = arith.addf %544, %546 : vector<2x256xf32>
    %548 = arith.negf %547 : vector<2x256xf32>
    %549 = math.exp %548 : vector<2x256xf32>
    %cst_291 = arith.constant 1.000000e+00 : f32
    %550 = vector.broadcast %cst_291 : f32 to vector<2x256xf32>
    %551 = arith.addf %550, %549 : vector<2x256xf32>
    %552 = arith.divf %550, %551 : vector<2x256xf32>
    %553 = math.tanh %547 : vector<2x256xf32>
    %554 = vector.extract_strided_slice %552 {offsets = [0, 0], sizes = [2, 64], strides = [1, 1]} : vector<2x256xf32> to vector<2x64xf32>
    %555 = vector.extract_strided_slice %552 {offsets = [0, 64], sizes = [2, 64], strides = [1, 1]} : vector<2x256xf32> to vector<2x64xf32>
    %556 = vector.extract_strided_slice %553 {offsets = [0, 128], sizes = [2, 64], strides = [1, 1]} : vector<2x256xf32> to vector<2x64xf32>
    %557 = vector.extract_strided_slice %552 {offsets = [0, 192], sizes = [2, 64], strides = [1, 1]} : vector<2x256xf32> to vector<2x64xf32>
    %558 = arith.mulf %555, %532 : vector<2x64xf32>
    %559 = arith.mulf %554, %556 : vector<2x64xf32>
    %560 = arith.addf %558, %559 : vector<2x64xf32>
    %561 = math.tanh %560 : vector<2x64xf32>
    %562 = arith.mulf %557, %561 : vector<2x64xf32>
    %c0_292 = arith.constant 0 : index
    %c0_293 = arith.constant 0 : index
    %563 = vector.load %arg7[%c0_292, %c0_293] : memref<64x128xf32, #tpu.memory_space<vmem>>, vector<64x128xf32>
    %cst_294 = arith.constant dense<0.000000e+00> : vector<2x128xf32>
    %564 = tpu.matmul %562, %563, %cst_294 {dimension_numbers = #tpu.dot_dimension_numbers<[1], [0], [0], [1], [0, 0, 1, 1], [], []>} : vector<2x64xf32>, vector<64x128xf32>, vector<2x128xf32> -> vector<2x128xf32>
    %c0_295 = arith.constant 0 : index
    %c0_296 = arith.constant 0 : index
    %565 = vector.load %arg9[%c0_295, %c0_296] : memref<1x128xf32, #tpu.memory_space<vmem>>, vector<1x128xf32>
    %566 = vector.broadcast %565 : vector<1x128xf32> to vector<2x128xf32>
    %567 = arith.addf %564, %566 : vector<2x128xf32>
    %c2_297 = arith.constant 2 : index
    %c0_298 = arith.constant 0 : index
    %c0_299 = arith.constant 0 : index
    %568 = vector.load %arg15[%c2_297, %c0_298, %c0_299] : memref<8x2x128xf32, #tpu.memory_space<vmem>>, vector<1x2x128xf32>
    %569 = vector.shape_cast %568 : vector<1x2x128xf32> to vector<2x128xf32>
    %570 = vector.shape_cast %567 : vector<2x128xf32> to vector<1x2x128xf32>
    tpu.vector_store %arg15[%c2_297, %c0_298, %c0_299], %570 {strides = array<i32>} : memref<8x2x128xf32, #tpu.memory_space<vmem>>, vector<1x2x128xf32>,
    %c3_300 = arith.constant 3 : index
    %c0_301 = arith.constant 0 : index
    %c0_302 = arith.constant 0 : index
    %571 = vector.load %arg14[%c3_300, %c0_301, %c0_302] : memref<8x2x256xf32, #tpu.memory_space<vmem>>, vector<1x2x256xf32>
    %572 = vector.shape_cast %571 : vector<1x2x256xf32> to vector<2x256xf32>
    %c0_303 = arith.constant 0 : index
    %c0_304 = arith.constant 0 : index
    %573 = vector.load %arg5[%c0_303, %c0_304] : memref<64x256xf32, #tpu.memory_space<vmem>>, vector<64x256xf32>
    %cst_305 = arith.constant dense<0.000000e+00> : vector<2x256xf32>
    %574 = tpu.matmul %562, %573, %cst_305 {dimension_numbers = #tpu.dot_dimension_numbers<[1], [0], [0], [1], [0, 0, 1, 1], [], []>} : vector<2x64xf32>, vector<64x256xf32>, vector<2x256xf32> -> vector<2x256xf32>
    %575 = arith.addf %572, %574 : vector<2x256xf32>
    %576 = arith.negf %575 : vector<2x256xf32>
    %577 = math.exp %576 : vector<2x256xf32>
    %cst_306 = arith.constant 1.000000e+00 : f32
    %578 = vector.broadcast %cst_306 : f32 to vector<2x256xf32>
    %579 = arith.addf %578, %577 : vector<2x256xf32>
    %580 = arith.divf %578, %579 : vector<2x256xf32>
    %581 = math.tanh %575 : vector<2x256xf32>
    %582 = vector.extract_strided_slice %580 {offsets = [0, 0], sizes = [2, 64], strides = [1, 1]} : vector<2x256xf32> to vector<2x64xf32>
    %583 = vector.extract_strided_slice %580 {offsets = [0, 64], sizes = [2, 64], strides = [1, 1]} : vector<2x256xf32> to vector<2x64xf32>
    %584 = vector.extract_strided_slice %581 {offsets = [0, 128], sizes = [2, 64], strides = [1, 1]} : vector<2x256xf32> to vector<2x64xf32>
    %585 = vector.extract_strided_slice %580 {offsets = [0, 192], sizes = [2, 64], strides = [1, 1]} : vector<2x256xf32> to vector<2x64xf32>
    %586 = arith.mulf %583, %560 : vector<2x64xf32>
    %587 = arith.mulf %582, %584 : vector<2x64xf32>
    %588 = arith.addf %586, %587 : vector<2x64xf32>
    %589 = math.tanh %588 : vector<2x64xf32>
    %590 = arith.mulf %585, %589 : vector<2x64xf32>
    %c0_307 = arith.constant 0 : index
    %c0_308 = arith.constant 0 : index
    %591 = vector.load %arg7[%c0_307, %c0_308] : memref<64x128xf32, #tpu.memory_space<vmem>>, vector<64x128xf32>
    %cst_309 = arith.constant dense<0.000000e+00> : vector<2x128xf32>
    %592 = tpu.matmul %590, %591, %cst_309 {dimension_numbers = #tpu.dot_dimension_numbers<[1], [0], [0], [1], [0, 0, 1, 1], [], []>} : vector<2x64xf32>, vector<64x128xf32>, vector<2x128xf32> -> vector<2x128xf32>
    %c0_310 = arith.constant 0 : index
    %c0_311 = arith.constant 0 : index
    %593 = vector.load %arg9[%c0_310, %c0_311] : memref<1x128xf32, #tpu.memory_space<vmem>>, vector<1x128xf32>
    %594 = vector.broadcast %593 : vector<1x128xf32> to vector<2x128xf32>
    %595 = arith.addf %592, %594 : vector<2x128xf32>
    %c3_312 = arith.constant 3 : index
    %c0_313 = arith.constant 0 : index
    %c0_314 = arith.constant 0 : index
    %596 = vector.load %arg15[%c3_312, %c0_313, %c0_314] : memref<8x2x128xf32, #tpu.memory_space<vmem>>, vector<1x2x128xf32>
    %597 = vector.shape_cast %596 : vector<1x2x128xf32> to vector<2x128xf32>
    %598 = vector.shape_cast %595 : vector<2x128xf32> to vector<1x2x128xf32>
    tpu.vector_store %arg15[%c3_312, %c0_313, %c0_314], %598 {strides = array<i32>} : memref<8x2x128xf32, #tpu.memory_space<vmem>>, vector<1x2x128xf32>,
    %c4_315 = arith.constant 4 : index
    %c0_316 = arith.constant 0 : index
    %c0_317 = arith.constant 0 : index
    %599 = vector.load %arg14[%c4_315, %c0_316, %c0_317] : memref<8x2x256xf32, #tpu.memory_space<vmem>>, vector<1x2x256xf32>
    %600 = vector.shape_cast %599 : vector<1x2x256xf32> to vector<2x256xf32>
    %c0_318 = arith.constant 0 : index
    %c0_319 = arith.constant 0 : index
    %601 = vector.load %arg5[%c0_318, %c0_319] : memref<64x256xf32, #tpu.memory_space<vmem>>, vector<64x256xf32>
    %cst_320 = arith.constant dense<0.000000e+00> : vector<2x256xf32>
    %602 = tpu.matmul %590, %601, %cst_320 {dimension_numbers = #tpu.dot_dimension_numbers<[1], [0], [0], [1], [0, 0, 1, 1], [], []>} : vector<2x64xf32>, vector<64x256xf32>, vector<2x256xf32> -> vector<2x256xf32>
    %603 = arith.addf %600, %602 : vector<2x256xf32>
    %604 = arith.negf %603 : vector<2x256xf32>
    %605 = math.exp %604 : vector<2x256xf32>
    %cst_321 = arith.constant 1.000000e+00 : f32
    %606 = vector.broadcast %cst_321 : f32 to vector<2x256xf32>
    %607 = arith.addf %606, %605 : vector<2x256xf32>
    %608 = arith.divf %606, %607 : vector<2x256xf32>
    %609 = math.tanh %603 : vector<2x256xf32>
    %610 = vector.extract_strided_slice %608 {offsets = [0, 0], sizes = [2, 64], strides = [1, 1]} : vector<2x256xf32> to vector<2x64xf32>
    %611 = vector.extract_strided_slice %608 {offsets = [0, 64], sizes = [2, 64], strides = [1, 1]} : vector<2x256xf32> to vector<2x64xf32>
    %612 = vector.extract_strided_slice %609 {offsets = [0, 128], sizes = [2, 64], strides = [1, 1]} : vector<2x256xf32> to vector<2x64xf32>
    %613 = vector.extract_strided_slice %608 {offsets = [0, 192], sizes = [2, 64], strides = [1, 1]} : vector<2x256xf32> to vector<2x64xf32>
    %614 = arith.mulf %611, %588 : vector<2x64xf32>
    %615 = arith.mulf %610, %612 : vector<2x64xf32>
    %616 = arith.addf %614, %615 : vector<2x64xf32>
    %617 = math.tanh %616 : vector<2x64xf32>
    %618 = arith.mulf %613, %617 : vector<2x64xf32>
    %c0_322 = arith.constant 0 : index
    %c0_323 = arith.constant 0 : index
    %619 = vector.load %arg7[%c0_322, %c0_323] : memref<64x128xf32, #tpu.memory_space<vmem>>, vector<64x128xf32>
    %cst_324 = arith.constant dense<0.000000e+00> : vector<2x128xf32>
    %620 = tpu.matmul %618, %619, %cst_324 {dimension_numbers = #tpu.dot_dimension_numbers<[1], [0], [0], [1], [0, 0, 1, 1], [], []>} : vector<2x64xf32>, vector<64x128xf32>, vector<2x128xf32> -> vector<2x128xf32>
    %c0_325 = arith.constant 0 : index
    %c0_326 = arith.constant 0 : index
    %621 = vector.load %arg9[%c0_325, %c0_326] : memref<1x128xf32, #tpu.memory_space<vmem>>, vector<1x128xf32>
    %622 = vector.broadcast %621 : vector<1x128xf32> to vector<2x128xf32>
    %623 = arith.addf %620, %622 : vector<2x128xf32>
    %c4_327 = arith.constant 4 : index
    %c0_328 = arith.constant 0 : index
    %c0_329 = arith.constant 0 : index
    %624 = vector.load %arg15[%c4_327, %c0_328, %c0_329] : memref<8x2x128xf32, #tpu.memory_space<vmem>>, vector<1x2x128xf32>
    %625 = vector.shape_cast %624 : vector<1x2x128xf32> to vector<2x128xf32>
    %626 = vector.shape_cast %623 : vector<2x128xf32> to vector<1x2x128xf32>
    tpu.vector_store %arg15[%c4_327, %c0_328, %c0_329], %626 {strides = array<i32>} : memref<8x2x128xf32, #tpu.memory_space<vmem>>, vector<1x2x128xf32>,
    %c5_330 = arith.constant 5 : index
    %c0_331 = arith.constant 0 : index
    %c0_332 = arith.constant 0 : index
    %627 = vector.load %arg14[%c5_330, %c0_331, %c0_332] : memref<8x2x256xf32, #tpu.memory_space<vmem>>, vector<1x2x256xf32>
    %628 = vector.shape_cast %627 : vector<1x2x256xf32> to vector<2x256xf32>
    %c0_333 = arith.constant 0 : index
    %c0_334 = arith.constant 0 : index
    %629 = vector.load %arg5[%c0_333, %c0_334] : memref<64x256xf32, #tpu.memory_space<vmem>>, vector<64x256xf32>
    %cst_335 = arith.constant dense<0.000000e+00> : vector<2x256xf32>
    %630 = tpu.matmul %618, %629, %cst_335 {dimension_numbers = #tpu.dot_dimension_numbers<[1], [0], [0], [1], [0, 0, 1, 1], [], []>} : vector<2x64xf32>, vector<64x256xf32>, vector<2x256xf32> -> vector<2x256xf32>
    %631 = arith.addf %628, %630 : vector<2x256xf32>
    %632 = arith.negf %631 : vector<2x256xf32>
    %633 = math.exp %632 : vector<2x256xf32>
    %cst_336 = arith.constant 1.000000e+00 : f32
    %634 = vector.broadcast %cst_336 : f32 to vector<2x256xf32>
    %635 = arith.addf %634, %633 : vector<2x256xf32>
    %636 = arith.divf %634, %635 : vector<2x256xf32>
    %637 = math.tanh %631 : vector<2x256xf32>
    %638 = vector.extract_strided_slice %636 {offsets = [0, 0], sizes = [2, 64], strides = [1, 1]} : vector<2x256xf32> to vector<2x64xf32>
    %639 = vector.extract_strided_slice %636 {offsets = [0, 64], sizes = [2, 64], strides = [1, 1]} : vector<2x256xf32> to vector<2x64xf32>
    %640 = vector.extract_strided_slice %637 {offsets = [0, 128], sizes = [2, 64], strides = [1, 1]} : vector<2x256xf32> to vector<2x64xf32>
    %641 = vector.extract_strided_slice %636 {offsets = [0, 192], sizes = [2, 64], strides = [1, 1]} : vector<2x256xf32> to vector<2x64xf32>
    %642 = arith.mulf %639, %616 : vector<2x64xf32>
    %643 = arith.mulf %638, %640 : vector<2x64xf32>
    %644 = arith.addf %642, %643 : vector<2x64xf32>
    %645 = math.tanh %644 : vector<2x64xf32>
    %646 = arith.mulf %641, %645 : vector<2x64xf32>
    %c0_337 = arith.constant 0 : index
    %c0_338 = arith.constant 0 : index
    %647 = vector.load %arg7[%c0_337, %c0_338] : memref<64x128xf32, #tpu.memory_space<vmem>>, vector<64x128xf32>
    %cst_339 = arith.constant dense<0.000000e+00> : vector<2x128xf32>
    %648 = tpu.matmul %646, %647, %cst_339 {dimension_numbers = #tpu.dot_dimension_numbers<[1], [0], [0], [1], [0, 0, 1, 1], [], []>} : vector<2x64xf32>, vector<64x128xf32>, vector<2x128xf32> -> vector<2x128xf32>
    %c0_340 = arith.constant 0 : index
    %c0_341 = arith.constant 0 : index
    %649 = vector.load %arg9[%c0_340, %c0_341] : memref<1x128xf32, #tpu.memory_space<vmem>>, vector<1x128xf32>
    %650 = vector.broadcast %649 : vector<1x128xf32> to vector<2x128xf32>
    %651 = arith.addf %648, %650 : vector<2x128xf32>
    %c5_342 = arith.constant 5 : index
    %c0_343 = arith.constant 0 : index
    %c0_344 = arith.constant 0 : index
    %652 = vector.load %arg15[%c5_342, %c0_343, %c0_344] : memref<8x2x128xf32, #tpu.memory_space<vmem>>, vector<1x2x128xf32>
    %653 = vector.shape_cast %652 : vector<1x2x128xf32> to vector<2x128xf32>
    %654 = vector.shape_cast %651 : vector<2x128xf32> to vector<1x2x128xf32>
    tpu.vector_store %arg15[%c5_342, %c0_343, %c0_344], %654 {strides = array<i32>} : memref<8x2x128xf32, #tpu.memory_space<vmem>>, vector<1x2x128xf32>,
    %c6_345 = arith.constant 6 : index
    %c0_346 = arith.constant 0 : index
    %c0_347 = arith.constant 0 : index
    %655 = vector.load %arg14[%c6_345, %c0_346, %c0_347] : memref<8x2x256xf32, #tpu.memory_space<vmem>>, vector<1x2x256xf32>
    %656 = vector.shape_cast %655 : vector<1x2x256xf32> to vector<2x256xf32>
    %c0_348 = arith.constant 0 : index
    %c0_349 = arith.constant 0 : index
    %657 = vector.load %arg5[%c0_348, %c0_349] : memref<64x256xf32, #tpu.memory_space<vmem>>, vector<64x256xf32>
    %cst_350 = arith.constant dense<0.000000e+00> : vector<2x256xf32>
    %658 = tpu.matmul %646, %657, %cst_350 {dimension_numbers = #tpu.dot_dimension_numbers<[1], [0], [0], [1], [0, 0, 1, 1], [], []>} : vector<2x64xf32>, vector<64x256xf32>, vector<2x256xf32> -> vector<2x256xf32>
    %659 = arith.addf %656, %658 : vector<2x256xf32>
    %660 = arith.negf %659 : vector<2x256xf32>
    %661 = math.exp %660 : vector<2x256xf32>
    %cst_351 = arith.constant 1.000000e+00 : f32
    %662 = vector.broadcast %cst_351 : f32 to vector<2x256xf32>
    %663 = arith.addf %662, %661 : vector<2x256xf32>
    %664 = arith.divf %662, %663 : vector<2x256xf32>
    %665 = math.tanh %659 : vector<2x256xf32>
    %666 = vector.extract_strided_slice %664 {offsets = [0, 0], sizes = [2, 64], strides = [1, 1]} : vector<2x256xf32> to vector<2x64xf32>
    %667 = vector.extract_strided_slice %664 {offsets = [0, 64], sizes = [2, 64], strides = [1, 1]} : vector<2x256xf32> to vector<2x64xf32>
    %668 = vector.extract_strided_slice %665 {offsets = [0, 128], sizes = [2, 64], strides = [1, 1]} : vector<2x256xf32> to vector<2x64xf32>
    %669 = vector.extract_strided_slice %664 {offsets = [0, 192], sizes = [2, 64], strides = [1, 1]} : vector<2x256xf32> to vector<2x64xf32>
    %670 = arith.mulf %667, %644 : vector<2x64xf32>
    %671 = arith.mulf %666, %668 : vector<2x64xf32>
    %672 = arith.addf %670, %671 : vector<2x64xf32>
    %673 = math.tanh %672 : vector<2x64xf32>
    %674 = arith.mulf %669, %673 : vector<2x64xf32>
    %c0_352 = arith.constant 0 : index
    %c0_353 = arith.constant 0 : index
    %675 = vector.load %arg7[%c0_352, %c0_353] : memref<64x128xf32, #tpu.memory_space<vmem>>, vector<64x128xf32>
    %cst_354 = arith.constant dense<0.000000e+00> : vector<2x128xf32>
    %676 = tpu.matmul %674, %675, %cst_354 {dimension_numbers = #tpu.dot_dimension_numbers<[1], [0], [0], [1], [0, 0, 1, 1], [], []>} : vector<2x64xf32>, vector<64x128xf32>, vector<2x128xf32> -> vector<2x128xf32>
    %c0_355 = arith.constant 0 : index
    %c0_356 = arith.constant 0 : index
    %677 = vector.load %arg9[%c0_355, %c0_356] : memref<1x128xf32, #tpu.memory_space<vmem>>, vector<1x128xf32>
    %678 = vector.broadcast %677 : vector<1x128xf32> to vector<2x128xf32>
    %679 = arith.addf %676, %678 : vector<2x128xf32>
    %c6_357 = arith.constant 6 : index
    %c0_358 = arith.constant 0 : index
    %c0_359 = arith.constant 0 : index
    %680 = vector.load %arg15[%c6_357, %c0_358, %c0_359] : memref<8x2x128xf32, #tpu.memory_space<vmem>>, vector<1x2x128xf32>
    %681 = vector.shape_cast %680 : vector<1x2x128xf32> to vector<2x128xf32>
    %682 = vector.shape_cast %679 : vector<2x128xf32> to vector<1x2x128xf32>
    tpu.vector_store %arg15[%c6_357, %c0_358, %c0_359], %682 {strides = array<i32>} : memref<8x2x128xf32, #tpu.memory_space<vmem>>, vector<1x2x128xf32>,
    %c7_360 = arith.constant 7 : index
    %c0_361 = arith.constant 0 : index
    %c0_362 = arith.constant 0 : index
    %683 = vector.load %arg14[%c7_360, %c0_361, %c0_362] : memref<8x2x256xf32, #tpu.memory_space<vmem>>, vector<1x2x256xf32>
    %684 = vector.shape_cast %683 : vector<1x2x256xf32> to vector<2x256xf32>
    %c0_363 = arith.constant 0 : index
    %c0_364 = arith.constant 0 : index
    %685 = vector.load %arg5[%c0_363, %c0_364] : memref<64x256xf32, #tpu.memory_space<vmem>>, vector<64x256xf32>
    %cst_365 = arith.constant dense<0.000000e+00> : vector<2x256xf32>
    %686 = tpu.matmul %674, %685, %cst_365 {dimension_numbers = #tpu.dot_dimension_numbers<[1], [0], [0], [1], [0, 0, 1, 1], [], []>} : vector<2x64xf32>, vector<64x256xf32>, vector<2x256xf32> -> vector<2x256xf32>
    %687 = arith.addf %684, %686 : vector<2x256xf32>
    %688 = arith.negf %687 : vector<2x256xf32>
    %689 = math.exp %688 : vector<2x256xf32>
    %cst_366 = arith.constant 1.000000e+00 : f32
    %690 = vector.broadcast %cst_366 : f32 to vector<2x256xf32>
    %691 = arith.addf %690, %689 : vector<2x256xf32>
    %692 = arith.divf %690, %691 : vector<2x256xf32>
    %693 = math.tanh %687 : vector<2x256xf32>
    %694 = vector.extract_strided_slice %692 {offsets = [0, 0], sizes = [2, 64], strides = [1, 1]} : vector<2x256xf32> to vector<2x64xf32>
    %695 = vector.extract_strided_slice %692 {offsets = [0, 64], sizes = [2, 64], strides = [1, 1]} : vector<2x256xf32> to vector<2x64xf32>
    %696 = vector.extract_strided_slice %693 {offsets = [0, 128], sizes = [2, 64], strides = [1, 1]} : vector<2x256xf32> to vector<2x64xf32>
    %697 = vector.extract_strided_slice %692 {offsets = [0, 192], sizes = [2, 64], strides = [1, 1]} : vector<2x256xf32> to vector<2x64xf32>
    %698 = arith.mulf %695, %672 : vector<2x64xf32>
    %699 = arith.mulf %694, %696 : vector<2x64xf32>
    %700 = arith.addf %698, %699 : vector<2x64xf32>
    %701 = math.tanh %700 : vector<2x64xf32>
    %702 = arith.mulf %697, %701 : vector<2x64xf32>
    %c0_367 = arith.constant 0 : index
    %c0_368 = arith.constant 0 : index
    %703 = vector.load %arg7[%c0_367, %c0_368] : memref<64x128xf32, #tpu.memory_space<vmem>>, vector<64x128xf32>
    %cst_369 = arith.constant dense<0.000000e+00> : vector<2x128xf32>
    %704 = tpu.matmul %702, %703, %cst_369 {dimension_numbers = #tpu.dot_dimension_numbers<[1], [0], [0], [1], [0, 0, 1, 1], [], []>} : vector<2x64xf32>, vector<64x128xf32>, vector<2x128xf32> -> vector<2x128xf32>
    %c0_370 = arith.constant 0 : index
    %c0_371 = arith.constant 0 : index
    %705 = vector.load %arg9[%c0_370, %c0_371] : memref<1x128xf32, #tpu.memory_space<vmem>>, vector<1x128xf32>
    %706 = vector.broadcast %705 : vector<1x128xf32> to vector<2x128xf32>
    %707 = arith.addf %704, %706 : vector<2x128xf32>
    %c7_372 = arith.constant 7 : index
    %c0_373 = arith.constant 0 : index
    %c0_374 = arith.constant 0 : index
    %708 = vector.load %arg15[%c7_372, %c0_373, %c0_374] : memref<8x2x128xf32, #tpu.memory_space<vmem>>, vector<1x2x128xf32>
    %709 = vector.shape_cast %708 : vector<1x2x128xf32> to vector<2x128xf32>
    %710 = vector.shape_cast %707 : vector<2x128xf32> to vector<1x2x128xf32>
    tpu.vector_store %arg15[%c7_372, %c0_373, %c0_374], %710 {strides = array<i32>} : memref<8x2x128xf32, #tpu.memory_space<vmem>>, vector<1x2x128xf32>,
    %cst_375 = arith.constant 0.000000e+00 : f32
    %711 = vector.broadcast %cst_375 : f32 to vector<2x32xf32>
    %cst_376 = arith.constant 0.000000e+00 : f32
    %712 = vector.broadcast %cst_376 : f32 to vector<2x32xf32>
    %c0_377 = arith.constant 0 : index
    %c0_378 = arith.constant 0 : index
    %c0_379 = arith.constant 0 : index
    %713 = vector.load %arg15[%c0_377, %c0_378, %c0_379] : memref<8x2x128xf32, #tpu.memory_space<vmem>>, vector<1x2x128xf32>
    %714 = vector.shape_cast %713 : vector<1x2x128xf32> to vector<2x128xf32>
    %c0_380 = arith.constant 0 : index
    %c0_381 = arith.constant 0 : index
    %715 = vector.load %arg8[%c0_380, %c0_381] : memref<32x128xf32, #tpu.memory_space<vmem>>, vector<32x128xf32>
    %cst_382 = arith.constant dense<0.000000e+00> : vector<2x128xf32>
    %716 = tpu.matmul %711, %715, %cst_382 {dimension_numbers = #tpu.dot_dimension_numbers<[1], [0], [0], [1], [0, 0, 1, 1], [], []>} : vector<2x32xf32>, vector<32x128xf32>, vector<2x128xf32> -> vector<2x128xf32>
    %717 = arith.addf %714, %716 : vector<2x128xf32>
    %718 = arith.negf %717 : vector<2x128xf32>
    %719 = math.exp %718 : vector<2x128xf32>
    %cst_383 = arith.constant 1.000000e+00 : f32
    %720 = vector.broadcast %cst_383 : f32 to vector<2x128xf32>
    %721 = arith.addf %720, %719 : vector<2x128xf32>
    %722 = arith.divf %720, %721 : vector<2x128xf32>
    %723 = math.tanh %717 : vector<2x128xf32>
    %724 = vector.extract_strided_slice %722 {offsets = [0, 0], sizes = [2, 32], strides = [1, 1]} : vector<2x128xf32> to vector<2x32xf32>
    %725 = vector.extract_strided_slice %722 {offsets = [0, 32], sizes = [2, 32], strides = [1, 1]} : vector<2x128xf32> to vector<2x32xf32>
    %726 = vector.extract_strided_slice %723 {offsets = [0, 64], sizes = [2, 32], strides = [1, 1]} : vector<2x128xf32> to vector<2x32xf32>
    %727 = vector.extract_strided_slice %722 {offsets = [0, 96], sizes = [2, 32], strides = [1, 1]} : vector<2x128xf32> to vector<2x32xf32>
    %728 = arith.mulf %725, %712 : vector<2x32xf32>
    %729 = arith.mulf %724, %726 : vector<2x32xf32>
    %730 = arith.addf %728, %729 : vector<2x32xf32>
    %731 = math.tanh %730 : vector<2x32xf32>
    %732 = arith.mulf %727, %731 : vector<2x32xf32>
    %c1_384 = arith.constant 1 : index
    %c0_385 = arith.constant 0 : index
    %c0_386 = arith.constant 0 : index
    %733 = vector.load %arg15[%c1_384, %c0_385, %c0_386] : memref<8x2x128xf32, #tpu.memory_space<vmem>>, vector<1x2x128xf32>
    %734 = vector.shape_cast %733 : vector<1x2x128xf32> to vector<2x128xf32>
    %c0_387 = arith.constant 0 : index
    %c0_388 = arith.constant 0 : index
    %735 = vector.load %arg8[%c0_387, %c0_388] : memref<32x128xf32, #tpu.memory_space<vmem>>, vector<32x128xf32>
    %cst_389 = arith.constant dense<0.000000e+00> : vector<2x128xf32>
    %736 = tpu.matmul %732, %735, %cst_389 {dimension_numbers = #tpu.dot_dimension_numbers<[1], [0], [0], [1], [0, 0, 1, 1], [], []>} : vector<2x32xf32>, vector<32x128xf32>, vector<2x128xf32> -> vector<2x128xf32>
    %737 = arith.addf %734, %736 : vector<2x128xf32>
    %738 = arith.negf %737 : vector<2x128xf32>
    %739 = math.exp %738 : vector<2x128xf32>
    %cst_390 = arith.constant 1.000000e+00 : f32
    %740 = vector.broadcast %cst_390 : f32 to vector<2x128xf32>
    %741 = arith.addf %740, %739 : vector<2x128xf32>
    %742 = arith.divf %740, %741 : vector<2x128xf32>
    %743 = math.tanh %737 : vector<2x128xf32>
    %744 = vector.extract_strided_slice %742 {offsets = [0, 0], sizes = [2, 32], strides = [1, 1]} : vector<2x128xf32> to vector<2x32xf32>
    %745 = vector.extract_strided_slice %742 {offsets = [0, 32], sizes = [2, 32], strides = [1, 1]} : vector<2x128xf32> to vector<2x32xf32>
    %746 = vector.extract_strided_slice %743 {offsets = [0, 64], sizes = [2, 32], strides = [1, 1]} : vector<2x128xf32> to vector<2x32xf32>
    %747 = vector.extract_strided_slice %742 {offsets = [0, 96], sizes = [2, 32], strides = [1, 1]} : vector<2x128xf32> to vector<2x32xf32>
    %748 = arith.mulf %745, %730 : vector<2x32xf32>
    %749 = arith.mulf %744, %746 : vector<2x32xf32>
    %750 = arith.addf %748, %749 : vector<2x32xf32>
    %751 = math.tanh %750 : vector<2x32xf32>
    %752 = arith.mulf %747, %751 : vector<2x32xf32>
    %c2_391 = arith.constant 2 : index
    %c0_392 = arith.constant 0 : index
    %c0_393 = arith.constant 0 : index
    %753 = vector.load %arg15[%c2_391, %c0_392, %c0_393] : memref<8x2x128xf32, #tpu.memory_space<vmem>>, vector<1x2x128xf32>
    %754 = vector.shape_cast %753 : vector<1x2x128xf32> to vector<2x128xf32>
    %c0_394 = arith.constant 0 : index
    %c0_395 = arith.constant 0 : index
    %755 = vector.load %arg8[%c0_394, %c0_395] : memref<32x128xf32, #tpu.memory_space<vmem>>, vector<32x128xf32>
    %cst_396 = arith.constant dense<0.000000e+00> : vector<2x128xf32>
    %756 = tpu.matmul %752, %755, %cst_396 {dimension_numbers = #tpu.dot_dimension_numbers<[1], [0], [0], [1], [0, 0, 1, 1], [], []>} : vector<2x32xf32>, vector<32x128xf32>, vector<2x128xf32> -> vector<2x128xf32>
    %757 = arith.addf %754, %756 : vector<2x128xf32>
    %758 = arith.negf %757 : vector<2x128xf32>
    %759 = math.exp %758 : vector<2x128xf32>
    %cst_397 = arith.constant 1.000000e+00 : f32
    %760 = vector.broadcast %cst_397 : f32 to vector<2x128xf32>
    %761 = arith.addf %760, %759 : vector<2x128xf32>
    %762 = arith.divf %760, %761 : vector<2x128xf32>
    %763 = math.tanh %757 : vector<2x128xf32>
    %764 = vector.extract_strided_slice %762 {offsets = [0, 0], sizes = [2, 32], strides = [1, 1]} : vector<2x128xf32> to vector<2x32xf32>
    %765 = vector.extract_strided_slice %762 {offsets = [0, 32], sizes = [2, 32], strides = [1, 1]} : vector<2x128xf32> to vector<2x32xf32>
    %766 = vector.extract_strided_slice %763 {offsets = [0, 64], sizes = [2, 32], strides = [1, 1]} : vector<2x128xf32> to vector<2x32xf32>
    %767 = vector.extract_strided_slice %762 {offsets = [0, 96], sizes = [2, 32], strides = [1, 1]} : vector<2x128xf32> to vector<2x32xf32>
    %768 = arith.mulf %765, %750 : vector<2x32xf32>
    %769 = arith.mulf %764, %766 : vector<2x32xf32>
    %770 = arith.addf %768, %769 : vector<2x32xf32>
    %771 = math.tanh %770 : vector<2x32xf32>
    %772 = arith.mulf %767, %771 : vector<2x32xf32>
    %c3_398 = arith.constant 3 : index
    %c0_399 = arith.constant 0 : index
    %c0_400 = arith.constant 0 : index
    %773 = vector.load %arg15[%c3_398, %c0_399, %c0_400] : memref<8x2x128xf32, #tpu.memory_space<vmem>>, vector<1x2x128xf32>
    %774 = vector.shape_cast %773 : vector<1x2x128xf32> to vector<2x128xf32>
    %c0_401 = arith.constant 0 : index
    %c0_402 = arith.constant 0 : index
    %775 = vector.load %arg8[%c0_401, %c0_402] : memref<32x128xf32, #tpu.memory_space<vmem>>, vector<32x128xf32>
    %cst_403 = arith.constant dense<0.000000e+00> : vector<2x128xf32>
    %776 = tpu.matmul %772, %775, %cst_403 {dimension_numbers = #tpu.dot_dimension_numbers<[1], [0], [0], [1], [0, 0, 1, 1], [], []>} : vector<2x32xf32>, vector<32x128xf32>, vector<2x128xf32> -> vector<2x128xf32>
    %777 = arith.addf %774, %776 : vector<2x128xf32>
    %778 = arith.negf %777 : vector<2x128xf32>
    %779 = math.exp %778 : vector<2x128xf32>
    %cst_404 = arith.constant 1.000000e+00 : f32
    %780 = vector.broadcast %cst_404 : f32 to vector<2x128xf32>
    %781 = arith.addf %780, %779 : vector<2x128xf32>
    %782 = arith.divf %780, %781 : vector<2x128xf32>
    %783 = math.tanh %777 : vector<2x128xf32>
    %784 = vector.extract_strided_slice %782 {offsets = [0, 0], sizes = [2, 32], strides = [1, 1]} : vector<2x128xf32> to vector<2x32xf32>
    %785 = vector.extract_strided_slice %782 {offsets = [0, 32], sizes = [2, 32], strides = [1, 1]} : vector<2x128xf32> to vector<2x32xf32>
    %786 = vector.extract_strided_slice %783 {offsets = [0, 64], sizes = [2, 32], strides = [1, 1]} : vector<2x128xf32> to vector<2x32xf32>
    %787 = vector.extract_strided_slice %782 {offsets = [0, 96], sizes = [2, 32], strides = [1, 1]} : vector<2x128xf32> to vector<2x32xf32>
    %788 = arith.mulf %785, %770 : vector<2x32xf32>
    %789 = arith.mulf %784, %786 : vector<2x32xf32>
    %790 = arith.addf %788, %789 : vector<2x32xf32>
    %791 = math.tanh %790 : vector<2x32xf32>
    %792 = arith.mulf %787, %791 : vector<2x32xf32>
    %c4_405 = arith.constant 4 : index
    %c0_406 = arith.constant 0 : index
    %c0_407 = arith.constant 0 : index
    %793 = vector.load %arg15[%c4_405, %c0_406, %c0_407] : memref<8x2x128xf32, #tpu.memory_space<vmem>>, vector<1x2x128xf32>
    %794 = vector.shape_cast %793 : vector<1x2x128xf32> to vector<2x128xf32>
    %c0_408 = arith.constant 0 : index
    %c0_409 = arith.constant 0 : index
    %795 = vector.load %arg8[%c0_408, %c0_409] : memref<32x128xf32, #tpu.memory_space<vmem>>, vector<32x128xf32>
    %cst_410 = arith.constant dense<0.000000e+00> : vector<2x128xf32>
    %796 = tpu.matmul %792, %795, %cst_410 {dimension_numbers = #tpu.dot_dimension_numbers<[1], [0], [0], [1], [0, 0, 1, 1], [], []>} : vector<2x32xf32>, vector<32x128xf32>, vector<2x128xf32> -> vector<2x128xf32>
    %797 = arith.addf %794, %796 : vector<2x128xf32>
    %798 = arith.negf %797 : vector<2x128xf32>
    %799 = math.exp %798 : vector<2x128xf32>
    %cst_411 = arith.constant 1.000000e+00 : f32
    %800 = vector.broadcast %cst_411 : f32 to vector<2x128xf32>
    %801 = arith.addf %800, %799 : vector<2x128xf32>
    %802 = arith.divf %800, %801 : vector<2x128xf32>
    %803 = math.tanh %797 : vector<2x128xf32>
    %804 = vector.extract_strided_slice %802 {offsets = [0, 0], sizes = [2, 32], strides = [1, 1]} : vector<2x128xf32> to vector<2x32xf32>
    %805 = vector.extract_strided_slice %802 {offsets = [0, 32], sizes = [2, 32], strides = [1, 1]} : vector<2x128xf32> to vector<2x32xf32>
    %806 = vector.extract_strided_slice %803 {offsets = [0, 64], sizes = [2, 32], strides = [1, 1]} : vector<2x128xf32> to vector<2x32xf32>
    %807 = vector.extract_strided_slice %802 {offsets = [0, 96], sizes = [2, 32], strides = [1, 1]} : vector<2x128xf32> to vector<2x32xf32>
    %808 = arith.mulf %805, %790 : vector<2x32xf32>
    %809 = arith.mulf %804, %806 : vector<2x32xf32>
    %810 = arith.addf %808, %809 : vector<2x32xf32>
    %811 = math.tanh %810 : vector<2x32xf32>
    %812 = arith.mulf %807, %811 : vector<2x32xf32>
    %c5_412 = arith.constant 5 : index
    %c0_413 = arith.constant 0 : index
    %c0_414 = arith.constant 0 : index
    %813 = vector.load %arg15[%c5_412, %c0_413, %c0_414] : memref<8x2x128xf32, #tpu.memory_space<vmem>>, vector<1x2x128xf32>
    %814 = vector.shape_cast %813 : vector<1x2x128xf32> to vector<2x128xf32>
    %c0_415 = arith.constant 0 : index
    %c0_416 = arith.constant 0 : index
    %815 = vector.load %arg8[%c0_415, %c0_416] : memref<32x128xf32, #tpu.memory_space<vmem>>, vector<32x128xf32>
    %cst_417 = arith.constant dense<0.000000e+00> : vector<2x128xf32>
    %816 = tpu.matmul %812, %815, %cst_417 {dimension_numbers = #tpu.dot_dimension_numbers<[1], [0], [0], [1], [0, 0, 1, 1], [], []>} : vector<2x32xf32>, vector<32x128xf32>, vector<2x128xf32> -> vector<2x128xf32>
    %817 = arith.addf %814, %816 : vector<2x128xf32>
    %818 = arith.negf %817 : vector<2x128xf32>
    %819 = math.exp %818 : vector<2x128xf32>
    %cst_418 = arith.constant 1.000000e+00 : f32
    %820 = vector.broadcast %cst_418 : f32 to vector<2x128xf32>
    %821 = arith.addf %820, %819 : vector<2x128xf32>
    %822 = arith.divf %820, %821 : vector<2x128xf32>
    %823 = math.tanh %817 : vector<2x128xf32>
    %824 = vector.extract_strided_slice %822 {offsets = [0, 0], sizes = [2, 32], strides = [1, 1]} : vector<2x128xf32> to vector<2x32xf32>
    %825 = vector.extract_strided_slice %822 {offsets = [0, 32], sizes = [2, 32], strides = [1, 1]} : vector<2x128xf32> to vector<2x32xf32>
    %826 = vector.extract_strided_slice %823 {offsets = [0, 64], sizes = [2, 32], strides = [1, 1]} : vector<2x128xf32> to vector<2x32xf32>
    %827 = vector.extract_strided_slice %822 {offsets = [0, 96], sizes = [2, 32], strides = [1, 1]} : vector<2x128xf32> to vector<2x32xf32>
    %828 = arith.mulf %825, %810 : vector<2x32xf32>
    %829 = arith.mulf %824, %826 : vector<2x32xf32>
    %830 = arith.addf %828, %829 : vector<2x32xf32>
    %831 = math.tanh %830 : vector<2x32xf32>
    %832 = arith.mulf %827, %831 : vector<2x32xf32>
    %c6_419 = arith.constant 6 : index
    %c0_420 = arith.constant 0 : index
    %c0_421 = arith.constant 0 : index
    %833 = vector.load %arg15[%c6_419, %c0_420, %c0_421] : memref<8x2x128xf32, #tpu.memory_space<vmem>>, vector<1x2x128xf32>
    %834 = vector.shape_cast %833 : vector<1x2x128xf32> to vector<2x128xf32>
    %c0_422 = arith.constant 0 : index
    %c0_423 = arith.constant 0 : index
    %835 = vector.load %arg8[%c0_422, %c0_423] : memref<32x128xf32, #tpu.memory_space<vmem>>, vector<32x128xf32>
    %cst_424 = arith.constant dense<0.000000e+00> : vector<2x128xf32>
    %836 = tpu.matmul %832, %835, %cst_424 {dimension_numbers = #tpu.dot_dimension_numbers<[1], [0], [0], [1], [0, 0, 1, 1], [], []>} : vector<2x32xf32>, vector<32x128xf32>, vector<2x128xf32> -> vector<2x128xf32>
    %837 = arith.addf %834, %836 : vector<2x128xf32>
    %838 = arith.negf %837 : vector<2x128xf32>
    %839 = math.exp %838 : vector<2x128xf32>
    %cst_425 = arith.constant 1.000000e+00 : f32
    %840 = vector.broadcast %cst_425 : f32 to vector<2x128xf32>
    %841 = arith.addf %840, %839 : vector<2x128xf32>
    %842 = arith.divf %840, %841 : vector<2x128xf32>
    %843 = math.tanh %837 : vector<2x128xf32>
    %844 = vector.extract_strided_slice %842 {offsets = [0, 0], sizes = [2, 32], strides = [1, 1]} : vector<2x128xf32> to vector<2x32xf32>
    %845 = vector.extract_strided_slice %842 {offsets = [0, 32], sizes = [2, 32], strides = [1, 1]} : vector<2x128xf32> to vector<2x32xf32>
    %846 = vector.extract_strided_slice %843 {offsets = [0, 64], sizes = [2, 32], strides = [1, 1]} : vector<2x128xf32> to vector<2x32xf32>
    %847 = vector.extract_strided_slice %842 {offsets = [0, 96], sizes = [2, 32], strides = [1, 1]} : vector<2x128xf32> to vector<2x32xf32>
    %848 = arith.mulf %845, %830 : vector<2x32xf32>
    %849 = arith.mulf %844, %846 : vector<2x32xf32>
    %850 = arith.addf %848, %849 : vector<2x32xf32>
    %851 = math.tanh %850 : vector<2x32xf32>
    %852 = arith.mulf %847, %851 : vector<2x32xf32>
    %c7_426 = arith.constant 7 : index
    %c0_427 = arith.constant 0 : index
    %c0_428 = arith.constant 0 : index
    %853 = vector.load %arg15[%c7_426, %c0_427, %c0_428] : memref<8x2x128xf32, #tpu.memory_space<vmem>>, vector<1x2x128xf32>
    %854 = vector.shape_cast %853 : vector<1x2x128xf32> to vector<2x128xf32>
    %c0_429 = arith.constant 0 : index
    %c0_430 = arith.constant 0 : index
    %855 = vector.load %arg8[%c0_429, %c0_430] : memref<32x128xf32, #tpu.memory_space<vmem>>, vector<32x128xf32>
    %cst_431 = arith.constant dense<0.000000e+00> : vector<2x128xf32>
    %856 = tpu.matmul %852, %855, %cst_431 {dimension_numbers = #tpu.dot_dimension_numbers<[1], [0], [0], [1], [0, 0, 1, 1], [], []>} : vector<2x32xf32>, vector<32x128xf32>, vector<2x128xf32> -> vector<2x128xf32>
    %857 = arith.addf %854, %856 : vector<2x128xf32>
    %858 = arith.negf %857 : vector<2x128xf32>
    %859 = math.exp %858 : vector<2x128xf32>
    %cst_432 = arith.constant 1.000000e+00 : f32
    %860 = vector.broadcast %cst_432 : f32 to vector<2x128xf32>
    %861 = arith.addf %860, %859 : vector<2x128xf32>
    %862 = arith.divf %860, %861 : vector<2x128xf32>
    %863 = math.tanh %857 : vector<2x128xf32>
    %864 = vector.extract_strided_slice %862 {offsets = [0, 0], sizes = [2, 32], strides = [1, 1]} : vector<2x128xf32> to vector<2x32xf32>
    %865 = vector.extract_strided_slice %862 {offsets = [0, 32], sizes = [2, 32], strides = [1, 1]} : vector<2x128xf32> to vector<2x32xf32>
    %866 = vector.extract_strided_slice %863 {offsets = [0, 64], sizes = [2, 32], strides = [1, 1]} : vector<2x128xf32> to vector<2x32xf32>
    %867 = vector.extract_strided_slice %862 {offsets = [0, 96], sizes = [2, 32], strides = [1, 1]} : vector<2x128xf32> to vector<2x32xf32>
    %868 = arith.mulf %865, %850 : vector<2x32xf32>
    %869 = arith.mulf %864, %866 : vector<2x32xf32>
    %870 = arith.addf %868, %869 : vector<2x32xf32>
    %871 = math.tanh %870 : vector<2x32xf32>
    %872 = arith.mulf %867, %871 : vector<2x32xf32>
    %c0_433 = arith.constant 0 : index
    %c0_434 = arith.constant 0 : index
    %873 = vector.load %arg10[%c0_433, %c0_434] : memref<32x32xf32, #tpu.memory_space<vmem>>, vector<32x32xf32>
    %c0_435 = arith.constant 0 : index
    %c0_436 = arith.constant 0 : index
    %874 = vector.load %arg11[%c0_435, %c0_436] : memref<1x32xf32, #tpu.memory_space<vmem>>, vector<1x32xf32>
    %cst_437 = arith.constant dense<0.000000e+00> : vector<2x32xf32>
    %875 = tpu.matmul %872, %873, %cst_437 {dimension_numbers = #tpu.dot_dimension_numbers<[1], [0], [0], [1], [0, 0, 1, 1], [], []>} : vector<2x32xf32>, vector<32x32xf32>, vector<2x32xf32> -> vector<2x32xf32>
    %876 = vector.broadcast %874 : vector<1x32xf32> to vector<2x32xf32>
    %877 = arith.addf %875, %876 : vector<2x32xf32>
    %cst_438 = arith.constant 0.000000e+00 : f32
    %878 = vector.broadcast %cst_438 : f32 to vector<2x32xf32>
    %879 = arith.maximumf %877, %878 : vector<2x32xf32>
    %cst_439 = arith.constant dense<0.000000e+00> : vector<2x32xf32>
    %880 = tpu.matmul %879, %873, %cst_439 {dimension_numbers = #tpu.dot_dimension_numbers<[1], [0], [0], [1], [0, 0, 1, 1], [], []>} : vector<2x32xf32>, vector<32x32xf32>, vector<2x32xf32> -> vector<2x32xf32>
    %881 = vector.broadcast %874 : vector<1x32xf32> to vector<2x32xf32>
    %882 = arith.addf %880, %881 : vector<2x32xf32>
    %cst_440 = arith.constant 0.000000e+00 : f32
    %883 = vector.broadcast %cst_440 : f32 to vector<2x32xf32>
    %884 = arith.maximumf %882, %883 : vector<2x32xf32>
    %c0_441 = arith.constant 0 : index
    %c0_442 = arith.constant 0 : index
    %885 = vector.load %arg12[%c0_441, %c0_442] : memref<2x32xf32, #tpu.memory_space<vmem>>, vector<2x32xf32>
    tpu.vector_store %arg12[%c0_441, %c0_442], %884 {strides = array<i32>} : memref<2x32xf32, #tpu.memory_space<vmem>>, vector<2x32xf32>,
    return
  }
}

</mosaic_0001>

<bundles_post_ra>
// kernel: encoder_forward.1
= control target key start
LH: loop header
LB: loop body
LE: loop exit
PB: predicated region body
PF: predicated region fallthrough
CT: control target
= control target key end

     0   :  { %17 = vsyncpa [#allocation6], 0  ;;  %s10516_s0 = inlined_call_operand.vmem [shape: f32[2,32], index: 0, kind: input, shape index: {}]   ;;  %s10517_s1 = inlined_call_operand.vmem [shape: f32[4,256], index: 1, kind: input, shape index: {}]   ;;  %s10518_s2 = inlined_call_operand.hbm [shape: f32[64,256], index: 2, kind: input, shape index: {}]   ;;  %s10519_s3 = inlined_call_operand.vmem [shape: f32[1,256], index: 3, kind: input, shape index: {}]   ;;  %s10520_s4 = inlined_call_operand.hbm [shape: f32[64,256], index: 4, kind: input, shape index: {}]   ;;  %s10521_s5 = inlined_call_operand.hbm [shape: f32[64,256], index: 5, kind: input, shape index: {}]   ;;  %s10522_s6 = inlined_call_operand.hbm [shape: f32[1,256], index: 6, kind: input, shape index: {}]   ;;  %s10523_s7 = inlined_call_operand.vmem [shape: f32[64,128], index: 7, kind: input, shape index: {}]   ;;  %s10524_s8 = inlined_call_operand.hbm [shape: f32[32,128], index: 8, kind: input, shape index: {}]   ;;  %s10525_s9 = inlined_call_operand.vmem [shape: f32[1,128], index: 9, kind: input, shape index: {}]   ;;  %s10526_s10 = inlined_call_operand.hbm [shape: f32[32,32], index: 10, kind: input, shape index: {}]   ;;  %s10527_s11 = inlined_call_operand.hbm [shape: f32[1,32], index: 11, kind: input, shape index: {}]   ;;  %s10528_s12 = inlined_call_operand.hbm [shape: f32[2,32], index: 12, kind: output, shape index: {}]  }
   0x1   :  { %18 = vsyncpa [#allocation9], 0 }
   0x2   :  { %19 = vsyncpa [#allocation12], 0 }
   0x3   :  { %20 = vsyncpa [#allocation15], 0 }
   0x4   :  { %21 = vsyncpa [#allocation7], 0  ;;  %s9248_s21 = smov [#allocation8]   ;;  %s9249_s23 = smov [#allocation11]  }
   0x5   :  { %s45_s22 = sshll.u32 %s9248_s21, 4  ;;  %s70_s24 = sshll.u32 %s9249_s23, 4  ;;  %s46_s22 = int_to_ptr.vmem [resolvable:$true] %s45_s22  ;;  %s71_s24 = int_to_ptr.vmem [resolvable:$true] %s70_s24 }
   0x6   :  { %s9062_s27 = scalar_lea.hbm %s10520_s4, 2048 }
   0x7   :  { %p9063_p0 = scmp.ne.s32.totalorder %s10520_s4, %s9062_s27  ;;  %p9066_p1 = scmp.lt.u32.totalorder %s9062_s27, %s10520_s4 }
   0x9   :  { %p9068_p2 = pnand %p9066_p1, %p9063_p0 }
   0xb   :  { %9071 = shalt.err (!%p9068_p2)
}
   0xc   :  { %s9072_s14 = scalar_lea.vmem %s46_s22, 2048  ;;  %p9077_p4 = scmp.lt.s32.totalorder %s46_s22, %s46_s22 }
   0xd   :  { %p9073_p3 = scmp.ne.s32.totalorder %s46_s22, %s9072_s14  ;;  %p9078_p5 = scmp.lt.s32.totalorder %s9072_s14, %s9072_s14 }
   0xf   :  { %p9079_p6 = por %p9078_p5, %p9077_p4 }
  0x11   :  { %p9080_p7 = pnand %p9079_p6, %p9073_p3 }
  0x13   :  { %9083 = shalt.err (!%p9080_p7)
}
  0x14   :  { %s9250_s15 = smov 256   ;;  %s9251_s16 = smov 16  }
  0x15   :  { %51 = dma.hbm_to_vmem [thread:$0]  %s10520_s4, 2048, %s46_s22, [#allocation9], %s9250_s15, %s9250_s15, %s9251_s16  }
  0x16   :  { %s9084_s21 = scalar_lea.hbm %s10522_s6, 32 }
  0x17   :  { %p9085_p8 = scmp.ne.s32.totalorder %s10522_s6, %s9084_s21  ;;  %p9088_p9 = scmp.lt.u32.totalorder %s9084_s21, %s10522_s6 }
  0x19   :  { %p9090_p10 = pnand %p9088_p9, %p9085_p8 }
  0x1b   :  { %9093 = shalt.err (!%p9090_p10)
}
  0x1c   :  { %s9094_s28 = scalar_lea.vmem %s71_s24, 32  ;;  %p9099_p12 = scmp.lt.s32.totalorder %s71_s24, %s71_s24 }
  0x1d   :  { %p9095_p11 = scmp.ne.s32.totalorder %s71_s24, %s9094_s28  ;;  %p9100_p13 = scmp.lt.s32.totalorder %s9094_s28, %s9094_s28 }
  0x1f   :  { %p9101_p0 = por %p9100_p13, %p9099_p12 }
  0x21   :  { %p9102_p1 = pnand %p9101_p0, %p9095_p11 }
  0x23   :  { %9105 = shalt.err (!%p9102_p1)
}
  0x24   :  { %73 = dma.hbm_to_vmem [thread:$0]  %s10522_s6, 32, %s71_s24, [#allocation12]  }
  0x25   :  { %s9252_s29 = smov [#allocation14]   ;;  %s9253_s13 = smov [#allocation5]  }
  0x26   :  { %s95_s30 = sshll.u32 %s9252_s29, 4  ;;  %s31_s14 = sshll.u32 %s9253_s13, 4  ;;  %s96_s30 = int_to_ptr.vmem [resolvable:$true] %s95_s30  ;;  %s9365_s14 = int_to_ptr.vmem [resolvable:$true] %s31_s14 }
  0x27   :  { %s9106_s19 = scalar_lea.hbm %s10526_s10, 512 }
  0x28   :  { %p9107_p2 = scmp.ne.s32.totalorder %s10526_s10, %s9106_s19  ;;  %p9110_p3 = scmp.lt.u32.totalorder %s9106_s19, %s10526_s10 }
  0x2a   :  { %p9112_p4 = pnand %p9110_p3, %p9107_p2 }
  0x2c   :  { %9115 = shalt.err (!%p9112_p4)
}
  0x2d   :  { %s9116_s6 = scalar_lea.vmem %s96_s30, 512  ;;  %p9121_p6 = scmp.lt.s32.totalorder %s96_s30, %s96_s30 }
  0x2e   :  { %p9117_p5 = scmp.ne.s32.totalorder %s96_s30, %s9116_s6  ;;  %p9122_p7 = scmp.lt.s32.totalorder %s9116_s6, %s9116_s6 }
  0x30   :  { %p9123_p8 = por %p9122_p7, %p9121_p6 }
  0x32   :  { %p9124_p9 = pnand %p9123_p8, %p9117_p5 }
  0x34   :  { %9127 = shalt.err (!%p9124_p9)
}
  0x35   :  { %s9254_s24 = smov 128   ;;  %s9255_s26 = smov 8  }
  0x36   :  { %101 = dma.hbm_to_vmem [thread:$0]  %s10526_s10, 512, %s96_s30, [#allocation15], %s9254_s24, %s9254_s24, %s9255_s26  }
  0x37   :  { %s9128_s29 = scalar_lea.hbm %s10518_s2, 2048 }
  0x38   :  { %p9129_p10 = scmp.ne.s32.totalorder %s10518_s2, %s9128_s29  ;;  %p9132_p11 = scmp.lt.u32.totalorder %s9128_s29, %s10518_s2 }
  0x3a   :  { %p9134_p12 = pnand %p9132_p11, %p9129_p10 }
  0x3c   :  { %9137 = shalt.err (!%p9134_p12)
}
  0x3d   :  { %s9138_s20 = scalar_lea.vmem %s9365_s14, 2048  ;;  %p9143_p0 = scmp.lt.s32.totalorder %s9365_s14, %s9365_s14 }
  0x3e   :  { %p9139_p13 = scmp.ne.s32.totalorder %s9365_s14, %s9138_s20  ;;  %p9144_p1 = scmp.lt.s32.totalorder %s9138_s20, %s9138_s20 }
  0x40   :  { %p9145_p2 = por %p9144_p1, %p9143_p0 }
  0x42   :  { %p9146_p3 = pnand %p9145_p2, %p9139_p13 }
  0x44   :  { %9149 = shalt.err (!%p9146_p3)
}
  0x45   :  { %37 = dma.hbm_to_vmem [thread:$0]  %s10518_s2, 2048, %s9365_s14, [#allocation6], %s9250_s15, %s9250_s15, %s9251_s16  }
  0x46   :  { %s9256_s21 = smov [#allocation10]   ;;  %s9257_s25 = smov [#allocation13]  }
  0x47   :  { %s57_s23 = sshll.u32 %s9256_s21, 4  ;;  %s81_s6 = sshll.u32 %s9257_s25, 4  ;;  %s58_s23 = int_to_ptr.vmem [resolvable:$true] %s57_s23  ;;  %s9402_s6 = int_to_ptr.vmem [resolvable:$true] %s81_s6 }
  0x48   :  { %s9150_s4 = scalar_lea.hbm %s10521_s5, 2048 }
  0x49   :  { %p9151_p4 = scmp.ne.s32.totalorder %s10521_s5, %s9150_s4  ;;  %p9154_p5 = scmp.lt.u32.totalorder %s9150_s4, %s10521_s5 }
  0x4b   :  { %p9156_p6 = pnand %p9154_p5, %p9151_p4 }
  0x4d   :  { %9159 = shalt.err (!%p9156_p6)
}
  0x4e   :  { %s9160_s2 = scalar_lea.vmem %s58_s23, 2048  ;;  %p9165_p8 = scmp.lt.s32.totalorder %s58_s23, %s58_s23 }
  0x4f   :  { %p9161_p7 = scmp.ne.s32.totalorder %s58_s23, %s9160_s2  ;;  %p9166_p9 = scmp.lt.s32.totalorder %s9160_s2, %s9160_s2 }
  0x51   :  { %p9167_p10 = por %p9166_p9, %p9165_p8 }
  0x53   :  { %p9168_p11 = pnand %p9167_p10, %p9161_p7 }
  0x55   :  { %9171 = shalt.err (!%p9168_p11)
}
  0x56   :  { %63 = dma.hbm_to_vmem [thread:$0]  %s10521_s5, 2048, %s58_s23, [#allocation9], %s9250_s15, %s9250_s15, %s9251_s16  }
  0x57   :  { %s9172_s10 = scalar_lea.hbm %s10524_s8, 512 }
  0x58   :  { %p9173_p12 = scmp.ne.s32.totalorder %s10524_s8, %s9172_s10  ;;  %p9176_p13 = scmp.lt.u32.totalorder %s9172_s10, %s10524_s8 }
  0x5a   :  { %p9178_p0 = pnand %p9176_p13, %p9173_p12 }
  0x5c   :  { %9181 = shalt.err (!%p9178_p0)
}
  0x5d   :  { %s9182_s28 = scalar_lea.vmem %s9402_s6, 512  ;;  %p9187_p2 = scmp.lt.s32.totalorder %s9402_s6, %s9402_s6 }
  0x5e   :  { %p9183_p1 = scmp.ne.s32.totalorder %s9402_s6, %s9182_s28  ;;  %p9188_p3 = scmp.lt.s32.totalorder %s9182_s28, %s9182_s28 }
  0x60   :  { %p9189_p4 = por %p9188_p3, %p9187_p2 }
  0x62   :  { %p9190_p5 = pnand %p9189_p4, %p9183_p1 }
  0x64   :  { %9193 = shalt.err (!%p9190_p5)
}
  0x65   :  { %87 = dma.hbm_to_vmem [thread:$0]  %s10524_s8, 512, %s9402_s6, [#allocation12], %s9254_s24, %s9254_s24, %s9255_s26  }
  0x66   :  { %s9258_s16 = smov [#allocation16]   ;;  %s9194_s29 = scalar_lea.hbm %s10527_s11, 16 }
  0x67   :  { %s108_s23 = sshll.u32 %s9258_s16, 4  ;;  %p9195_p6 = scmp.ne.s32.totalorder %s10527_s11, %s9194_s29  ;;  %s109_s23 = int_to_ptr.vmem [resolvable:$true] %s108_s23 }
  0x68   :  { %p9198_p7 = scmp.lt.u32.totalorder %s9194_s29, %s10527_s11 }
  0x6a   :  { %p9200_p8 = pnand %p9198_p7, %p9195_p6 }
  0x6c   :  { %9203 = shalt.err (!%p9200_p8)
}
  0x6d   :  { %s9204_s18 = scalar_lea.vmem %s109_s23, 16  ;;  %s9208_s8 = scalar_lea.vmem %s109_s23, 32 }
  0x6e   :  { %p9205_p9 = scmp.ne.s32.totalorder %s109_s23, %s9204_s18  ;;  %p9209_p10 = scmp.lt.s32.totalorder %s109_s23, %s109_s23 }
  0x6f   :  { %p9210_p11 = scmp.lt.s32.totalorder %s9208_s8, %s9204_s18 }
  0x71   :  { %p9211_p12 = por %p9210_p11, %p9209_p10 }
  0x73   :  { %p9212_p13 = pnand %p9211_p12, %p9205_p9 }
  0x75   :  { %9215 = shalt.err (!%p9212_p13)
}
  0x76   :  { %111 = dma.hbm_to_vmem [thread:$0]  %s10527_s11, 16, %s109_s23, [#allocation15]  }
  0x77   :  { %9238 = dma.done.wait [#allocation6], 2048  }
  0x78   :  { %9239 = vsyncadd [#allocation6], 4294965248 }
  0x79   :  { %9240 = dma.done.wait [#allocation9], 4096  }
  0x7a   :  { %9241 = vsyncadd [#allocation9], 4294963200 }
  0x7b   :  { %9242 = dma.done.wait [#allocation12], 544  }
  0x7c   :  { %9243 = vsyncadd [#allocation12], 4294966752 }
  0x7d   :  { %9244 = dma.done.wait [#allocation15], 528  }
  0x7e   :  { %9245 = vsyncadd [#allocation15], 4294966768  ;;  %v9259_v0 = vmov 0.0   ;;  %v9456_v1 = vld [vmem:[%s10517_s1] sm:$0xff]  ;;  %vm153_vm0 = vcmask 1043456   ;;  %v230_v2 = vld [vmem:[#allocation5 + $0x8] sm:$0xff]  ;;  %v137_v28 = vlaneseq }
  0x7f   :  { %222 = vmatprep.mubr.f32.mxu0 %v9259_v0  ;;  %441 = vmatprep.mubr.f32.mxu1 %v9259_v0  ;;  %v232_v3 = vld [vmem:[#allocation5 + $0x18] sm:$0xff]  ;;  %v9460_v4 = vcombine.high %v9456_v1, %v9456_v1  ;;  %v229_v6 = vld [vmem:[#allocation5] sm:$0xff]  ;;  %v231_v7 = vld [vmem:[#allocation5 + $0x10] sm:$0xff]  ;;  %vm149_vm1 = vcmask 31744   ;;  %s9260_s21 = smov 64   ;;  %s9261_s25 = smov 124  }
  0x80   :  { %v9462_v5 = vpack.c.bf16 %v232_v3, %v230_v2  ;;  %v9467_v8 = vld [vmem:[%s10516_s0] sm:$0x3]  ;;  %v9469_v9 = vpack.c.bf16 %v231_v7, %v229_v6  ;;  %v234_v10 = vld [vmem:[#allocation5 + $0x28] sm:$0xff]  ;;  %v236_v11 = vld [vmem:[#allocation5 + $0x38] sm:$0xff]  ;;  %v9500_v29 = vshrl.u32 %v137_v28, 7  ;;  %vm245_vm2 = vcmask 523264  }
  0x81   :  { %7391 = vmatprep.subr.msk.mxu0 %vm153_vm0, %v9460_v4  ;;  %v9473_v12 = vpack.c.bf16 %v236_v11, %v234_v10  ;;  %v233_v13 = vld [vmem:[#allocation5 + $0x20] sm:$0xff]  ;;  %v235_v14 = vld [vmem:[#allocation5 + $0x30] sm:$0xff]  ;;  %v238_v15 = vld [vmem:[#allocation5 + $0x48] sm:$0xff]  ;;  %473 = vrot.lane.b32.xlu1 %v9467_v8, %s9261_s25  ;;  %s9262_s5 = smov 120   ;;  %s9263_s23 = smov 116   ;;  %vm9270_vm3 = vmmov 0  }
  0x82   :  { %7392 = vmatpush1.msk.msra.mxu0 %vm153_vm0, %v9456_v1  ;;  %v240_v16 = vld [vmem:[#allocation5 + $0x58] sm:$0xff]  ;;  %v9481_v17 = vpack.c.bf16 %v235_v14, %v233_v13  ;;  %v237_v19 = vld [vmem:[#allocation5 + $0x40] sm:$0xff]  ;;  %v239_v20 = vld [vmem:[#allocation5 + $0x50] sm:$0xff]  ;;  %v9503_v30 = vsub.s32 0, %v9500_v29  ;;  %v9510_v37 = vsub.s32 1, %v9500_v29  ;;  %s9264_s29 = smov 112  }
  0x83   :  { %7919 = vmatprep.subr.bf16.mxu0 %v9462_v5  ;;  %7393 = vmatmul.mubr.msk.f32.vlgmr.msra.gmra.mrb[0].mxu0 %vm149_vm1, %v9467_v8  ;;  %v9485_v18 = vpack.c.bf16 %v240_v16, %v238_v15  ;;  %v242_v21 = vld [vmem:[#allocation5 + $0x68] sm:$0xff]  ;;  %v244_v22 = vld [vmem:[#allocation5 + $0x78] sm:$0xff]  ;;  %v9488_v23 = vpack.c.bf16 %v239_v20, %v237_v19  ;;  %v241_v25 = vld [vmem:[#allocation5 + $0x60] sm:$0xff]  ;;  %s9265_s18 = smov 108   ;;  %s9266_s24 = smov 104   ;;  %vm6405_vm4 = vcmask 261120  }
  0x84   :  { %7921 = vmatpush1.bf16.msra.mxu0 %v9469_v9  ;;  %313 = vmatprep.mubr.f32.mxu0 %v9259_v0  ;;  %v9491_v24 = vpack.c.bf16 %v244_v22, %v242_v21  ;;  %v243_v26 = vld [vmem:[#allocation5 + $0x70] sm:$0xff]  ;;  %v345_v45 = vld [vmem:[#allocation8 + $0x8] sm:$0xff]  ;;  %v347_v46 = vld [vmem:[#allocation8 + $0x18] sm:$0xff]  ;;  %s9267_s20 = smov 100   ;;  %vm7371_vm5 = vcmask 254976  }
  0x85   :  { %7923 = vmatprep.subr.bf16.mxu0 %v9473_v12  ;;  %v9494_v27 = vpack.c.bf16 %v243_v26, %v241_v25  ;;  %v135_v31 = vld [vmem:[%s10519_s3] sm:$0x3]  ;;  %v344_v47 = vld [vmem:[#allocation8] sm:$0xff]  ;;  %v9515_v48 = vpack.c.bf16 %v347_v46, %v345_v45  ;;  %v349_v50 = vld [vmem:[#allocation8 + $0x28] sm:$0xff] }
  0x86   :  { %v140_v32 = vrot.slane %v135_v31, %v9503_v30  ;;  %v144_v38 = vrot.slane %v135_v31, %v9510_v37  ;;  %v346_v49 = vld [vmem:[#allocation8 + $0x10] sm:$0xff]  ;;  %v351_v51 = vld [vmem:[#allocation8 + $0x38] sm:$0xff]  ;;  %v348_v54 = vld [vmem:[#allocation8 + $0x20] sm:$0xff] }
  0x87   :  { %v9517_v52 = vpack.c.bf16 %v346_v49, %v344_v47  ;;  %v9519_v53 = vpack.c.bf16 %v351_v51, %v349_v50  ;;  %v350_v55 = vld [vmem:[#allocation8 + $0x30] sm:$0xff]  ;;  %v353_v56 = vld [vmem:[#allocation8 + $0x48] sm:$0xff]  ;;  %7935 = vmatprep.subr.bf16.mxu1 %v9515_v48  ;;  %v355_v57 = vld [vmem:[#allocation8 + $0x58] sm:$0xff] }
  0x88   :  { %7925 = vmatpush1.bf16.msra.mxu0 %v9481_v17  ;;  %v9524_v58 = vpack.c.bf16 %v350_v55, %v348_v54  ;;  %v9528_v59 = vpack.c.bf16 %v355_v57, %v353_v56  ;;  %v352_v60 = vld [vmem:[#allocation8 + $0x40] sm:$0xff]  ;;  %v354_v61 = vld [vmem:[#allocation8 + $0x50] sm:$0xff]  ;;  %v357_v62 = vld [vmem:[#allocation8 + $0x68] sm:$0xff] }
  0x89   :  { %7927 = vmatprep.subr.bf16.mxu0 %v9485_v18  ;;  %7937 = vmatpush1.bf16.msra.mxu1 %v9517_v52  ;;  %v359_v63 = vld [vmem:[#allocation8 + $0x78] sm:$0xff]  ;;  %v9532_v2 = vpack.c.bf16 %v354_v61, %v352_v60  ;;  %v356_v6 = vld [vmem:[#allocation8 + $0x60] sm:$0xff]  ;;  %v358_v7 = vld [vmem:[#allocation8 + $0x70] sm:$0xff] }
  0x8a   :  { %7939 = vmatprep.subr.bf16.mxu1 %v9519_v53  ;;  %v9536_v3 = vpack.c.bf16 %v359_v63, %v357_v62  ;;  %v9540_v10 = vpack.c.bf16 %v358_v7, %v356_v6  ;;  %v360_v28 = vld [vmem:[#allocation11] sm:$0x3] }
  0x8b   :  { %v365_v31 = vrot.slane %v360_v28, %v9503_v30 }
  0x8c   :  { %7929 = vmatpush1.bf16.msra.mxu0 %v9488_v23 }
  0x8d   :  { %7931 = vmatprep.subr.bf16.mxu0 %v9491_v24  ;;  %7941 = vmatpush1.bf16.msra.mxu1 %v9524_v58 }
  0x8e   :  { %7943 = vmatprep.subr.bf16.mxu1 %v9528_v59 }
  0x90   :  { %7933 = vmatpush1.bf16.msra.mxu0 %v9494_v27 }
  0x91   :  { %7967 = vmatprep.subr.bf16.mxu0 %v9515_v48  ;;  %7945 = vmatpush1.bf16.msra.mxu1 %v9532_v2 }
  0x92   :  { %7947 = vmatprep.subr.bf16.mxu1 %v9536_v3 }
  0x93   :  { %314 = vmatmul.mubr.f32.vlgmr.msra.gmra.mrb[0].mxu0 %v9259_v0 }
  0x94   :  { %762 = vmatprep.mubr.f32.mxu0 %v9259_v0  ;;  %7969 = vmatpush1.bf16.msra.mxu0 %v9517_v52 }
  0x95   :  { %7971 = vmatprep.subr.bf16.mxu0 %v9519_v53  ;;  %7949 = vmatpush1.bf16.msra.mxu1 %v9540_v10 }
  0x96   :  { %7398 = vmatprep.subr.msk.mxu1 %vm153_vm0, %v9460_v4 }
  0x98   :  { %7973 = vmatpush1.bf16.msra.mxu0 %v9524_v58 }
  0x99   :  { %7975 = vmatprep.subr.bf16.mxu0 %v9528_v59 }
  0x9c   :  { %7977 = vmatpush1.bf16.msra.mxu0 %v9532_v2 }
  0x9d   :  { %7979 = vmatprep.subr.bf16.mxu0 %v9536_v3 }
  0xa0   :  { %7981 = vmatpush1.bf16.msra.mxu0 %v9540_v10 }
  0xa1   :  { %7406 = vmatprep.subr.msk.mxu0 %vm153_vm0, %v9460_v4 }
  0xf3   :  { %v474_v26 = vpop.permute.xlu1 %473 }
 0x166   :  { %v315_v33 = vpop.f32.mrb[0].mxu0 }
 0x167   :  { %v8714_v34 = vadd.f32 %v315_v33, %v140_v32  ;;  %v317_v35 = vpop.f32.mrb[1].mxu0  ;;  %v369_v32 = vrot.slane %v360_v28, %v9510_v37 }
 0x168   :  { %v8715_v39 = vadd.f32 %v317_v35, %v144_v38 }
 0x169   :  { %v7394_v36 = vmul.f32 -1.442695, %v8714_v34 }
 0x16a   :  { %v7395_v11 = vmul.f32 -1.442695, %v8715_v39 }
 0x16b   :  { %8773 = vpow2.f32 %v7394_v36 }
 0x16c   :  { %8775 = vtanh.f32 %v8715_v39  ;;  %v461_v39 = vld [vmem:[%s10519_s3] sm:$0x3] }
 0x16d   :  { %v470_v45 = vrot.slane %v461_v39, %v9510_v37 }
 0x175   :  { %v8774_v40 = vpop.eup %8773 }
 0x176   :  { %v328_v41 = vadd.f32 1.0, %v8774_v40  ;;  %v8776_v42 = vpop.eup %8775  ;;  %v466_v40 = vrot.slane %v461_v39, %v9503_v30 }
 0x178   :  { %8777 = vrcp.f32 %v328_v41 }
 0x179   :  { %8779 = vpow2.f32 %v7395_v11 }
 0x182   :  { %v8778_v43 = vpop.eup %8777 }
 0x183   :  { %v336_v44 = vmul.f32 %v8778_v43, %v8776_v42  ;;  %v8780_v13 = vpop.eup %8779  ;;  %v335_v15 = vmul.f32 0.0, %v8778_v43 }
 0x184   :  { %v329_v14 = vadd.f32 1.0, %v8780_v13 }
 0x185   :  { %338 = vrot.lane.b32.xlu0 %v336_v44, %s9260_s21 }
 0x186   :  { %8781 = vrcp.f32 %v329_v14  ;;  %v681_v14 = vld [vmem:[#allocation11] sm:$0x3] }
 0x190   :  { %v8782_v20 = vpop.eup %8781 }
 0x1f7   :  { %v339_v16 = vpop.permute.xlu0 %338 }
 0x1f8   :  { %v9551_v19 = vadd.f32 %v339_v16, %v335_v15  ;;  %v686_v15 = vrot.slane %v681_v14, %v9503_v30  ;;  %v690_v16 = vrot.slane %v681_v14, %v9510_v37 }
 0x1fa   :  { %8783 = vtanh.f32 %v9551_v19 }
 0x204   :  { %v8784_v21 = vpop.eup %8783 }
 0x205   :  { %v343_v22 = vmul.f32 %v8784_v21, %v8782_v20 }
 0x207   :  { %373 = vrot.lane.b32.xlu0 %v343_v22, %s9260_s21 }
 0x279   :  { %v374_v25 = vpop.permute.xlu0 %373 }
 0x27a   :  { %7396 = vmatmul.mubr.msk.f32.vlgmr.msra.gmra.mrb[0].mxu1 %vm245_vm2, %v374_v25 }
 0x27b   :  { %7399 = vmatpush1.msk.msra.mxu1 %vm153_vm0, %v9456_v1  ;;  %547 = vmatprep.mubr.f32.mxu1 %v9259_v0 }
 0x27c   :  { %7951 = vmatprep.subr.bf16.mxu1 %v9462_v5 }
 0x27e   :  { %7400 = vmatmul.mubr.msk.f32.vlgmr.msra.gmra.mrb[2].mxu1 %vm149_vm1, %v474_v26  ;;  %v783_v26 = vld [vmem:[%s10519_s3] sm:$0x3] }
 0x27f   :  { %7953 = vmatpush1.bf16.msra.mxu1 %v9469_v9  ;;  %634 = vmatprep.mubr.f32.mxu1 %v9259_v0  ;;  %v788_v28 = vrot.slane %v783_v26, %v9503_v30 }
 0x280   :  { %7955 = vmatprep.subr.bf16.mxu1 %v9473_v12 }
 0x283   :  { %7957 = vmatpush1.bf16.msra.mxu1 %v9481_v17 }
 0x284   :  { %7959 = vmatprep.subr.bf16.mxu1 %v9485_v18 }
 0x287   :  { %7961 = vmatpush1.bf16.msra.mxu1 %v9488_v23 }
 0x288   :  { %7963 = vmatprep.subr.bf16.mxu1 %v9491_v24 }
 0x28b   :  { %7965 = vmatpush1.bf16.msra.mxu1 %v9494_v27 }
 0x28c   :  { %7999 = vmatprep.subr.bf16.mxu1 %v9515_v48 }
 0x28e   :  { %7401 = vmatmul.mubr.msk.f32.vlgmr.msra.gmra.mrb[2].mxu1 %vm245_vm2, %v374_v25 }
 0x28f   :  { %8001 = vmatpush1.bf16.msra.mxu1 %v9517_v52  ;;  %1084 = vmatprep.mubr.f32.mxu1 %v9259_v0 }
 0x290   :  { %8003 = vmatprep.subr.bf16.mxu1 %v9519_v53 }
 0x293   :  { %8005 = vmatpush1.bf16.msra.mxu1 %v9524_v58 }
 0x294   :  { %8007 = vmatprep.subr.bf16.mxu1 %v9528_v59 }
 0x297   :  { %8009 = vmatpush1.bf16.msra.mxu1 %v9532_v2 }
 0x298   :  { %8011 = vmatprep.subr.bf16.mxu1 %v9536_v3 }
 0x29b   :  { %8013 = vmatpush1.bf16.msra.mxu1 %v9540_v10 }
 0x29c   :  { %7414 = vmatprep.subr.msk.mxu1 %vm153_vm0, %v9460_v4 }
 0x34d   :  { %v443_v33 = vpop.f32.mrb[0].mxu1 }
 0x34e   :  { %v444_v34 = vadd.f32 %v443_v33, %v365_v31  ;;  %v445_v35 = vpop.f32.mrb[1].mxu1 }
 0x34f   :  { %v446_v36 = vadd.f32 %v445_v35, %v369_v32 }
 0x351   :  { %v450_v38 = vcombine.low %v444_v34, %v446_v36  ;;  %v792_v34 = vrot.slane %v783_v26, %v9510_v37 }
 0x353   :  { %7397 = vst.sshfl [vmem:[#allocation2] sm:$0x33 pattern:$0x76325410] %v450_v38 }
 0x361   :  { %v636_v41 = vpop.f32.mrb[2].mxu1 }
 0x362   :  { %v8716_v42 = vadd.f32 %v636_v41, %v466_v40  ;;  %v638_v43 = vpop.f32.mrb[3].mxu1 }
 0x363   :  { %v8717_v46 = vadd.f32 %v638_v43, %v470_v45 }
 0x364   :  { %v7402_v44 = vmul.f32 -1.442695, %v8716_v42 }
 0x365   :  { %v7403_v55 = vmul.f32 -1.442695, %v8717_v46 }
 0x366   :  { %8785 = vpow2.f32 %v7402_v44 }
 0x367   :  { %8787 = vtanh.f32 %v8717_v46 }
 0x370   :  { %v8786_v47 = vpop.eup %8785 }
 0x371   :  { %v649_v49 = vadd.f32 1.0, %v8786_v47  ;;  %v8788_v50 = vpop.eup %8787 }
 0x373   :  { %8789 = vrcp.f32 %v649_v49 }
 0x374   :  { %8791 = vpow2.f32 %v7403_v55 }
 0x37d   :  { %v8790_v51 = vpop.eup %8789 }
 0x37e   :  { %v657_v54 = vmul.f32 %v8790_v51, %v8788_v50  ;;  %v8792_v56 = vpop.eup %8791  ;;  %v656_v60 = vmul.f32 %v8790_v51, %v9551_v19 }
 0x37f   :  { %v650_v57 = vadd.f32 1.0, %v8792_v56  ;;  %v1003_v56 = vld [vmem:[#allocation11] sm:$0x3] }
 0x380   :  { %659 = vrot.lane.b32.xlu1 %v657_v54, %s9260_s21 }
 0x381   :  { %8793 = vrcp.f32 %v650_v57  ;;  %v1012_v57 = vrot.slane %v1003_v56, %v9510_v37 }
 0x384   :  { %795 = vrot.lane.b32.xlu1 %v9467_v8, %s9262_s5 }
 0x38b   :  { %v8794_v63 = vpop.eup %8793 }
 0x3f2   :  { %v660_v61 = vpop.permute.xlu1 %659 }
 0x3f3   :  { %v9591_v62 = vadd.f32 %v660_v61, %v656_v60 }
 0x3f5   :  { %8795 = vtanh.f32 %v9591_v62 }
 0x3f6   :  { %v796_v13 = vpop.permute.xlu1 %795 }
 0x3ff   :  { %v8796_v6 = vpop.eup %8795 }
 0x400   :  { %v664_v7 = vmul.f32 %v8796_v6, %v8794_v63 }
 0x402   :  { %694 = vrot.lane.b32.xlu0 %v664_v7, %s9260_s21 }
 0x474   :  { %v695_v11 = vpop.permute.xlu0 %694 }
 0x475   :  { %7404 = vmatmul.mubr.msk.f32.vlgmr.msra.gmra.mrb[2].mxu0 %vm245_vm2, %v695_v11 }
 0x476   :  { %7407 = vmatpush1.msk.msra.mxu0 %vm153_vm0, %v9456_v1  ;;  %869 = vmatprep.mubr.f32.mxu0 %v9259_v0 }
 0x477   :  { %7983 = vmatprep.subr.bf16.mxu0 %v9462_v5 }
 0x479   :  { %7408 = vmatmul.mubr.msk.f32.vlgmr.msra.gmra.mrb[4].mxu0 %vm149_vm1, %v796_v13 }
 0x47a   :  { %7985 = vmatpush1.bf16.msra.mxu0 %v9469_v9  ;;  %956 = vmatprep.mubr.f32.mxu0 %v9259_v0 }
 0x47b   :  { %7987 = vmatprep.subr.bf16.mxu0 %v9473_v12 }
 0x47e   :  { %7989 = vmatpush1.bf16.msra.mxu0 %v9481_v17 }
 0x47f   :  { %7991 = vmatprep.subr.bf16.mxu0 %v9485_v18 }
 0x482   :  { %7993 = vmatpush1.bf16.msra.mxu0 %v9488_v23 }
 0x483   :  { %7995 = vmatprep.subr.bf16.mxu0 %v9491_v24 }
 0x486   :  { %7997 = vmatpush1.bf16.msra.mxu0 %v9494_v27 }
 0x487   :  { %8031 = vmatprep.subr.bf16.mxu0 %v9515_v48 }
 0x489   :  { %7409 = vmatmul.mubr.msk.f32.vlgmr.msra.gmra.mrb[4].mxu0 %vm245_vm2, %v695_v11 }
 0x48a   :  { %8033 = vmatpush1.bf16.msra.mxu0 %v9517_v52  ;;  %1406 = vmatprep.mubr.f32.mxu0 %v9259_v0 }
 0x48b   :  { %8035 = vmatprep.subr.bf16.mxu0 %v9519_v53 }
 0x48e   :  { %8037 = vmatpush1.bf16.msra.mxu0 %v9524_v58 }
 0x48f   :  { %8039 = vmatprep.subr.bf16.mxu0 %v9528_v59 }
 0x492   :  { %8041 = vmatpush1.bf16.msra.mxu0 %v9532_v2 }
 0x493   :  { %8043 = vmatprep.subr.bf16.mxu0 %v9536_v3 }
 0x496   :  { %8045 = vmatpush1.bf16.msra.mxu0 %v9540_v10 }
 0x497   :  { %7422 = vmatprep.subr.msk.mxu0 %vm153_vm0, %v9460_v4 }
 0x548   :  { %v764_v19 = vpop.f32.mrb[2].mxu0 }
 0x549   :  { %v765_v20 = vadd.f32 %v764_v19, %v686_v15  ;;  %v766_v21 = vpop.f32.mrb[3].mxu0 }
 0x54a   :  { %v767_v22 = vadd.f32 %v766_v21, %v690_v16 }
 0x54c   :  { %v771_v25 = vcombine.low %v765_v20, %v767_v22 }
 0x54e   :  { %7405 = vst.sshfl [vmem:[#allocation2 + $0x4] sm:$0x33 pattern:$0x76325410] %v771_v25 }
 0x55c   :  { %v958_v31 = vpop.f32.mrb[4].mxu0 }
 0x55d   :  { %v8718_v32 = vadd.f32 %v958_v31, %v788_v28  ;;  %v960_v4 = vpop.f32.mrb[5].mxu0 }
 0x55e   :  { %v8719_v35 = vadd.f32 %v960_v4, %v792_v34 }
 0x55f   :  { %v7410_v33 = vmul.f32 -1.442695, %v8718_v32 }
 0x560   :  { %v7411_v42 = vmul.f32 -1.442695, %v8719_v35 }
 0x561   :  { %8797 = vpow2.f32 %v7410_v33 }
 0x562   :  { %8799 = vtanh.f32 %v8719_v35 }
 0x56b   :  { %v8798_v36 = vpop.eup %8797 }
 0x56c   :  { %v971_v38 = vadd.f32 1.0, %v8798_v36  ;;  %v8800_v39 = vpop.eup %8799 }
 0x56e   :  { %8801 = vrcp.f32 %v971_v38 }
 0x56f   :  { %8803 = vpow2.f32 %v7411_v42 }
 0x578   :  { %v8802_v40 = vpop.eup %8801 }
 0x579   :  { %v979_v41 = vmul.f32 %v8802_v40, %v8800_v39  ;;  %v8804_v43 = vpop.eup %8803  ;;  %v978_v45 = vmul.f32 %v8802_v40, %v9591_v62 }
 0x57a   :  { %v972_v44 = vadd.f32 1.0, %v8804_v43 }
 0x57b   :  { %981 = vrot.lane.b32.xlu0 %v979_v41, %s9260_s21 }
 0x57c   :  { %8805 = vrcp.f32 %v972_v44 }
 0x57f   :  { %1117 = vrot.lane.b32.xlu0 %v9467_v8, %s9263_s23 }
 0x586   :  { %v8806_v49 = vpop.eup %8805 }
 0x5ed   :  { %v982_v46 = vpop.permute.xlu0 %981 }
 0x5ee   :  { %v9631_v47 = vadd.f32 %v982_v46, %v978_v45 }
 0x5f0   :  { %8807 = vtanh.f32 %v9631_v47 }
 0x5f1   :  { %v1118_v55 = vpop.permute.xlu0 %1117 }
 0x5fa   :  { %v8808_v50 = vpop.eup %8807 }
 0x5fb   :  { %v986_v51 = vmul.f32 %v8808_v50, %v8806_v49 }
 0x5fd   :  { %1016 = vrot.lane.b32.xlu1 %v986_v51, %s9260_s21 }
 0x66f   :  { %v1017_v54 = vpop.permute.xlu1 %1016 }
 0x670   :  { %7412 = vmatmul.mubr.msk.f32.vlgmr.msra.gmra.mrb[4].mxu1 %vm245_vm2, %v1017_v54 }
 0x671   :  { %7415 = vmatpush1.msk.msra.mxu1 %vm153_vm0, %v9456_v1  ;;  %1191 = vmatprep.mubr.f32.mxu1 %v9259_v0 }
 0x672   :  { %8015 = vmatprep.subr.bf16.mxu1 %v9462_v5 }
 0x674   :  { %7416 = vmatmul.mubr.msk.f32.vlgmr.msra.gmra.mrb[6].mxu1 %vm149_vm1, %v1118_v55 }
 0x675   :  { %8017 = vmatpush1.bf16.msra.mxu1 %v9469_v9  ;;  %1278 = vmatprep.mubr.f32.mxu1 %v9259_v0 }
 0x676   :  { %8019 = vmatprep.subr.bf16.mxu1 %v9473_v12 }
 0x679   :  { %8021 = vmatpush1.bf16.msra.mxu1 %v9481_v17 }
 0x67a   :  { %8023 = vmatprep.subr.bf16.mxu1 %v9485_v18 }
 0x67d   :  { %8025 = vmatpush1.bf16.msra.mxu1 %v9488_v23 }
 0x67e   :  { %8027 = vmatprep.subr.bf16.mxu1 %v9491_v24 }
 0x681   :  { %8029 = vmatpush1.bf16.msra.mxu1 %v9494_v27 }
 0x682   :  { %8063 = vmatprep.subr.bf16.mxu1 %v9515_v48  ;;  %v1008_v48 = vrot.slane %v1003_v56, %v9503_v30 }
 0x684   :  { %7417 = vmatmul.mubr.msk.f32.vlgmr.msra.gmra.mrb[6].mxu1 %vm245_vm2, %v1017_v54 }
 0x685   :  { %8065 = vmatpush1.bf16.msra.mxu1 %v9517_v52  ;;  %1728 = vmatprep.mubr.f32.mxu1 %v9259_v0 }
 0x686   :  { %8067 = vmatprep.subr.bf16.mxu1 %v9519_v53 }
 0x689   :  { %8069 = vmatpush1.bf16.msra.mxu1 %v9524_v58  ;;  %v1105_v58 = vld [vmem:[%s10519_s3] sm:$0x3] }
 0x68a   :  { %8071 = vmatprep.subr.bf16.mxu1 %v9528_v59  ;;  %v1110_v59 = vrot.slane %v1105_v58, %v9503_v30  ;;  %v1114_v6 = vrot.slane %v1105_v58, %v9510_v37  ;;  %v1842_v58 = vld [vmem:[#allocation5] sm:$0xff] }
 0x68d   :  { %8073 = vmatpush1.bf16.msra.mxu1 %v9532_v2 }
 0x68e   :  { %8075 = vmatprep.subr.bf16.mxu1 %v9536_v3 }
 0x691   :  { %8077 = vmatpush1.bf16.msra.mxu1 %v9540_v10 }
 0x743   :  { %v1086_v52 = vpop.f32.mrb[4].mxu1 }
 0x744   :  { %v1087_v60 = vadd.f32 %v1086_v52, %v1008_v48  ;;  %v1088_v61 = vpop.f32.mrb[5].mxu1 }
 0x745   :  { %v1089_v62 = vadd.f32 %v1088_v61, %v1012_v57  ;;  %v1843_v61 = vld [vmem:[#allocation5 + $0x8] sm:$0xff] }
 0x747   :  { %v1093_v53 = vcombine.low %v1087_v60, %v1089_v62  ;;  %v1845_v62 = vld [vmem:[#allocation5 + $0x18] sm:$0xff] }
 0x749   :  { %7413 = vst.sshfl [vmem:[#allocation2 + $0x8] sm:$0x33 pattern:$0x76325410] %v1093_v53  ;;  %v9710_v53 = vpack.c.bf16 %v1845_v62, %v1843_v61  ;;  %v1957_v61 = vld [vmem:[#allocation8 + $0x20] sm:$0xff]  ;;  %v1959_v62 = vld [vmem:[#allocation8 + $0x30] sm:$0xff] }
 0x757   :  { %v1280_v2 = vpop.f32.mrb[6].mxu1 }
 0x758   :  { %v8720_v3 = vadd.f32 %v1280_v2, %v1110_v59  ;;  %v1282_v10 = vpop.f32.mrb[7].mxu1  ;;  %v1844_v59 = vld [vmem:[#allocation5 + $0x10] sm:$0xff] }
 0x759   :  { %v8721_v7 = vadd.f32 %v1282_v10, %v1114_v6  ;;  %v1849_v10 = vld [vmem:[#allocation5 + $0x38] sm:$0xff]  ;;  %v9716_v6 = vpack.c.bf16 %v1844_v59, %v1842_v58  ;;  %v1962_v58 = vld [vmem:[#allocation8 + $0x48] sm:$0xff] }
 0x75a   :  { %v7418_v63 = vmul.f32 -1.442695, %v8720_v3  ;;  %v1847_v3 = vld [vmem:[#allocation5 + $0x28] sm:$0xff]  ;;  %v1964_v59 = vld [vmem:[#allocation8 + $0x58] sm:$0xff] }
 0x75b   :  { %v7419_v19 = vmul.f32 -1.442695, %v8721_v7 }
 0x75c   :  { %8809 = vpow2.f32 %v7418_v63 }
 0x75d   :  { %8811 = vtanh.f32 %v8721_v7  ;;  %v9719_v7 = vpack.c.bf16 %v1849_v10, %v1847_v3  ;;  %v1961_v3 = vld [vmem:[#allocation8 + $0x40] sm:$0xff]  ;;  %v1963_v10 = vld [vmem:[#allocation8 + $0x50] sm:$0xff] }
 0x766   :  { %v8810_v11 = vpop.eup %8809 }
 0x767   :  { %v1293_v13 = vadd.f32 1.0, %v8810_v11  ;;  %v8812_v14 = vpop.eup %8811  ;;  %v1846_v11 = vld [vmem:[#allocation5 + $0x20] sm:$0xff] }
 0x769   :  { %8813 = vrcp.f32 %v1293_v13  ;;  %v1848_v13 = vld [vmem:[#allocation5 + $0x30] sm:$0xff] }
 0x76a   :  { %8815 = vpow2.f32 %v7419_v19 }
 0x773   :  { %v8814_v15 = vpop.eup %8813 }
 0x774   :  { %v1301_v16 = vmul.f32 %v8814_v15, %v8812_v14  ;;  %v8816_v20 = vpop.eup %8815  ;;  %v1300_v22 = vmul.f32 %v8814_v15, %v9631_v47  ;;  %v9697_v47 = vld [vmem:[%s10517_s1] sm:$0xff]  ;;  %v1851_v14 = vld [vmem:[#allocation5 + $0x48] sm:$0xff]  ;;  %v1853_v15 = vld [vmem:[#allocation5 + $0x58] sm:$0xff]  ;;  %s9272_s1 = smov [#allocation17]  }
 0x775   :  { %v1294_v21 = vadd.f32 1.0, %v8816_v20  ;;  %v9701_v49 = vcombine.high %v9697_v47, %v9697_v47  ;;  %v9727_v19 = vpack.c.bf16 %v1853_v15, %v1851_v14  ;;  %v1850_v20 = vld [vmem:[#allocation5 + $0x40] sm:$0xff]  ;;  %s7379_s8 = sshll.u32 %s9272_s1, 4  ;;  %s7380_s8 = int_to_ptr.vmem [resolvable:$true] %s7379_s8 }
 0x776   :  { %1303 = vrot.lane.b32.xlu1 %v1301_v16, %s9260_s21  ;;  %v9723_v16 = vpack.c.bf16 %v1848_v13, %v1846_v11  ;;  %v1968_v11 = vld [vmem:[#allocation8 + $0x78] sm:$0xff]  ;;  %v9768_v13 = vpack.c.bf16 %v1963_v10, %v1961_v3  ;;  %v1965_v15 = vld [vmem:[#allocation8 + $0x60] sm:$0xff]  ;;  %p9221_p1 = scmp.lt.s32.totalorder %s7380_s8, %s7380_s8 }
 0x777   :  { %8817 = vrcp.f32 %v1294_v21  ;;  %7430 = vmatprep.subr.msk.mxu1 %vm153_vm0, %v9701_v49  ;;  %v1852_v21 = vld [vmem:[#allocation5 + $0x50] sm:$0xff] }
 0x77a   :  { %1439 = vrot.lane.b32.xlu1 %v9467_v8, %s9264_s29 }
 0x781   :  { %v8818_v28 = vpop.eup %8817 }
 0x7e8   :  { %v1304_v25 = vpop.permute.xlu1 %1303 }
 0x7e9   :  { %v1306_v26 = vadd.f32 %v1304_v25, %v1300_v22  ;;  %v1855_v22 = vld [vmem:[#allocation5 + $0x68] sm:$0xff]  ;;  %v1857_v25 = vld [vmem:[#allocation5 + $0x78] sm:$0xff] }
 0x7eb   :  { %8819 = vtanh.f32 %v1306_v26 }
 0x7ec   :  { %v1440_v33 = vpop.permute.xlu1 %1439 }
 0x7f5   :  { %v8820_v31 = vpop.eup %8819 }
 0x7f6   :  { %v1308_v32 = vmul.f32 %v8820_v31, %v8818_v28  ;;  %v9733_v28 = vpack.c.bf16 %v1857_v25, %v1855_v22  ;;  %v1854_v31 = vld [vmem:[#allocation5 + $0x60] sm:$0xff] }
 0x7f8   :  { %1338 = vrot.lane.b32.xlu0 %v1308_v32, %s9260_s21  ;;  %v1856_v32 = vld [vmem:[#allocation5 + $0x70] sm:$0xff] }
 0x86a   :  { %v1339_v4 = vpop.permute.xlu0 %1338 }
 0x86b   :  { %7420 = vmatmul.mubr.msk.f32.vlgmr.msra.gmra.mrb[6].mxu0 %vm245_vm2, %v1339_v4 }
 0x86c   :  { %7423 = vmatpush1.msk.msra.mxu0 %vm153_vm0, %v9456_v1  ;;  %1513 = vmatprep.mubr.f32.mxu0 %v9259_v0  ;;  %v1325_v1 = vld [vmem:[#allocation11] sm:$0x3] }
 0x86d   :  { %8047 = vmatprep.subr.bf16.mxu0 %v9462_v5  ;;  %v1330_v5 = vrot.slane %v1325_v1, %v9503_v30 }
 0x86f   :  { %7424 = vmatmul.mubr.msk.f32.vlgmr.msra.gmra.mrb[8].mxu0 %vm149_vm1, %v1440_v33  ;;  %v1647_v33 = vld [vmem:[#allocation11] sm:$0x3] }
 0x870   :  { %8049 = vmatpush1.bf16.msra.mxu0 %v9469_v9  ;;  %1600 = vmatprep.mubr.f32.mxu0 %v9259_v0  ;;  %v1334_v9 = vrot.slane %v1325_v1, %v9510_v37  ;;  %v1652_v1 = vrot.slane %v1647_v33, %v9503_v30 }
 0x871   :  { %8051 = vmatprep.subr.bf16.mxu0 %v9473_v12 }
 0x874   :  { %8053 = vmatpush1.bf16.msra.mxu0 %v9481_v17 }
 0x875   :  { %8055 = vmatprep.subr.bf16.mxu0 %v9485_v18 }
 0x878   :  { %8057 = vmatpush1.bf16.msra.mxu0 %v9488_v23  ;;  %v1427_v23 = vld [vmem:[%s10519_s3] sm:$0x3] }
 0x879   :  { %8059 = vmatprep.subr.bf16.mxu0 %v9491_v24  ;;  %v1432_v24 = vrot.slane %v1427_v23, %v9503_v30  ;;  %v1436_v40 = vrot.slane %v1427_v23, %v9510_v37 }
 0x87c   :  { %8061 = vmatpush1.bf16.msra.mxu0 %v9494_v27 }
 0x87f   :  { %7425 = vmatmul.mubr.msk.f32.vlgmr.msra.gmra.mrb[8].mxu0 %vm245_vm2, %v1339_v4  ;;  %v9736_v4 = vpack.c.bf16 %v1856_v32, %v1854_v31 }
 0x880   :  { %2050 = vmatprep.mubr.f32.mxu0 %v9259_v0 }
 0x93e   :  { %v1408_v12 = vpop.f32.mrb[6].mxu0 }
 0x93f   :  { %v1409_v34 = vadd.f32 %v1408_v12, %v1330_v5  ;;  %v1410_v17 = vpop.f32.mrb[7].mxu0  ;;  %v1656_v5 = vrot.slane %v1647_v33, %v9510_v37 }
 0x940   :  { %v1411_v35 = vadd.f32 %v1410_v17, %v1334_v9 }
 0x942   :  { %v1415_v18 = vcombine.low %v1409_v34, %v1411_v35 }
 0x944   :  { %7421 = vst.sshfl [vmem:[#allocation2 + $0xc] sm:$0x33 pattern:$0x76325410] %v1415_v18  ;;  %v1749_v18 = vld [vmem:[%s10519_s3] sm:$0x3] }
 0x945   :  { %v1754_v23 = vrot.slane %v1749_v18, %v9503_v30 }
 0x952   :  { %v1602_v27 = vpop.f32.mrb[8].mxu0 }
 0x953   :  { %v8722_v36 = vadd.f32 %v1602_v27, %v1432_v24  ;;  %v1604_v38 = vpop.f32.mrb[9].mxu0 }
 0x954   :  { %v8723_v41 = vadd.f32 %v1604_v38, %v1436_v40 }
 0x955   :  { %v7426_v39 = vmul.f32 -1.442695, %v8722_v36 }
 0x956   :  { %v7427_v50 = vmul.f32 -1.442695, %v8723_v41 }
 0x957   :  { %8821 = vpow2.f32 %v7426_v39  ;;  %v1758_v39 = vrot.slane %v1749_v18, %v9510_v37 }
 0x958   :  { %8823 = vtanh.f32 %v8723_v41 }
 0x961   :  { %v8822_v42 = vpop.eup %8821 }
 0x962   :  { %v1615_v43 = vadd.f32 1.0, %v8822_v42  ;;  %v8824_v44 = vpop.eup %8823 }
 0x964   :  { %8825 = vrcp.f32 %v1615_v43 }
 0x965   :  { %8827 = vpow2.f32 %v7427_v50  ;;  %v1956_v50 = vld [vmem:[#allocation8 + $0x18] sm:$0xff] }
 0x96e   :  { %v8826_v45 = vpop.eup %8825 }
 0x96f   :  { %v1623_v46 = vmul.f32 %v8826_v45, %v8824_v44  ;;  %v8828_v51 = vpop.eup %8827  ;;  %v1622_v55 = vmul.f32 %v8826_v45, %v1306_v26  ;;  %v9730_v26 = vpack.c.bf16 %v1852_v21, %v1850_v20  ;;  %v1967_v20 = vld [vmem:[#allocation8 + $0x70] sm:$0xff] }
 0x970   :  { %v1616_v54 = vadd.f32 1.0, %v8828_v51  ;;  %v1953_v51 = vld [vmem:[#allocation8] sm:$0xff]  ;;  %v9776_v21 = vpack.c.bf16 %v1967_v20, %v1965_v15 }
 0x971   :  { %1625 = vrot.lane.b32.xlu0 %v1623_v46, %s9260_s21  ;;  %v1954_v46 = vld [vmem:[#allocation8 + $0x8] sm:$0xff] }
 0x972   :  { %8829 = vrcp.f32 %v1616_v54  ;;  %v9750_v54 = vpack.c.bf16 %v1956_v50, %v1954_v46 }
 0x974   :  { %8095 = vmatprep.subr.bf16.mxu0 %v9750_v54 }
 0x975   :  { %1761 = vrot.lane.b32.xlu0 %v9467_v8, %s9265_s18 }
 0x97c   :  { %v8830_v57 = vpop.eup %8829 }
 0x9e3   :  { %v1626_v56 = vpop.permute.xlu0 %1625 }
 0x9e4   :  { %v9706_v48 = vadd.f32 %v1626_v56, %v1622_v55  ;;  %v1955_v55 = vld [vmem:[#allocation8 + $0x10] sm:$0xff]  ;;  %v1958_v56 = vld [vmem:[#allocation8 + $0x28] sm:$0xff] }
 0x9e6   :  { %8831 = vtanh.f32 %v9706_v48 }
 0x9e7   :  { %v1762_v63 = vpop.permute.xlu0 %1761 }
 0x9f0   :  { %v8832_v52 = vpop.eup %8831 }
 0x9f1   :  { %v1630_v60 = vmul.f32 %v8832_v52, %v8830_v57  ;;  %v1960_v57 = vld [vmem:[#allocation8 + $0x38] sm:$0xff]  ;;  %v9753_v52 = vpack.c.bf16 %v1955_v55, %v1953_v51 }
 0x9f3   :  { %1660 = vrot.lane.b32.xlu1 %v1630_v60, %s9260_s21  ;;  %v9755_v60 = vpack.c.bf16 %v1960_v57, %v1958_v56  ;;  %8097 = vmatpush1.bf16.msra.mxu0 %v9753_v52  ;;  %v9061_v57 = vld [vmem:[%s10516_s0] sm:$0x3] }
 0x9f5   :  { %8099 = vmatprep.subr.bf16.mxu0 %v9755_v60 }
 0xa65   :  { %v1661_v2 = vpop.permute.xlu1 %1660 }
 0xa66   :  { %7428 = vmatmul.mubr.msk.f32.vlgmr.msra.gmra.mrb[8].mxu1 %vm245_vm2, %v1661_v2 }
 0xa67   :  { %7431 = vmatpush1.msk.msra.mxu1 %vm153_vm0, %v9697_v47  ;;  %1835 = vmatprep.mubr.f32.mxu1 %v9259_v0 }
 0xa68   :  { %8079 = vmatprep.subr.bf16.mxu1 %v9710_v53 }
 0xa6a   :  { %7432 = vmatmul.mubr.msk.f32.vlgmr.msra.gmra.mrb[10].mxu1 %vm149_vm1, %v1762_v63  ;;  %v1966_v63 = vld [vmem:[#allocation8 + $0x68] sm:$0xff] }
 0xa6b   :  { %8081 = vmatpush1.bf16.msra.mxu1 %v9716_v6  ;;  %1922 = vmatprep.mubr.f32.mxu1 %v9259_v0  ;;  %v9772_v14 = vpack.c.bf16 %v1968_v11, %v1966_v63 }
 0xa6c   :  { %8083 = vmatprep.subr.bf16.mxu1 %v9719_v7 }
 0xa6f   :  { %8085 = vmatpush1.bf16.msra.mxu1 %v9723_v16 }
 0xa70   :  { %8087 = vmatprep.subr.bf16.mxu1 %v9727_v19 }
 0xa73   :  { %8089 = vmatpush1.bf16.msra.mxu1 %v9730_v26 }
 0xa74   :  { %8091 = vmatprep.subr.bf16.mxu1 %v9733_v28 }
 0xa77   :  { %8093 = vmatpush1.bf16.msra.mxu1 %v9736_v4 }
 0xa78   :  { %8127 = vmatprep.subr.bf16.mxu1 %v9750_v54 }
 0xa7a   :  { %7433 = vmatmul.mubr.msk.f32.vlgmr.msra.gmra.mrb[10].mxu1 %vm245_vm2, %v1661_v2  ;;  %v9760_v2 = vpack.c.bf16 %v1959_v62, %v1957_v61 }
 0xa7b   :  { %2372 = vmatprep.mubr.f32.mxu1 %v9259_v0  ;;  %8129 = vmatpush1.bf16.msra.mxu1 %v9753_v52 }
 0xa7c   :  { %8131 = vmatprep.subr.bf16.mxu1 %v9755_v60  ;;  %8101 = vmatpush1.bf16.msra.mxu0 %v9760_v2 }
 0xa7f   :  { %8133 = vmatpush1.bf16.msra.mxu1 %v9760_v2 }
 0xb39   :  { %v1730_v9 = vpop.f32.mrb[8].mxu1 }
 0xb3a   :  { %v1731_v12 = vadd.f32 %v1730_v9, %v1652_v1  ;;  %v1732_v34 = vpop.f32.mrb[9].mxu1 }
 0xb3b   :  { %v1733_v17 = vadd.f32 %v1732_v34, %v1656_v5 }
 0xb3d   :  { %v1737_v35 = vcombine.low %v1731_v12, %v1733_v17 }
 0xb3f   :  { %7429 = vst.sshfl [vmem:[#allocation2 + $0x10] sm:$0x33 pattern:$0x76325410] %v1737_v35 }
 0xb4d   :  { %v1924_v24 = vpop.f32.mrb[10].mxu1 }
 0xb4e   :  { %v8724_v27 = vadd.f32 %v1924_v24, %v1754_v23  ;;  %v1926_v36 = vpop.f32.mrb[11].mxu1 }
 0xb4f   :  { %v8725_v40 = vadd.f32 %v1926_v36, %v1758_v39 }
 0xb50   :  { %v7434_v38 = vmul.f32 -1.442695, %v8724_v27 }
 0xb51   :  { %v7435_v22 = vmul.f32 -1.442695, %v8725_v40 }
 0xb52   :  { %8833 = vpow2.f32 %v7434_v38  ;;  %v2071_v38 = vld [vmem:[%s10519_s3] sm:$0x3] }
 0xb53   :  { %8835 = vtanh.f32 %v8725_v40  ;;  %v2076_v39 = vrot.slane %v2071_v38, %v9503_v30 }
 0xb5c   :  { %v8834_v41 = vpop.eup %8833 }
 0xb5d   :  { %v1937_v42 = vadd.f32 1.0, %v8834_v41  ;;  %v8836_v43 = vpop.eup %8835 }
 0xb5f   :  { %8837 = vrcp.f32 %v1937_v42 }
 0xb60   :  { %8839 = vpow2.f32 %v7435_v22 }
 0xb69   :  { %v8838_v44 = vpop.eup %8837 }
 0xb6a   :  { %v1945_v45 = vmul.f32 %v8838_v44, %v8836_v43  ;;  %v8840_v25 = vpop.eup %8839  ;;  %v1944_v32 = vmul.f32 %v8838_v44, %v9706_v48  ;;  %v1969_v48 = vld [vmem:[#allocation11] sm:$0x3]  ;;  %v2080_v44 = vrot.slane %v2071_v38, %v9510_v37 }
 0xb6b   :  { %v1938_v31 = vadd.f32 1.0, %v8840_v25  ;;  %v1974_v17 = vrot.slane %v1969_v48, %v9503_v30  ;;  %v1978_v35 = vrot.slane %v1969_v48, %v9510_v37 }
 0xb6c   :  { %1947 = vrot.lane.b32.xlu1 %v1945_v45, %s9260_s21 }
 0xb6d   :  { %8841 = vrcp.f32 %v1938_v31 }
 0xb70   :  { %2083 = vrot.lane.b32.xlu1 %v9467_v8, %s9266_s24  ;;  %v9764_v8 = vpack.c.bf16 %v1964_v59, %v1962_v58 }
 0xb72   :  { %8103 = vmatprep.subr.bf16.mxu0 %v9764_v8  ;;  %8135 = vmatprep.subr.bf16.mxu1 %v9764_v8 }
 0xb73   :  { %8105 = vmatpush1.bf16.msra.mxu0 %v9768_v13  ;;  %8137 = vmatpush1.bf16.msra.mxu1 %v9768_v13 }
 0xb74   :  { %8107 = vmatprep.subr.bf16.mxu0 %v9772_v14  ;;  %8139 = vmatprep.subr.bf16.mxu1 %v9772_v14 }
 0xb77   :  { %8109 = vmatpush1.bf16.msra.mxu0 %v9776_v21  ;;  %8141 = vmatpush1.bf16.msra.mxu1 %v9776_v21  ;;  %v8842_v5 = vpop.eup %8841 }
 0xb78   :  { %7438 = vmatprep.subr.msk.mxu0 %vm153_vm0, %v9701_v49  ;;  %7446 = vmatprep.subr.msk.mxu1 %vm153_vm0, %v9701_v49 }
 0xbde   :  { %v1948_v33 = vpop.permute.xlu1 %1947 }
 0xbdf   :  { %v9788_v1 = vadd.f32 %v1948_v33, %v1944_v32 }
 0xbe1   :  { %8843 = vtanh.f32 %v9788_v1 }
 0xbe2   :  { %v2084_v49 = vpop.permute.xlu1 %2083 }
 0xbeb   :  { %v8844_v9 = vpop.eup %8843 }
 0xbec   :  { %v1952_v12 = vmul.f32 %v8844_v9, %v8842_v5 }
 0xbee   :  { %1982 = vrot.lane.b32.xlu0 %v1952_v12, %s9260_s21 }
 0xc60   :  { %v1983_v34 = vpop.permute.xlu0 %1982 }
 0xc61   :  { %7436 = vmatmul.mubr.msk.f32.vlgmr.msra.gmra.mrb[10].mxu0 %vm245_vm2, %v1983_v34 }
 0xc62   :  { %7439 = vmatpush1.msk.msra.mxu0 %vm153_vm0, %v9697_v47  ;;  %2157 = vmatprep.mubr.f32.mxu0 %v9259_v0 }
 0xc63   :  { %8111 = vmatprep.subr.bf16.mxu0 %v9710_v53 }
 0xc65   :  { %7440 = vmatmul.mubr.msk.f32.vlgmr.msra.gmra.mrb[12].mxu0 %vm149_vm1, %v2084_v49 }
 0xc66   :  { %8113 = vmatpush1.bf16.msra.mxu0 %v9716_v6  ;;  %2244 = vmatprep.mubr.f32.mxu0 %v9259_v0 }
 0xc67   :  { %8115 = vmatprep.subr.bf16.mxu0 %v9719_v7 }
 0xc6a   :  { %8117 = vmatpush1.bf16.msra.mxu0 %v9723_v16 }
 0xc6b   :  { %8119 = vmatprep.subr.bf16.mxu0 %v9727_v19 }
 0xc6e   :  { %8121 = vmatpush1.bf16.msra.mxu0 %v9730_v26 }
 0xc6f   :  { %8123 = vmatprep.subr.bf16.mxu0 %v9733_v28 }
 0xc72   :  { %8125 = vmatpush1.bf16.msra.mxu0 %v9736_v4 }
 0xc73   :  { %8159 = vmatprep.subr.bf16.mxu0 %v9750_v54 }
 0xc75   :  { %7441 = vmatmul.mubr.msk.f32.vlgmr.msra.gmra.mrb[12].mxu0 %vm245_vm2, %v1983_v34 }
 0xc76   :  { %8161 = vmatpush1.bf16.msra.mxu0 %v9753_v52  ;;  %2694 = vmatprep.mubr.f32.mxu0 %v9259_v0 }
 0xc77   :  { %8163 = vmatprep.subr.bf16.mxu0 %v9755_v60 }
 0xc7a   :  { %8165 = vmatpush1.bf16.msra.mxu0 %v9760_v2 }
 0xc7b   :  { %8167 = vmatprep.subr.bf16.mxu0 %v9764_v8 }
 0xc7e   :  { %8169 = vmatpush1.bf16.msra.mxu0 %v9768_v13 }
 0xc7f   :  { %8171 = vmatprep.subr.bf16.mxu0 %v9772_v14 }
 0xc82   :  { %8173 = vmatpush1.bf16.msra.mxu0 %v9776_v21 }
 0xd34   :  { %v2052_v18 = vpop.f32.mrb[10].mxu0 }
 0xd35   :  { %v2053_v23 = vadd.f32 %v2052_v18, %v1974_v17  ;;  %v2054_v24 = vpop.f32.mrb[11].mxu0  ;;  %v2716_v17 = vld [vmem:[#allocation10 + $0x8] sm:$0xff] }
 0xd36   :  { %v2055_v27 = vadd.f32 %v2054_v24, %v1978_v35  ;;  %v2718_v35 = vld [vmem:[#allocation10 + $0x18] sm:$0xff] }
 0xd37   :  { %v9865_v18 = vpack.c.bf16 %v2718_v35, %v2716_v17 }
 0xd38   :  { %v2059_v36 = vcombine.low %v2053_v23, %v2055_v27 }
 0xd39   :  { %8175 = vmatprep.subr.bf16.mxu0 %v9865_v18 }
 0xd3a   :  { %7437 = vst.sshfl [vmem:[#allocation2 + $0x14] sm:$0x33 pattern:$0x76325410] %v2059_v36 }
 0xd48   :  { %v2246_v40 = vpop.f32.mrb[12].mxu0 }
 0xd49   :  { %v8726_v41 = vadd.f32 %v2246_v40, %v2076_v39  ;;  %v2248_v42 = vpop.f32.mrb[13].mxu0 }
 0xd4a   :  { %v8727_v45 = vadd.f32 %v2248_v42, %v2080_v44  ;;  %v2717_v44 = vld [vmem:[#allocation10 + $0x10] sm:$0xff] }
 0xd4b   :  { %v7442_v43 = vmul.f32 -1.442695, %v8726_v41 }
 0xd4c   :  { %v7443_v61 = vmul.f32 -1.442695, %v8727_v45 }
 0xd4d   :  { %8845 = vpow2.f32 %v7442_v43  ;;  %v2715_v43 = vld [vmem:[#allocation10] sm:$0xff] }
 0xd4e   :  { %8847 = vtanh.f32 %v8727_v45  ;;  %v2720_v45 = vld [vmem:[#allocation10 + $0x28] sm:$0xff] }
 0xd57   :  { %v8846_v46 = vpop.eup %8845 }
 0xd58   :  { %v2259_v50 = vadd.f32 1.0, %v8846_v46  ;;  %v8848_v51 = vpop.eup %8847  ;;  %v2722_v46 = vld [vmem:[#allocation10 + $0x38] sm:$0xff] }
 0xd5a   :  { %8849 = vrcp.f32 %v2259_v50  ;;  %v9870_v50 = vpack.c.bf16 %v2717_v44, %v2715_v43 }
 0xd5b   :  { %8851 = vpow2.f32 %v7443_v61  ;;  %v2724_v61 = vld [vmem:[#allocation10 + $0x48] sm:$0xff] }
 0xd64   :  { %v8850_v55 = vpop.eup %8849 }
 0xd65   :  { %v2267_v56 = vmul.f32 %v8850_v55, %v8848_v51  ;;  %v8852_v62 = vpop.eup %8851  ;;  %v2266_v59 = vmul.f32 %v8850_v55, %v9788_v1  ;;  %v9872_v51 = vpack.c.bf16 %v2722_v46, %v2720_v45  ;;  %v2719_v55 = vld [vmem:[#allocation10 + $0x20] sm:$0xff] }
 0xd66   :  { %v2260_v58 = vadd.f32 1.0, %v8852_v62  ;;  %v2726_v62 = vld [vmem:[#allocation10 + $0x58] sm:$0xff] }
 0xd67   :  { %2269 = vrot.lane.b32.xlu0 %v2267_v56, %s9260_s21  ;;  %v2721_v56 = vld [vmem:[#allocation10 + $0x30] sm:$0xff] }
 0xd68   :  { %8853 = vrcp.f32 %v2260_v58  ;;  %v9876_v58 = vpack.c.bf16 %v2721_v56, %v2719_v55 }
 0xd6b   :  { %2405 = vrot.lane.b32.xlu0 %v9061_v57, %s9267_s20 }
 0xd72   :  { %v8854_v63 = vpop.eup %8853 }
 0xdd9   :  { %v2270_v3 = vpop.permute.xlu0 %2269 }
 0xdda   :  { %v9828_v10 = vadd.f32 %v2270_v3, %v2266_v59  ;;  %v9880_v59 = vpack.c.bf16 %v2726_v62, %v2724_v61  ;;  %v2723_v3 = vld [vmem:[#allocation10 + $0x40] sm:$0xff]  ;;  %v2956_v62 = vld [vmem:[#allocation2 + $0x4] sm:$0xf] }
 0xddc   :  { %8855 = vtanh.f32 %v9828_v10 }
 0xddd   :  { %v2406_v22 = vpop.permute.xlu0 %2405 }
 0xde6   :  { %v8856_v11 = vpop.eup %8855 }
 0xde7   :  { %v2274_v15 = vmul.f32 %v8856_v11, %v8854_v63  ;;  %v2728_v63 = vld [vmem:[#allocation10 + $0x68] sm:$0xff]  ;;  %v2730_v11 = vld [vmem:[#allocation10 + $0x78] sm:$0xff] }
 0xde9   :  { %2304 = vrot.lane.b32.xlu1 %v2274_v15, %s9260_s21 }
 0xe5b   :  { %v2305_v20 = vpop.permute.xlu1 %2304 }
 0xe5c   :  { %7444 = vmatmul.mubr.msk.f32.vlgmr.msra.gmra.mrb[12].mxu1 %vm245_vm2, %v2305_v20 }
 0xe5d   :  { %7447 = vmatpush1.msk.msra.mxu1 %vm153_vm0, %v9697_v47  ;;  %2479 = vmatprep.mubr.f32.mxu1 %v9259_v0  ;;  %v2291_v47 = vld [vmem:[#allocation11] sm:$0x3] }
 0xe5e   :  { %8143 = vmatprep.subr.bf16.mxu1 %v9710_v53  ;;  %v2296_v53 = vrot.slane %v2291_v47, %v9503_v30 }
 0xe60   :  { %7448 = vmatmul.mubr.msk.f32.vlgmr.msra.gmra.mrb[14].mxu1 %vm149_vm1, %v2406_v22  ;;  %v2727_v22 = vld [vmem:[#allocation10 + $0x60] sm:$0xff] }
 0xe61   :  { %8145 = vmatpush1.bf16.msra.mxu1 %v9716_v6  ;;  %2566 = vmatprep.mubr.f32.mxu1 %v9259_v0  ;;  %v2300_v6 = vrot.slane %v2291_v47, %v9510_v37  ;;  %v2729_v47 = vld [vmem:[#allocation10 + $0x70] sm:$0xff] }
 0xe62   :  { %8147 = vmatprep.subr.bf16.mxu1 %v9719_v7 }
 0xe65   :  { %8149 = vmatpush1.bf16.msra.mxu1 %v9723_v16 }
 0xe66   :  { %8151 = vmatprep.subr.bf16.mxu1 %v9727_v19 }
 0xe69   :  { %8153 = vmatpush1.bf16.msra.mxu1 %v9730_v26 }
 0xe6a   :  { %8155 = vmatprep.subr.bf16.mxu1 %v9733_v28 }
 0xe6d   :  { %8157 = vmatpush1.bf16.msra.mxu1 %v9736_v4  ;;  %v2393_v4 = vld [vmem:[%s10519_s3] sm:$0x3] }
 0xe6e   :  { %8191 = vmatprep.subr.bf16.mxu1 %v9750_v54  ;;  %v2398_v25 = vrot.slane %v2393_v4, %v9503_v30  ;;  %v2402_v1 = vrot.slane %v2393_v4, %v9510_v37 }
 0xe70   :  { %7449 = vmatmul.mubr.msk.f32.vlgmr.msra.gmra.mrb[14].mxu1 %vm245_vm2, %v2305_v20  ;;  %v9886_v20 = vpack.c.bf16 %v2730_v11, %v2728_v63 }
 0xe71   :  { %8193 = vmatpush1.bf16.msra.mxu1 %v9753_v52  ;;  %2937 = vmatprep.mubr.f32.mxu1 %v9259_v0 }
 0xe72   :  { %8195 = vmatprep.subr.bf16.mxu1 %v9755_v60 }
 0xe75   :  { %8197 = vmatpush1.bf16.msra.mxu1 %v9760_v2 }
 0xe76   :  { %8199 = vmatprep.subr.bf16.mxu1 %v9764_v8 }
 0xe79   :  { %8201 = vmatpush1.bf16.msra.mxu1 %v9768_v13 }
 0xe7a   :  { %8203 = vmatprep.subr.bf16.mxu1 %v9772_v14 }
 0xe7d   :  { %8205 = vmatpush1.bf16.msra.mxu1 %v9776_v21 }
 0xe7e   :  { %8223 = vmatprep.subr.bf16.mxu1 %v9750_v54 }
 0xf2f   :  { %v2374_v7 = vpop.f32.mrb[12].mxu1 }
 0xf30   :  { %v2375_v16 = vadd.f32 %v2374_v7, %v2296_v53  ;;  %v2376_v19 = vpop.f32.mrb[13].mxu1  ;;  %v9889_v53 = vpack.c.bf16 %v2729_v47, %v2727_v22 }
 0xf31   :  { %v2377_v26 = vadd.f32 %v2376_v19, %v2300_v6  ;;  %v2613_v6 = vld [vmem:[#allocation11] sm:$0x3] }
 0xf32   :  { %v2618_v7 = vrot.slane %v2613_v6, %v9503_v30 }
 0xf33   :  { %v2381_v28 = vcombine.low %v2375_v16, %v2377_v26  ;;  %v2622_v16 = vrot.slane %v2613_v6, %v9510_v37 }
 0xf35   :  { %7445 = vst.sshfl [vmem:[#allocation2 + $0x18] sm:$0x33 pattern:$0x76325410] %v2381_v28 }
 0xf43   :  { %v2568_v31 = vpop.f32.mrb[14].mxu1 }
 0xf44   :  { %v8728_v32 = vadd.f32 %v2568_v31, %v2398_v25  ;;  %v2570_v54 = vpop.f32.mrb[15].mxu1  ;;  %v9268_v31 = vmov 1983009808  }
 0xf45   :  { %v8729_v5 = vadd.f32 %v2570_v54, %v2402_v1 }
 0xf46   :  { %v7450_v33 = vmul.f32 -1.442695, %v8728_v32  ;;  %v2806_v32 = vunpack.c.l.s4 %v9268_v31 }
 0xf47   :  { %v7451_v23 = vmul.f32 -1.442695, %v8729_v5 }
 0xf48   :  { %8857 = vpow2.f32 %v7450_v33  ;;  %v2807_v54 = vunpack.c.0.s8 %v2806_v32  ;;  %v3100_v32 = vld [vmem:[#allocation11] sm:$0x3] }
 0xf49   :  { %8859 = vtanh.f32 %v8729_v5 }
 0xf4a   :  { %v9907_v1 = vsub.s32 %v2807_v54, %v9500_v29  ;;  %v3105_v54 = vrot.slane %v3100_v32, %v9503_v30 }
 0xf52   :  { %v8858_v9 = vpop.eup %8857 }
 0xf53   :  { %v2581_v12 = vadd.f32 1.0, %v8858_v9  ;;  %v8860_v34 = vpop.eup %8859 }
 0xf55   :  { %8861 = vrcp.f32 %v2581_v12 }
 0xf56   :  { %8863 = vpow2.f32 %v7451_v23 }
 0xf5f   :  { %v8862_v49 = vpop.eup %8861 }
 0xf60   :  { %v2589_v48 = vmul.f32 %v8862_v49, %v8860_v34  ;;  %v8864_v24 = vpop.eup %8863  ;;  %v2588_v36 = vmul.f32 %v8862_v49, %v9828_v10  ;;  %v2725_v10 = vld [vmem:[#allocation10 + $0x50] sm:$0xff] }
 0xf61   :  { %v2582_v27 = vadd.f32 1.0, %v8864_v24  ;;  %v9883_v15 = vpack.c.bf16 %v2725_v10, %v2723_v3  ;;  %v2714_v34 = vld [vmem:[#allocation2] sm:$0xf] }
 0xf62   :  { %2591 = vrot.lane.b32.xlu1 %v2589_v48, %s9260_s21 }
 0xf63   :  { %8865 = vrcp.f32 %v2582_v27 }
 0xf6d   :  { %v8866_v40 = vpop.eup %8865 }
 0xfd4   :  { %v2592_v38 = vpop.permute.xlu1 %2591 }
 0xfd5   :  { %v2594_v39 = vadd.f32 %v2592_v38, %v2588_v36 }
 0xfd7   :  { %8867 = vtanh.f32 %v2594_v39 }
 0xfe1   :  { %v8868_v41 = vpop.eup %8867 }
 0xfe2   :  { %v2596_v42 = vmul.f32 %v8868_v41, %v8866_v40 }
 0xfe4   :  { %2626 = vrot.lane.b32.xlu0 %v2596_v42, %s9260_s21 }
0x1056   :  { %v2627_v57 = vpop.permute.xlu0 %2626 }
0x1057   :  { %7452 = vmatmul.mubr.msk.f32.vlgmr.msra.gmra.mrb[14].mxu0 %vm245_vm2, %v2627_v57 }
0x1058   :  { %8177 = vmatpush1.bf16.msra.mxu0 %v9870_v50  ;;  %2795 = vmatprep.mubr.f32.mxu0 %v9259_v0 }
0x1059   :  { %8179 = vmatprep.subr.bf16.mxu0 %v9872_v51 }
0x105c   :  { %8181 = vmatpush1.bf16.msra.mxu0 %v9876_v58 }
0x105d   :  { %8183 = vmatprep.subr.bf16.mxu0 %v9880_v59 }
0x1060   :  { %8185 = vmatpush1.bf16.msra.mxu0 %v9883_v15 }
0x1061   :  { %8187 = vmatprep.subr.bf16.mxu0 %v9886_v20 }
0x1064   :  { %8189 = vmatpush1.bf16.msra.mxu0 %v9889_v53 }
0x1065   :  { %8207 = vmatprep.subr.bf16.mxu0 %v9865_v18 }
0x1067   :  { %2796 = vmatmul.mubr.f32.vlgmr.msra.gmra.mrb[16].mxu0 %v9259_v0 }
0x1068   :  { %8209 = vmatpush1.bf16.msra.mxu0 %v9870_v50  ;;  %3037 = vmatprep.mubr.f32.mxu0 %v9259_v0 }
0x1069   :  { %8211 = vmatprep.subr.bf16.mxu0 %v9872_v51 }
0x106c   :  { %8213 = vmatpush1.bf16.msra.mxu0 %v9876_v58 }
0x106d   :  { %8215 = vmatprep.subr.bf16.mxu0 %v9880_v59 }
0x1070   :  { %8217 = vmatpush1.bf16.msra.mxu0 %v9883_v15 }
0x1071   :  { %8219 = vmatprep.subr.bf16.mxu0 %v9886_v20 }
0x1074   :  { %8221 = vmatpush1.bf16.msra.mxu0 %v9889_v53 }
0x1075   :  { %8239 = vmatprep.subr.bf16.mxu0 %v9865_v18 }
0x112a   :  { %v2696_v19 = vpop.f32.mrb[14].mxu0 }
0x112b   :  { %v2697_v26 = vadd.f32 %v2696_v19, %v2618_v7  ;;  %v2698_v28 = vpop.f32.mrb[15].mxu0 }
0x112c   :  { %v2699_v4 = vadd.f32 %v2698_v28, %v2622_v16 }
0x112e   :  { %v2703_v25 = vcombine.low %v2697_v26, %v2699_v4 }
0x1130   :  { %7453 = vst.sshfl [vmem:[#allocation2 + $0x1c] sm:$0x33 pattern:$0x76325410] %v2703_v25 }
0x113a   :  { %v2797_v33 = vpop.f32.mrb[16].mxu0 }
0x113b   :  { %v2799_v5 = vpop.f32.mrb[17].mxu0 }
0x113c   :  { %v2804_v9 = vcombine.low %v2797_v33, %v2799_v5  ;;  %v3109_v33 = vrot.slane %v3100_v32, %v9510_v37 }
0x113e   :  { %v2811_v12 = vrot.slane %v2804_v9, %v9907_v1 }
0x1140   :  { %v2813_v49 = vadd.f32 %v2811_v12, %v2714_v34 }
0x1142   :  { %v7454_v48 = vmul.f32 -1.442695, %v2813_v49 }
0x1144   :  { %8869 = vpow2.f32 %v7454_v48 }
0x1145   :  { %8871 = vtanh.f32 %v2813_v49 }
0x114e   :  { %v8870_v17 = vpop.eup %8869 }
0x114f   :  { %v2817_v35 = vadd.f32 1.0, %v8870_v17  ;;  %v8872_v23 = vpop.eup %8871 }
0x1150   :  { %v2823_v24 = vrot.slane %v8872_v23, 2 }
0x1151   :  { %8873 = vrcp.f32 %v2817_v35 }
0x115b   :  { %v8874_v27 = vpop.eup %8873 }
0x115c   :  { %2833 = vrot.lane.b32.xlu0 %v8874_v27, %s9260_s21  ;;  %v2825_v36 = vmul.f32 %v8874_v27, %v2823_v24  ;;  %v2821_v29 = vmul.f32 0.0, %v8874_v27  ;;  %v3199_v24 = vld [vmem:[#allocation2 + $0x8] sm:$0xf] }
0x115e   :  { %2827 = vrot.lane.b32.xlu1 %v2825_v36, %s9260_s21 }
0x11ce   :  { %v2834_v41 = vpop.permute.xlu0 %2833 }
0x11cf   :  { %v2835_v42 = vrot.slane %v2834_v41, 2 }
0x11d0   :  { %v2828_v38 = vpop.permute.xlu1 %2827 }
0x11d1   :  { %v2830_v39 = vadd.f32 %v2828_v38, %v2821_v29 }
0x11d3   :  { %8875 = vtanh.f32 %v2830_v39 }
0x11dd   :  { %v8876_v40 = vpop.eup %8875 }
0x11de   :  { %2838 = vrot.lane.b32.xlu1 %v8876_v40, %s9260_s21 }
0x1250   :  { %v2839_v43 = vpop.permute.xlu1 %2838 }
0x1251   :  { %v2841_v44 = vmul.f32 %v2839_v43, %v2835_v42  ;;  %v3328_v43 = vld [vmem:[#allocation8 + $0x8] sm:$0xff] }
0x1253   :  { %7455 = vmatmul.mubr.msk.f32.vlgmr.msra.gmra.mrb[16].mxu1 %vm245_vm2, %v2841_v44  ;;  %7457 = vmatmul.mubr.msk.f32.vlgmr.msra.gmra.mrb[18].mxu0 %vm245_vm2, %v2841_v44  ;;  %v3330_v44 = vld [vmem:[#allocation8 + $0x18] sm:$0xff] }
0x1254   :  { %8225 = vmatpush1.bf16.msra.mxu1 %v9753_v52  ;;  %8241 = vmatpush1.bf16.msra.mxu0 %v9870_v50  ;;  %v2858_v52 = vld [vmem:[#allocation11] sm:$0x3] }
0x1255   :  { %8227 = vmatprep.subr.bf16.mxu1 %v9755_v60  ;;  %8243 = vmatprep.subr.bf16.mxu0 %v9872_v51  ;;  %v2863_v60 = vrot.slane %v2858_v52, %v9503_v30 }
0x1256   :  { %3179 = vmatprep.mubr.f32.mxu1 %v9259_v0  ;;  %3280 = vmatprep.mubr.f32.mxu0 %v9259_v0 }
0x1258   :  { %8229 = vmatpush1.bf16.msra.mxu1 %v9760_v2  ;;  %8245 = vmatpush1.bf16.msra.mxu0 %v9876_v58  ;;  %v2867_v2 = vrot.slane %v2858_v52, %v9510_v37  ;;  %v3327_v52 = vld [vmem:[#allocation8] sm:$0xff] }
0x1259   :  { %8231 = vmatprep.subr.bf16.mxu1 %v9764_v8  ;;  %8247 = vmatprep.subr.bf16.mxu0 %v9880_v59 }
0x125c   :  { %8233 = vmatpush1.bf16.msra.mxu1 %v9768_v13  ;;  %8249 = vmatpush1.bf16.msra.mxu0 %v9883_v15 }
0x125d   :  { %8235 = vmatprep.subr.bf16.mxu1 %v9772_v14  ;;  %8251 = vmatprep.subr.bf16.mxu0 %v9886_v20 }
0x1260   :  { %8253 = vmatpush1.bf16.msra.mxu0 %v9889_v53  ;;  %8237 = vmatpush1.bf16.msra.mxu1 %v9776_v21 }
0x1261   :  { %8271 = vmatprep.subr.bf16.mxu0 %v9865_v18 }
0x1326   :  { %v2939_v8 = vpop.f32.mrb[16].mxu1  ;;  %v3039_v45 = vpop.f32.mrb[18].mxu0 }
0x1327   :  { %v2940_v13 = vadd.f32 %v2939_v8, %v2863_v60  ;;  %v2941_v46 = vpop.f32.mrb[17].mxu1  ;;  %v3041_v55 = vpop.f32.mrb[19].mxu0  ;;  %v9958_v60 = vpack.c.bf16 %v3330_v44, %v3328_v43  ;;  %v3332_v8 = vld [vmem:[#allocation8 + $0x28] sm:$0xff] }
0x1328   :  { %v2942_v56 = vadd.f32 %v2941_v46, %v2867_v2  ;;  %v3046_v14 = vcombine.low %v3039_v45, %v3041_v55  ;;  %v3329_v2 = vld [vmem:[#allocation8 + $0x10] sm:$0xff]  ;;  %v3334_v45 = vld [vmem:[#allocation8 + $0x38] sm:$0xff]  ;;  %v3331_v55 = vld [vmem:[#allocation8 + $0x20] sm:$0xff] }
0x1329   :  { %v9962_v46 = vpack.c.bf16 %v3334_v45, %v3332_v8  ;;  %8255 = vmatprep.subr.bf16.mxu1 %v9958_v60 }
0x132a   :  { %v2946_v57 = vcombine.low %v2940_v13, %v2942_v56  ;;  %v3053_v61 = vrot.slane %v3046_v14, %v9907_v1  ;;  %v9960_v13 = vpack.c.bf16 %v3329_v2, %v3327_v52  ;;  %v3333_v56 = vld [vmem:[#allocation8 + $0x30] sm:$0xff]  ;;  %v3336_v14 = vld [vmem:[#allocation8 + $0x48] sm:$0xff] }
0x132c   :  { %7456 = vst.sshfl [vmem:[#allocation3] sm:$0x33 pattern:$0x76325410] %v2946_v57  ;;  %v3055_v21 = vadd.f32 %v3053_v61, %v2956_v62  ;;  %v3338_v57 = vld [vmem:[#allocation8 + $0x58] sm:$0xff]  ;;  %v9966_v61 = vpack.c.bf16 %v3333_v56, %v3331_v55 }
0x132d   :  { %v9969_v62 = vpack.c.bf16 %v3338_v57, %v3336_v14 }
0x132e   :  { %v7458_v3 = vmul.f32 -1.442695, %v3055_v21 }
0x1330   :  { %8877 = vpow2.f32 %v7458_v3  ;;  %v3337_v3 = vld [vmem:[#allocation8 + $0x50] sm:$0xff] }
0x1331   :  { %8879 = vtanh.f32 %v3055_v21  ;;  %v3335_v21 = vld [vmem:[#allocation8 + $0x40] sm:$0xff] }
0x133a   :  { %v8878_v10 = vpop.eup %8877 }
0x133b   :  { %v3059_v63 = vadd.f32 1.0, %v8878_v10  ;;  %v8880_v11 = vpop.eup %8879  ;;  %v3340_v10 = vld [vmem:[#allocation8 + $0x68] sm:$0xff] }
0x133c   :  { %v3065_v22 = vrot.slane %v8880_v11, 2  ;;  %v9972_v11 = vpack.c.bf16 %v3337_v3, %v3335_v21 }
0x133d   :  { %8881 = vrcp.f32 %v3059_v63  ;;  %v3342_v63 = vld [vmem:[#allocation8 + $0x78] sm:$0xff] }
0x1347   :  { %v8882_v47 = vpop.eup %8881 }
0x1348   :  { %3075 = vrot.lane.b32.xlu1 %v8882_v47, %s9260_s21  ;;  %v3067_v6 = vmul.f32 %v8882_v47, %v3065_v22  ;;  %v3063_v7 = vmul.f32 %v8882_v47, %v2830_v39  ;;  %v9975_v22 = vpack.c.bf16 %v3342_v63, %v3340_v10  ;;  %v3339_v47 = vld [vmem:[#allocation8 + $0x60] sm:$0xff] }
0x134a   :  { %3069 = vrot.lane.b32.xlu0 %v3067_v6, %s9260_s21  ;;  %v3341_v6 = vld [vmem:[#allocation8 + $0x70] sm:$0xff] }
0x13ba   :  { %v3076_v28 = vpop.permute.xlu1 %3075 }
0x13bb   :  { %v3077_v4 = vrot.slane %v3076_v28, 2 }
0x13bc   :  { %v3070_v16 = vpop.permute.xlu0 %3069 }
0x13bd   :  { %v9937_v19 = vadd.f32 %v3070_v16, %v3063_v7  ;;  %v9979_v7 = vpack.c.bf16 %v3341_v6, %v3339_v47 }
0x13bf   :  { %8883 = vtanh.f32 %v9937_v19 }
0x13c9   :  { %v8884_v26 = vpop.eup %8883 }
0x13ca   :  { %3080 = vrot.lane.b32.xlu0 %v8884_v26, %s9260_s21 }
0x143c   :  { %v3081_v25 = vpop.permute.xlu0 %3080 }
0x143d   :  { %v3083_v31 = vmul.f32 %v3081_v25, %v3077_v4 }
0x143f   :  { %7459 = vmatmul.mubr.msk.f32.vlgmr.msra.gmra.mrb[18].mxu1 %vm245_vm2, %v3083_v31  ;;  %7461 = vmatmul.mubr.msk.f32.vlgmr.msra.gmra.mrb[20].mxu0 %vm245_vm2, %v3083_v31 }
0x1440   :  { %8273 = vmatpush1.bf16.msra.mxu0 %v9870_v50  ;;  %3422 = vmatprep.mubr.f32.mxu1 %v9259_v0 }
0x1441   :  { %8275 = vmatprep.subr.bf16.mxu0 %v9872_v51  ;;  %3523 = vmatprep.mubr.f32.mxu0 %v9259_v0 }
0x1442   :  { %8257 = vmatpush1.bf16.msra.mxu1 %v9960_v13 }
0x1443   :  { %8259 = vmatprep.subr.bf16.mxu1 %v9962_v46 }
0x1444   :  { %8277 = vmatpush1.bf16.msra.mxu0 %v9876_v58 }
0x1445   :  { %8279 = vmatprep.subr.bf16.mxu0 %v9880_v59 }
0x1446   :  { %8261 = vmatpush1.bf16.msra.mxu1 %v9966_v61 }
0x1447   :  { %8263 = vmatprep.subr.bf16.mxu1 %v9969_v62 }
0x1448   :  { %8281 = vmatpush1.bf16.msra.mxu0 %v9883_v15 }
0x1449   :  { %8283 = vmatprep.subr.bf16.mxu0 %v9886_v20 }
0x144a   :  { %8265 = vmatpush1.bf16.msra.mxu1 %v9972_v11 }
0x144b   :  { %8267 = vmatprep.subr.bf16.mxu1 %v9975_v22 }
0x144c   :  { %8285 = vmatpush1.bf16.msra.mxu0 %v9889_v53 }
0x144d   :  { %8303 = vmatprep.subr.bf16.mxu0 %v9865_v18 }
0x144e   :  { %8269 = vmatpush1.bf16.msra.mxu1 %v9979_v7 }
0x144f   :  { %8287 = vmatprep.subr.bf16.mxu1 %v9958_v60 }
0x1512   :  { %v3181_v5 = vpop.f32.mrb[18].mxu1  ;;  %v3282_v9 = vpop.f32.mrb[20].mxu0 }
0x1513   :  { %v3182_v12 = vadd.f32 %v3181_v5, %v3105_v54  ;;  %v3183_v34 = vpop.f32.mrb[19].mxu1  ;;  %v3284_v49 = vpop.f32.mrb[21].mxu0 }
0x1514   :  { %v3184_v48 = vadd.f32 %v3183_v34, %v3109_v33  ;;  %v3289_v17 = vcombine.low %v3282_v9, %v3284_v49 }
0x1516   :  { %v3188_v35 = vcombine.low %v3182_v12, %v3184_v48  ;;  %v3296_v23 = vrot.slane %v3289_v17, %v9907_v1 }
0x1518   :  { %7460 = vst.sshfl [vmem:[#allocation3 + $0x4] sm:$0x33 pattern:$0x76325410] %v3188_v35  ;;  %v3298_v27 = vadd.f32 %v3296_v23, %v3199_v24 }
0x151a   :  { %v7462_v36 = vmul.f32 -1.442695, %v3298_v27 }
0x151c   :  { %8885 = vpow2.f32 %v7462_v36 }
0x151d   :  { %8887 = vtanh.f32 %v3298_v27  ;;  %v3442_v27 = vld [vmem:[#allocation2 + $0xc] sm:$0xf] }
0x1526   :  { %v8886_v29 = vpop.eup %8885 }
0x1527   :  { %v3302_v38 = vadd.f32 1.0, %v8886_v29  ;;  %v8888_v39 = vpop.eup %8887 }
0x1528   :  { %v3308_v40 = vrot.slane %v8888_v39, 2 }
0x1529   :  { %8889 = vrcp.f32 %v3302_v38 }
0x1533   :  { %v8890_v41 = vpop.eup %8889 }
0x1534   :  { %3318 = vrot.lane.b32.xlu0 %v8890_v41, %s9260_s21  ;;  %v3310_v42 = vmul.f32 %v8890_v41, %v3308_v40  ;;  %v3306_v16 = vmul.f32 %v8890_v41, %v9937_v19  ;;  %v3343_v19 = vld [vmem:[#allocation11] sm:$0x3] }
0x1535   :  { %v3348_v33 = vrot.slane %v3343_v19, %v9503_v30  ;;  %v3352_v5 = vrot.slane %v3343_v19, %v9510_v37 }
0x1536   :  { %3312 = vrot.lane.b32.xlu1 %v3310_v42, %s9260_s21 }
0x15a6   :  { %v3319_v25 = vpop.permute.xlu0 %3318 }
0x15a7   :  { %v3320_v31 = vrot.slane %v3319_v25, 2 }
0x15a8   :  { %v3313_v26 = vpop.permute.xlu1 %3312 }
0x15a9   :  { %v3315_v28 = vadd.f32 %v3313_v26, %v3306_v16 }
0x15ab   :  { %8891 = vtanh.f32 %v3315_v28 }
0x15b5   :  { %v8892_v4 = vpop.eup %8891 }
0x15b6   :  { %3323 = vrot.lane.b32.xlu1 %v8892_v4, %s9260_s21 }
0x1628   :  { %v3324_v32 = vpop.permute.xlu1 %3323 }
0x1629   :  { %v3326_v54 = vmul.f32 %v3324_v32, %v3320_v31 }
0x162b   :  { %7463 = vmatmul.mubr.msk.f32.vlgmr.msra.gmra.mrb[20].mxu1 %vm245_vm2, %v3326_v54  ;;  %7465 = vmatmul.mubr.msk.f32.vlgmr.msra.gmra.mrb[22].mxu0 %vm245_vm2, %v3326_v54 }
0x162c   :  { %8289 = vmatpush1.bf16.msra.mxu1 %v9960_v13  ;;  %8305 = vmatpush1.bf16.msra.mxu0 %v9870_v50 }
0x162d   :  { %8291 = vmatprep.subr.bf16.mxu1 %v9962_v46  ;;  %8307 = vmatprep.subr.bf16.mxu0 %v9872_v51 }
0x162e   :  { %3665 = vmatprep.mubr.f32.mxu1 %v9259_v0  ;;  %3766 = vmatprep.mubr.f32.mxu0 %v9259_v0 }
0x1630   :  { %8293 = vmatpush1.bf16.msra.mxu1 %v9966_v61  ;;  %8309 = vmatpush1.bf16.msra.mxu0 %v9876_v58 }
0x1631   :  { %8295 = vmatprep.subr.bf16.mxu1 %v9969_v62  ;;  %8311 = vmatprep.subr.bf16.mxu0 %v9880_v59 }
0x1634   :  { %8297 = vmatpush1.bf16.msra.mxu1 %v9972_v11  ;;  %8313 = vmatpush1.bf16.msra.mxu0 %v9883_v15 }
0x1635   :  { %8299 = vmatprep.subr.bf16.mxu1 %v9975_v22  ;;  %8315 = vmatprep.subr.bf16.mxu0 %v9886_v20 }
0x1638   :  { %8317 = vmatpush1.bf16.msra.mxu0 %v9889_v53  ;;  %8301 = vmatpush1.bf16.msra.mxu1 %v9979_v7 }
0x1639   :  { %8319 = vmatprep.subr.bf16.mxu1 %v9958_v60  ;;  %8335 = vmatprep.subr.bf16.mxu0 %v9865_v18 }
0x16fe   :  { %v3424_v9 = vpop.f32.mrb[20].mxu1  ;;  %v3525_v12 = vpop.f32.mrb[22].mxu0 }
0x16ff   :  { %v3425_v34 = vadd.f32 %v3424_v9, %v3348_v33  ;;  %v3426_v49 = vpop.f32.mrb[21].mxu1  ;;  %v3527_v48 = vpop.f32.mrb[23].mxu0 }
0x1700   :  { %v3427_v17 = vadd.f32 %v3426_v49, %v3352_v5  ;;  %v3532_v35 = vcombine.low %v3525_v12, %v3527_v48  ;;  %v3829_v49 = vld [vmem:[#allocation11] sm:$0x3] }
0x1701   :  { %v3834_v48 = vrot.slane %v3829_v49, %v9503_v30 }
0x1702   :  { %v3431_v23 = vcombine.low %v3425_v34, %v3427_v17  ;;  %v3539_v24 = vrot.slane %v3532_v35, %v9907_v1  ;;  %v3838_v17 = vrot.slane %v3829_v49, %v9510_v37 }
0x1704   :  { %7464 = vst.sshfl [vmem:[#allocation3 + $0x8] sm:$0x33 pattern:$0x76325410] %v3431_v23  ;;  %v3541_v36 = vadd.f32 %v3539_v24, %v3442_v27 }
0x1706   :  { %v7466_v29 = vmul.f32 -1.442695, %v3541_v36 }
0x1708   :  { %8893 = vpow2.f32 %v7466_v29 }
0x1709   :  { %8895 = vtanh.f32 %v3541_v36 }
0x1712   :  { %v8894_v18 = vpop.eup %8893 }
0x1713   :  { %v3545_v38 = vadd.f32 1.0, %v8894_v18  ;;  %v8896_v39 = vpop.eup %8895 }
0x1714   :  { %v3551_v40 = vrot.slane %v8896_v39, 2 }
0x1715   :  { %8897 = vrcp.f32 %v3545_v38 }
0x171f   :  { %v8898_v41 = vpop.eup %8897 }
0x1720   :  { %3561 = vrot.lane.b32.xlu1 %v8898_v41, %s9260_s21  ;;  %v3553_v42 = vmul.f32 %v8898_v41, %v3551_v40  ;;  %v3549_v43 = vmul.f32 %v8898_v41, %v3315_v28  ;;  %v3928_v40 = vld [vmem:[#allocation2 + $0x14] sm:$0xf] }
0x1722   :  { %3555 = vrot.lane.b32.xlu0 %v3553_v42, %s9260_s21 }
0x1792   :  { %v3562_v8 = vpop.permute.xlu1 %3561 }
0x1793   :  { %v3563_v45 = vrot.slane %v3562_v8, 2 }
0x1794   :  { %v3556_v44 = vpop.permute.xlu0 %3555 }
0x1795   :  { %v3558_v52 = vadd.f32 %v3556_v44, %v3549_v43 }
0x1797   :  { %8899 = vtanh.f32 %v3558_v52 }
0x17a1   :  { %v8900_v2 = vpop.eup %8899 }
0x17a2   :  { %3566 = vrot.lane.b32.xlu0 %v8900_v2, %s9260_s21 }
0x1814   :  { %v3567_v55 = vpop.permute.xlu0 %3566 }
0x1815   :  { %v3569_v56 = vmul.f32 %v3567_v55, %v3563_v45  ;;  %v4173_v45 = vld [vmem:[#allocation10 + $0x8] sm:$0xff]  ;;  %v4175_v55 = vld [vmem:[#allocation10 + $0x18] sm:$0xff] }
0x1817   :  { %7467 = vmatmul.mubr.msk.f32.vlgmr.msra.gmra.mrb[22].mxu1 %vm245_vm2, %v3569_v56  ;;  %7469 = vmatmul.mubr.msk.f32.vlgmr.msra.gmra.mrb[24].mxu0 %vm245_vm2, %v3569_v56  ;;  %v4172_v56 = vld [vmem:[#allocation10] sm:$0xff] }
0x1818   :  { %8321 = vmatpush1.bf16.msra.mxu1 %v9960_v13  ;;  %8337 = vmatpush1.bf16.msra.mxu0 %v9870_v50  ;;  %v3586_v50 = vld [vmem:[#allocation11] sm:$0x3] }
0x1819   :  { %8323 = vmatprep.subr.bf16.mxu1 %v9962_v46  ;;  %8339 = vmatprep.subr.bf16.mxu0 %v9872_v51  ;;  %v3591_v51 = vrot.slane %v3586_v50, %v9503_v30 }
0x181a   :  { %3908 = vmatprep.mubr.f32.mxu1 %v9259_v0  ;;  %4009 = vmatprep.mubr.f32.mxu0 %v9259_v0 }
0x181c   :  { %8325 = vmatpush1.bf16.msra.mxu1 %v9966_v61  ;;  %8341 = vmatpush1.bf16.msra.mxu0 %v9876_v58  ;;  %v3595_v58 = vrot.slane %v3586_v50, %v9510_v37  ;;  %v10056_v50 = vpack.c.bf16 %v4175_v55, %v4173_v45  ;;  %v4315_v55 = vld [vmem:[#allocation11] sm:$0x3] }
0x181d   :  { %8327 = vmatprep.subr.bf16.mxu1 %v9969_v62  ;;  %8343 = vmatprep.subr.bf16.mxu0 %v9880_v59 }
0x1820   :  { %8329 = vmatpush1.bf16.msra.mxu1 %v9972_v11  ;;  %8345 = vmatpush1.bf16.msra.mxu0 %v9883_v15 }
0x1821   :  { %8331 = vmatprep.subr.bf16.mxu1 %v9975_v22  ;;  %8347 = vmatprep.subr.bf16.mxu0 %v9886_v20 }
0x1824   :  { %8349 = vmatpush1.bf16.msra.mxu0 %v9889_v53  ;;  %8333 = vmatpush1.bf16.msra.mxu1 %v9979_v7  ;;  %v3685_v53 = vld [vmem:[#allocation2 + $0x10] sm:$0xf] }
0x1825   :  { %8351 = vmatprep.subr.bf16.mxu1 %v9958_v60  ;;  %8367 = vmatprep.subr.bf16.mxu0 %v10056_v50 }
0x18ea   :  { %v3667_v59 = vpop.f32.mrb[22].mxu1  ;;  %v3768_v14 = vpop.f32.mrb[24].mxu0 }
0x18eb   :  { %v3668_v57 = vadd.f32 %v3667_v59, %v3591_v51  ;;  %v3669_v21 = vpop.f32.mrb[23].mxu1  ;;  %v3770_v15 = vpop.f32.mrb[25].mxu0  ;;  %v4174_v51 = vld [vmem:[#allocation10 + $0x10] sm:$0xff]  ;;  %v4179_v59 = vld [vmem:[#allocation10 + $0x38] sm:$0xff] }
0x18ec   :  { %v3670_v3 = vadd.f32 %v3669_v21, %v3595_v58  ;;  %v3775_v10 = vcombine.low %v3768_v14, %v3770_v15  ;;  %v4177_v58 = vld [vmem:[#allocation10 + $0x28] sm:$0xff]  ;;  %v10058_v14 = vpack.c.bf16 %v4174_v51, %v4172_v56  ;;  %v4176_v21 = vld [vmem:[#allocation10 + $0x20] sm:$0xff]  ;;  %v4178_v15 = vld [vmem:[#allocation10 + $0x30] sm:$0xff]  ;;  %v4320_v56 = vrot.slane %v4315_v55, %v9503_v30 }
0x18ed   :  { %v4324_v51 = vrot.slane %v4315_v55, %v9510_v37 }
0x18ee   :  { %v3674_v63 = vcombine.low %v3668_v57, %v3670_v3  ;;  %v3782_v20 = vrot.slane %v3775_v10, %v9907_v1  ;;  %v10060_v57 = vpack.c.bf16 %v4179_v59, %v4177_v58  ;;  %v4181_v3 = vld [vmem:[#allocation10 + $0x48] sm:$0xff]  ;;  %v4183_v10 = vld [vmem:[#allocation10 + $0x58] sm:$0xff] }
0x18f0   :  { %7468 = vst.sshfl [vmem:[#allocation3 + $0xc] sm:$0x33 pattern:$0x76325410] %v3674_v63  ;;  %v3784_v47 = vadd.f32 %v3782_v20, %v3685_v53  ;;  %v10064_v63 = vpack.c.bf16 %v4178_v15, %v4176_v21  ;;  %v10067_v20 = vpack.c.bf16 %v4183_v10, %v4181_v3  ;;  %v4180_v53 = vld [vmem:[#allocation10 + $0x40] sm:$0xff] }
0x18f2   :  { %v7470_v6 = vmul.f32 -1.442695, %v3784_v47 }
0x18f4   :  { %8901 = vpow2.f32 %v7470_v6  ;;  %v4185_v6 = vld [vmem:[#allocation10 + $0x68] sm:$0xff] }
0x18f5   :  { %8903 = vtanh.f32 %v3784_v47  ;;  %v4182_v47 = vld [vmem:[#allocation10 + $0x50] sm:$0xff] }
0x18fe   :  { %v8902_v16 = vpop.eup %8901 }
0x18ff   :  { %v3788_v26 = vadd.f32 1.0, %v8902_v16  ;;  %v8904_v28 = vpop.eup %8903  ;;  %v4187_v16 = vld [vmem:[#allocation10 + $0x78] sm:$0xff] }
0x1900   :  { %v3794_v4 = vrot.slane %v8904_v28, 2  ;;  %v10073_v28 = vpack.c.bf16 %v4187_v16, %v4185_v6 }
0x1901   :  { %8905 = vrcp.f32 %v3788_v26  ;;  %v10070_v26 = vpack.c.bf16 %v4182_v47, %v4180_v53 }
0x190b   :  { %v8906_v25 = vpop.eup %8905 }
0x190c   :  { %3804 = vrot.lane.b32.xlu0 %v8906_v25, %s9260_s21  ;;  %v3796_v31 = vmul.f32 %v8906_v25, %v3794_v4  ;;  %v3792_v32 = vmul.f32 %v8906_v25, %v3558_v52  ;;  %v4184_v4 = vld [vmem:[#allocation10 + $0x60] sm:$0xff]  ;;  %v4186_v25 = vld [vmem:[#allocation10 + $0x70] sm:$0xff] }
0x190e   :  { %3798 = vrot.lane.b32.xlu1 %v3796_v31, %s9260_s21  ;;  %v10076_v31 = vpack.c.bf16 %v4186_v25, %v4184_v4 }
0x197e   :  { %v3805_v5 = vpop.permute.xlu0 %3804 }
0x197f   :  { %v3806_v9 = vrot.slane %v3805_v5, 2 }
0x1980   :  { %v3799_v54 = vpop.permute.xlu1 %3798 }
0x1981   :  { %v10035_v19 = vadd.f32 %v3799_v54, %v3792_v32 }
0x1983   :  { %8907 = vtanh.f32 %v10035_v19 }
0x198d   :  { %v8908_v33 = vpop.eup %8907 }
0x198e   :  { %3809 = vrot.lane.b32.xlu1 %v8908_v33, %s9260_s21 }
0x1a00   :  { %v3810_v12 = vpop.permute.xlu1 %3809 }
0x1a01   :  { %v3812_v34 = vmul.f32 %v3810_v12, %v3806_v9 }
0x1a03   :  { %7471 = vmatmul.mubr.msk.f32.vlgmr.msra.gmra.mrb[24].mxu1 %vm245_vm2, %v3812_v34  ;;  %7473 = vmatmul.mubr.msk.f32.vlgmr.msra.gmra.mrb[26].mxu0 %vm245_vm2, %v3812_v34 }
0x1a04   :  { %8353 = vmatpush1.bf16.msra.mxu1 %v9960_v13  ;;  %4151 = vmatprep.mubr.f32.mxu1 %v9259_v0 }
0x1a05   :  { %8355 = vmatprep.subr.bf16.mxu1 %v9962_v46  ;;  %4252 = vmatprep.mubr.f32.mxu0 %v9259_v0 }
0x1a06   :  { %8369 = vmatpush1.bf16.msra.mxu0 %v10058_v14 }
0x1a07   :  { %8371 = vmatprep.subr.bf16.mxu0 %v10060_v57 }
0x1a08   :  { %8357 = vmatpush1.bf16.msra.mxu1 %v9966_v61 }
0x1a09   :  { %8359 = vmatprep.subr.bf16.mxu1 %v9969_v62 }
0x1a0a   :  { %8373 = vmatpush1.bf16.msra.mxu0 %v10064_v63 }
0x1a0b   :  { %8375 = vmatprep.subr.bf16.mxu0 %v10067_v20 }
0x1a0c   :  { %8361 = vmatpush1.bf16.msra.mxu1 %v9972_v11 }
0x1a0d   :  { %8363 = vmatprep.subr.bf16.mxu1 %v9975_v22 }
0x1a0e   :  { %8377 = vmatpush1.bf16.msra.mxu0 %v10070_v26 }
0x1a0f   :  { %8379 = vmatprep.subr.bf16.mxu0 %v10073_v28 }
0x1a10   :  { %8365 = vmatpush1.bf16.msra.mxu1 %v9979_v7 }
0x1a11   :  { %8383 = vmatprep.subr.bf16.mxu1 %v9958_v60 }
0x1a12   :  { %8381 = vmatpush1.bf16.msra.mxu0 %v10076_v31 }
0x1a13   :  { %8399 = vmatprep.subr.bf16.mxu0 %v10056_v50 }
0x1ad6   :  { %v3910_v35 = vpop.f32.mrb[24].mxu1  ;;  %v4011_v23 = vpop.f32.mrb[26].mxu0 }
0x1ad7   :  { %v3911_v24 = vadd.f32 %v3910_v35, %v3834_v48  ;;  %v3912_v27 = vpop.f32.mrb[25].mxu1  ;;  %v4013_v36 = vpop.f32.mrb[27].mxu0 }
0x1ad8   :  { %v3913_v29 = vadd.f32 %v3912_v27, %v3838_v17  ;;  %v4018_v18 = vcombine.low %v4011_v23, %v4013_v36  ;;  %v4171_v27 = vld [vmem:[#allocation2 + $0x18] sm:$0xf] }
0x1ada   :  { %v3917_v38 = vcombine.low %v3911_v24, %v3913_v29  ;;  %v4025_v39 = vrot.slane %v4018_v18, %v9907_v1 }
0x1adc   :  { %7472 = vst.sshfl [vmem:[#allocation3 + $0x10] sm:$0x33 pattern:$0x76325410] %v3917_v38  ;;  %v4027_v41 = vadd.f32 %v4025_v39, %v3928_v40 }
0x1ade   :  { %v7474_v42 = vmul.f32 -1.442695, %v4027_v41 }
0x1ae0   :  { %8909 = vpow2.f32 %v7474_v42 }
0x1ae1   :  { %8911 = vtanh.f32 %v4027_v41 }
0x1aea   :  { %v8910_v60 = vpop.eup %8909 }
0x1aeb   :  { %v4031_v43 = vadd.f32 1.0, %v8910_v60  ;;  %v8912_v44 = vpop.eup %8911 }
0x1aec   :  { %v4037_v52 = vrot.slane %v8912_v44, 2 }
0x1aed   :  { %8913 = vrcp.f32 %v4031_v43 }
0x1af7   :  { %v8914_v2 = vpop.eup %8913 }
0x1af8   :  { %4047 = vrot.lane.b32.xlu1 %v8914_v2, %s9260_s21  ;;  %v4039_v8 = vmul.f32 %v8914_v2, %v4037_v52  ;;  %v4035_v32 = vmul.f32 %v8914_v2, %v10035_v19 }
0x1afa   :  { %4041 = vrot.lane.b32.xlu0 %v4039_v8, %s9260_s21 }
0x1b6a   :  { %v4048_v9 = vpop.permute.xlu1 %4047 }
0x1b6b   :  { %v4049_v12 = vrot.slane %v4048_v9, 2 }
0x1b6c   :  { %v4042_v54 = vpop.permute.xlu0 %4041 }
0x1b6d   :  { %v4044_v33 = vadd.f32 %v4042_v54, %v4035_v32  ;;  %v4657_v32 = vld [vmem:[#allocation3] sm:$0xf] }
0x1b6f   :  { %8915 = vtanh.f32 %v4044_v33 }
0x1b79   :  { %v8916_v5 = vpop.eup %8915 }
0x1b7a   :  { %4052 = vrot.lane.b32.xlu0 %v8916_v5, %s9260_s21 }
0x1bec   :  { %v4053_v34 = vpop.permute.xlu0 %4052 }
0x1bed   :  { %v4055_v49 = vmul.f32 %v4053_v34, %v4049_v12 }
0x1bef   :  { %7475 = vmatmul.mubr.msk.f32.vlgmr.msra.gmra.mrb[26].mxu1 %vm245_vm2, %v4055_v49  ;;  %7477 = vmatmul.mubr.msk.f32.vlgmr.msra.gmra.mrb[28].mxu0 %vm245_vm2, %v4055_v49 }
0x1bf0   :  { %8401 = vmatpush1.bf16.msra.mxu0 %v10058_v14  ;;  %8385 = vmatpush1.bf16.msra.mxu1 %v9960_v13  ;;  %v4072_v13 = vld [vmem:[#allocation11] sm:$0x3] }
0x1bf1   :  { %8403 = vmatprep.subr.bf16.mxu0 %v10060_v57  ;;  %8387 = vmatprep.subr.bf16.mxu1 %v9962_v46  ;;  %v4077_v46 = vrot.slane %v4072_v13, %v9503_v30 }
0x1bf2   :  { %4394 = vmatprep.mubr.f32.mxu1 %v9259_v0  ;;  %4495 = vmatprep.mubr.f32.mxu0 %v9259_v0 }
0x1bf4   :  { %8405 = vmatpush1.bf16.msra.mxu0 %v10064_v63  ;;  %8389 = vmatpush1.bf16.msra.mxu1 %v9966_v61  ;;  %v4081_v61 = vrot.slane %v4072_v13, %v9510_v37 }
0x1bf5   :  { %8407 = vmatprep.subr.bf16.mxu0 %v10067_v20  ;;  %8391 = vmatprep.subr.bf16.mxu1 %v9969_v62 }
0x1bf8   :  { %8409 = vmatpush1.bf16.msra.mxu0 %v10070_v26  ;;  %8393 = vmatpush1.bf16.msra.mxu1 %v9972_v11 }
0x1bf9   :  { %8411 = vmatprep.subr.bf16.mxu0 %v10073_v28  ;;  %8395 = vmatprep.subr.bf16.mxu1 %v9975_v22 }
0x1bfc   :  { %8413 = vmatpush1.bf16.msra.mxu0 %v10076_v31  ;;  %8397 = vmatpush1.bf16.msra.mxu1 %v9979_v7 }
0x1bfd   :  { %8431 = vmatprep.subr.bf16.mxu0 %v10056_v50 }
0x1cc2   :  { %v4153_v62 = vpop.f32.mrb[26].mxu1  ;;  %v4254_v19 = vpop.f32.mrb[28].mxu0 }
0x1cc3   :  { %v4154_v48 = vadd.f32 %v4153_v62, %v4077_v46  ;;  %v4155_v17 = vpop.f32.mrb[27].mxu1  ;;  %v4256_v11 = vpop.f32.mrb[29].mxu0 }
0x1cc4   :  { %v4156_v35 = vadd.f32 %v4155_v17, %v4081_v61  ;;  %v4261_v23 = vcombine.low %v4254_v19, %v4256_v11 }
0x1cc6   :  { %v4160_v24 = vcombine.low %v4154_v48, %v4156_v35  ;;  %v4268_v22 = vrot.slane %v4261_v23, %v9907_v1 }
0x1cc8   :  { %7476 = vst.sshfl [vmem:[#allocation3 + $0x14] sm:$0x33 pattern:$0x76325410] %v4160_v24  ;;  %v4270_v7 = vadd.f32 %v4268_v22, %v4171_v27 }
0x1cca   :  { %v7478_v36 = vmul.f32 -1.442695, %v4270_v7 }
0x1ccc   :  { %8917 = vpow2.f32 %v7478_v36 }
0x1ccd   :  { %8919 = vtanh.f32 %v4270_v7  ;;  %v4874_v7 = vld [vmem:[#allocation3 + $0x4] sm:$0xf] }
0x1cd6   :  { %v8918_v29 = vpop.eup %8917 }
0x1cd7   :  { %v4274_v18 = vadd.f32 1.0, %v8918_v29  ;;  %v8920_v38 = vpop.eup %8919 }
0x1cd8   :  { %v4280_v39 = vrot.slane %v8920_v38, 2 }
0x1cd9   :  { %8921 = vrcp.f32 %v4274_v18 }
0x1ce3   :  { %v8922_v40 = vpop.eup %8921 }
0x1ce4   :  { %4290 = vrot.lane.b32.xlu0 %v8922_v40, %s9260_s21  ;;  %v4282_v41 = vmul.f32 %v8922_v40, %v4280_v39  ;;  %v4278_v42 = vmul.f32 %v8922_v40, %v4044_v33 }
0x1ce6   :  { %4284 = vrot.lane.b32.xlu1 %v4282_v41, %s9260_s21 }
0x1d56   :  { %v4291_v52 = vpop.permute.xlu0 %4290 }
0x1d57   :  { %v4292_v2 = vrot.slane %v4291_v52, 2 }
0x1d58   :  { %v4285_v60 = vpop.permute.xlu1 %4284 }
0x1d59   :  { %v10107_v43 = vadd.f32 %v4285_v60, %v4278_v42 }
0x1d5b   :  { %8923 = vtanh.f32 %v10107_v43 }
0x1d65   :  { %v8924_v44 = vpop.eup %8923 }
0x1d66   :  { %4295 = vrot.lane.b32.xlu1 %v8924_v44, %s9260_s21 }
0x1dd8   :  { %v4296_v8 = vpop.permute.xlu1 %4295 }
0x1dd9   :  { %v4298_v45 = vmul.f32 %v4296_v8, %v4292_v2 }
0x1ddb   :  { %7479 = vmatmul.mubr.msk.f32.vlgmr.msra.gmra.mrb[28].mxu1 %vm245_vm2, %v4298_v45  ;;  %7481 = vmatmul.mubr.msk.f32.vlgmr.msra.gmra.mrb[30].mxu0 %vm245_vm2, %v4298_v45 }
0x1ddc   :  { %8433 = vmatpush1.bf16.msra.mxu0 %v10058_v14  ;;  %4738 = vmatprep.mubr.f32.mxu0 %v9259_v0 }
0x1ddd   :  { %8435 = vmatprep.subr.bf16.mxu0 %v10060_v57  ;;  %4637 = vmatprep.mubr.f32.mxu1 %v9259_v0 }
0x1de0   :  { %8437 = vmatpush1.bf16.msra.mxu0 %v10064_v63 }
0x1de1   :  { %8439 = vmatprep.subr.bf16.mxu0 %v10067_v20 }
0x1de4   :  { %8441 = vmatpush1.bf16.msra.mxu0 %v10070_v26 }
0x1de5   :  { %8443 = vmatprep.subr.bf16.mxu0 %v10073_v28 }
0x1de8   :  { %8445 = vmatpush1.bf16.msra.mxu0 %v10076_v31 }
0x1de9   :  { %8459 = vmatprep.subr.bf16.mxu0 %v10056_v50 }
0x1deb   :  { %4739 = vmatmul.mubr.f32.vlgmr.msra.gmra.mrb[32].mxu0 %v9259_v0 }
0x1dec   :  { %8461 = vmatpush1.bf16.msra.mxu0 %v10058_v14  ;;  %4955 = vmatprep.mubr.f32.mxu0 %v9259_v0 }
0x1ded   :  { %8463 = vmatprep.subr.bf16.mxu0 %v10060_v57 }
0x1df0   :  { %8465 = vmatpush1.bf16.msra.mxu0 %v10064_v63 }
0x1df1   :  { %8467 = vmatprep.subr.bf16.mxu0 %v10067_v20 }
0x1df4   :  { %8469 = vmatpush1.bf16.msra.mxu0 %v10070_v26 }
0x1df5   :  { %8471 = vmatprep.subr.bf16.mxu0 %v10073_v28 }
0x1df8   :  { %8473 = vmatpush1.bf16.msra.mxu0 %v10076_v31 }
0x1df9   :  { %8487 = vmatprep.subr.bf16.mxu0 %v10056_v50 }
0x1eae   :  { %v4396_v58 = vpop.f32.mrb[28].mxu1  ;;  %v10135_v59 = vpop.f32.mrb[30].mxu0 }
0x1eaf   :  { %v4397_v21 = vadd.f32 %v4396_v58, %v4320_v56  ;;  %v4398_v15 = vpop.f32.mrb[29].mxu1  ;;  %v10137_v3 = vpop.f32.mrb[31].mxu0 }
0x1eb0   :  { %v4399_v10 = vadd.f32 %v4398_v15, %v4324_v51  ;;  %v4504_v53 = vcombine.low %v10135_v59, %v10137_v3 }
0x1eb2   :  { %v4403_v47 = vcombine.low %v4397_v21, %v4399_v10  ;;  %v5092_v10 = vld [vmem:[#allocation3 + $0x8] sm:$0xf] }
0x1eb4   :  { %7480 = vst.sshfl [vmem:[#allocation3 + $0x18] sm:$0x33 pattern:$0x76325410] %v4403_v47 }
0x1ebe   :  { %v4740_v6 = vpop.f32.mrb[32].mxu0 }
0x1ebf   :  { %v4742_v16 = vpop.f32.mrb[33].mxu0 }
0x1ec0   :  { %v4747_v4 = vcombine.low %v4740_v6, %v4742_v16 }
0x1ec2   :  { %v4754_v25 = vrot.slane %v4747_v4, %v9907_v1 }
0x1ec4   :  { %v4756_v54 = vadd.f32 %v4754_v25, %v4657_v32 }
0x1ec6   :  { %v7485_v33 = vmul.f32 -1.442695, %v4756_v54 }
0x1ec8   :  { %8925 = vpow2.f32 %v7485_v33 }
0x1ec9   :  { %8927 = vtanh.f32 %v4756_v54 }
0x1ed2   :  { %v8926_v5 = vpop.eup %8925 }
0x1ed3   :  { %v4760_v9 = vadd.f32 1.0, %v8926_v5  ;;  %v8928_v12 = vpop.eup %8927 }
0x1ed4   :  { %v4766_v34 = vrot.slane %v8928_v12, 2 }
0x1ed5   :  { %8929 = vrcp.f32 %v4760_v9 }
0x1edf   :  { %v8930_v49 = vpop.eup %8929 }
0x1ee0   :  { %4776 = vrot.lane.b32.xlu1 %v8930_v49, %s9260_s21  ;;  %v4768_v13 = vmul.f32 %v8930_v49, %v4766_v34  ;;  %v4764_v46 = vmul.f32 0.0, %v8930_v49 }
0x1ee2   :  { %4770 = vrot.lane.b32.xlu0 %v4768_v13, %s9260_s21 }
0x1f52   :  { %v4777_v48 = vpop.permute.xlu1 %4776 }
0x1f53   :  { %v4778_v17 = vrot.slane %v4777_v48, 2 }
0x1f54   :  { %v4771_v61 = vpop.permute.xlu0 %4770 }
0x1f55   :  { %v4773_v62 = vadd.f32 %v4771_v61, %v4764_v46 }
0x1f57   :  { %8931 = vtanh.f32 %v4773_v62 }
0x1f61   :  { %v8932_v19 = vpop.eup %8931 }
0x1f62   :  { %4781 = vrot.lane.b32.xlu0 %v8932_v19, %s9260_s21 }
0x1fd4   :  { %v4782_v11 = vpop.permute.xlu0 %4781 }
0x1fd5   :  { %v10145_v35 = vmul.f32 %v4782_v11, %v4778_v17  ;;  %v5310_v11 = vld [vmem:[#allocation3 + $0xc] sm:$0xf] }
0x1fd7   :  { %7488 = vmatmul.mubr.msk.f32.vlgmr.msra.gmra.mrb[34].mxu0 %vm245_vm2, %v10145_v35 }
0x1fd8   :  { %8489 = vmatpush1.bf16.msra.mxu0 %v10058_v14  ;;  %5173 = vmatprep.mubr.f32.mxu0 %v9259_v0 }
0x1fd9   :  { %8491 = vmatprep.subr.bf16.mxu0 %v10060_v57 }
0x1fdc   :  { %8493 = vmatpush1.bf16.msra.mxu0 %v10064_v63 }
0x1fdd   :  { %8495 = vmatprep.subr.bf16.mxu0 %v10067_v20 }
0x1fe0   :  { %8497 = vmatpush1.bf16.msra.mxu0 %v10070_v26 }
0x1fe1   :  { %8499 = vmatprep.subr.bf16.mxu0 %v10073_v28 }
0x1fe4   :  { %8501 = vmatpush1.bf16.msra.mxu0 %v10076_v31 }
0x1fe5   :  { %8515 = vmatprep.subr.bf16.mxu0 %v10056_v50 }
0x20aa   :  { %v4957_v23 = vpop.f32.mrb[34].mxu0 }
0x20ab   :  { %v4959_v24 = vpop.f32.mrb[35].mxu0 }
0x20ac   :  { %v4964_v22 = vcombine.low %v4957_v23, %v4959_v24 }
0x20ae   :  { %v4971_v27 = vrot.slane %v4964_v22, %v9907_v1 }
0x20b0   :  { %v4973_v36 = vadd.f32 %v4971_v27, %v4874_v7 }
0x20b2   :  { %v7489_v29 = vmul.f32 -1.442695, %v4973_v36 }
0x20b4   :  { %8933 = vpow2.f32 %v7489_v29 }
0x20b5   :  { %8935 = vtanh.f32 %v4973_v36 }
0x20be   :  { %v8934_v18 = vpop.eup %8933 }
0x20bf   :  { %v4977_v38 = vadd.f32 1.0, %v8934_v18  ;;  %v8936_v39 = vpop.eup %8935 }
0x20c0   :  { %v4983_v40 = vrot.slane %v8936_v39, 2 }
0x20c1   :  { %8937 = vrcp.f32 %v4977_v38 }
0x20cb   :  { %v8938_v41 = vpop.eup %8937 }
0x20cc   :  { %4993 = vrot.lane.b32.xlu0 %v8938_v41, %s9260_s21  ;;  %v4985_v42 = vmul.f32 %v8938_v41, %v4983_v40  ;;  %v4981_v60 = vmul.f32 %v8938_v41, %v4773_v62 }
0x20ce   :  { %4987 = vrot.lane.b32.xlu1 %v4985_v42, %s9260_s21 }
0x213e   :  { %v4994_v8 = vpop.permute.xlu0 %4993 }
0x213f   :  { %v4995_v45 = vrot.slane %v4994_v8, 2 }
0x2140   :  { %v4988_v44 = vpop.permute.xlu1 %4987 }
0x2141   :  { %v4990_v52 = vadd.f32 %v4988_v44, %v4981_v60 }
0x2143   :  { %8939 = vtanh.f32 %v4990_v52 }
0x214d   :  { %v8940_v2 = vpop.eup %8939 }
0x214e   :  { %4998 = vrot.lane.b32.xlu1 %v8940_v2, %s9260_s21 }
0x21c0   :  { %v4999_v55 = vpop.permute.xlu1 %4998 }
0x21c1   :  { %v10162_v56 = vmul.f32 %v4999_v55, %v4995_v45 }
0x21c3   :  { %7492 = vmatmul.mubr.msk.f32.vlgmr.msra.gmra.mrb[36].mxu0 %vm245_vm2, %v10162_v56 }
0x21c4   :  { %8517 = vmatpush1.bf16.msra.mxu0 %v10058_v14  ;;  %5391 = vmatprep.mubr.f32.mxu0 %v9259_v0 }
0x21c5   :  { %8519 = vmatprep.subr.bf16.mxu0 %v10060_v57 }
0x21c8   :  { %8521 = vmatpush1.bf16.msra.mxu0 %v10064_v63 }
0x21c9   :  { %8523 = vmatprep.subr.bf16.mxu0 %v10067_v20 }
0x21cc   :  { %8525 = vmatpush1.bf16.msra.mxu0 %v10070_v26 }
0x21cd   :  { %8527 = vmatprep.subr.bf16.mxu0 %v10073_v28 }
0x21d0   :  { %8529 = vmatpush1.bf16.msra.mxu0 %v10076_v31 }
0x21d1   :  { %8543 = vmatprep.subr.bf16.mxu0 %v10056_v50 }
0x2296   :  { %v5175_v51 = vpop.f32.mrb[36].mxu0 }
0x2297   :  { %v5177_v58 = vpop.f32.mrb[37].mxu0 }
0x2298   :  { %v5182_v21 = vcombine.low %v5175_v51, %v5177_v58 }
0x229a   :  { %v5189_v15 = vrot.slane %v5182_v21, %v9907_v1 }
0x229c   :  { %v5191_v47 = vadd.f32 %v5189_v15, %v5092_v10 }
0x229e   :  { %v7493_v6 = vmul.f32 -1.442695, %v5191_v47 }
0x22a0   :  { %8941 = vpow2.f32 %v7493_v6 }
0x22a1   :  { %8943 = vtanh.f32 %v5191_v47 }
0x22aa   :  { %v8942_v16 = vpop.eup %8941 }
0x22ab   :  { %v5195_v4 = vadd.f32 1.0, %v8942_v16  ;;  %v8944_v25 = vpop.eup %8943 }
0x22ac   :  { %v5201_v32 = vrot.slane %v8944_v25, 2  ;;  %v4511_v25 = vrot.slane %v4504_v53, %v9907_v1 }
0x22ad   :  { %8945 = vrcp.f32 %v5195_v4 }
0x22b7   :  { %v8946_v54 = vpop.eup %8945 }
0x22b8   :  { %5211 = vrot.lane.b32.xlu1 %v8946_v54, %s9260_s21  ;;  %v5203_v33 = vmul.f32 %v8946_v54, %v5201_v32  ;;  %v5199_v5 = vmul.f32 %v8946_v54, %v4990_v52  ;;  %v4414_v32 = vld [vmem:[#allocation2 + $0x1c] sm:$0xf] }
0x22b9   :  { %v4513_v54 = vadd.f32 %v4511_v25, %v4414_v32 }
0x22ba   :  { %5205 = vrot.lane.b32.xlu0 %v5203_v33, %s9260_s21 }
0x232a   :  { %v5212_v49 = vpop.permute.xlu1 %5211 }
0x232b   :  { %v5213_v13 = vrot.slane %v5212_v49, 2  ;;  %v5746_v49 = vld [vmem:[#allocation3 + $0x14] sm:$0xf] }
0x232c   :  { %v5206_v9 = vpop.permute.xlu0 %5205 }
0x232d   :  { %v5208_v12 = vadd.f32 %v5206_v9, %v5199_v5  ;;  %v7482_v5 = vmul.f32 -1.442695, %v4513_v54 }
0x232f   :  { %8947 = vtanh.f32 %v5208_v12 }
0x2339   :  { %v8948_v34 = vpop.eup %8947 }
0x233a   :  { %5216 = vrot.lane.b32.xlu0 %v8948_v34, %s9260_s21 }
0x23ac   :  { %v5217_v46 = vpop.permute.xlu0 %5216 }
0x23ad   :  { %v10179_v61 = vmul.f32 %v5217_v46, %v5213_v13 }
0x23af   :  { %7496 = vmatmul.mubr.msk.f32.vlgmr.msra.gmra.mrb[38].mxu0 %vm245_vm2, %v10179_v61 }
0x23b0   :  { %8545 = vmatpush1.bf16.msra.mxu0 %v10058_v14  ;;  %5609 = vmatprep.mubr.f32.mxu0 %v9259_v0 }
0x23b1   :  { %8547 = vmatprep.subr.bf16.mxu0 %v10060_v57 }
0x23b4   :  { %8549 = vmatpush1.bf16.msra.mxu0 %v10064_v63 }
0x23b5   :  { %8551 = vmatprep.subr.bf16.mxu0 %v10067_v20 }
0x23b8   :  { %8553 = vmatpush1.bf16.msra.mxu0 %v10070_v26 }
0x23b9   :  { %8555 = vmatprep.subr.bf16.mxu0 %v10073_v28 }
0x23bc   :  { %8557 = vmatpush1.bf16.msra.mxu0 %v10076_v31 }
0x23bd   :  { %8571 = vmatprep.subr.bf16.mxu0 %v10056_v50 }
0x2482   :  { %v5393_v62 = vpop.f32.mrb[38].mxu0 }
0x2483   :  { %v5395_v19 = vpop.f32.mrb[39].mxu0 }
0x2484   :  { %v5400_v48 = vcombine.low %v5393_v62, %v5395_v19 }
0x2486   :  { %v5407_v17 = vrot.slane %v5400_v48, %v9907_v1 }
0x2488   :  { %v5409_v23 = vadd.f32 %v5407_v17, %v5310_v11 }
0x248a   :  { %v7497_v24 = vmul.f32 -1.442695, %v5409_v23 }
0x248c   :  { %8949 = vpow2.f32 %v7497_v24 }
0x248d   :  { %8951 = vtanh.f32 %v5409_v23 }
0x2496   :  { %v8950_v22 = vpop.eup %8949 }
0x2497   :  { %v5413_v27 = vadd.f32 1.0, %v8950_v22  ;;  %v8952_v7 = vpop.eup %8951 }
0x2498   :  { %v5419_v36 = vrot.slane %v8952_v7, 2  ;;  %v5966_v7 = vld [vmem:[#allocation10 + $0x8] sm:$0xff] }
0x2499   :  { %8953 = vrcp.f32 %v5413_v27 }
0x24a3   :  { %v8954_v29 = vpop.eup %8953 }
0x24a4   :  { %5429 = vrot.lane.b32.xlu0 %v8954_v29, %s9260_s21  ;;  %v5421_v18 = vmul.f32 %v8954_v29, %v5419_v36  ;;  %v5417_v50 = vmul.f32 %v8954_v29, %v5208_v12  ;;  %v5968_v36 = vld [vmem:[#allocation10 + $0x18] sm:$0xff]  ;;  %v5965_v29 = vld [vmem:[#allocation10] sm:$0xff] }
0x24a6   :  { %5423 = vrot.lane.b32.xlu1 %v5421_v18, %s9260_s21  ;;  %v8598_v18 = vpack.c.bf16 %v5968_v36, %v5966_v7  ;;  %v4550_v36 = vld [vmem:[#allocation8 + $0x40] sm:$0xff] }
0x2516   :  { %v5430_v41 = vpop.permute.xlu0 %5429 }
0x2517   :  { %v5431_v42 = vrot.slane %v5430_v41, 2 }
0x2518   :  { %v5424_v38 = vpop.permute.xlu1 %5423 }
0x2519   :  { %v5426_v39 = vadd.f32 %v5424_v38, %v5417_v50  ;;  %v5967_v50 = vld [vmem:[#allocation10 + $0x10] sm:$0xff]  ;;  %v5970_v38 = vld [vmem:[#allocation10 + $0x28] sm:$0xff] }
0x251b   :  { %8955 = vtanh.f32 %v5426_v39 }
0x2525   :  { %v8956_v40 = vpop.eup %8955 }
0x2526   :  { %5434 = vrot.lane.b32.xlu1 %v8956_v40, %s9260_s21  ;;  %v8600_v40 = vpack.c.bf16 %v5967_v50, %v5965_v29  ;;  %v4552_v29 = vld [vmem:[#allocation8 + $0x50] sm:$0xff] }
0x2598   :  { %v5435_v60 = vpop.permute.xlu1 %5434 }
0x2599   :  { %v10196_v44 = vmul.f32 %v5435_v60, %v5431_v42  ;;  %v5969_v42 = vld [vmem:[#allocation10 + $0x20] sm:$0xff]  ;;  %v5971_v60 = vld [vmem:[#allocation10 + $0x30] sm:$0xff] }
0x259b   :  { %7500 = vmatmul.mubr.msk.f32.vlgmr.msra.gmra.mrb[40].mxu0 %vm245_vm2, %v10196_v44 }
0x259c   :  { %8573 = vmatpush1.bf16.msra.mxu0 %v10058_v14  ;;  %5827 = vmatprep.mubr.f32.mxu0 %v9259_v0  ;;  %v5528_v14 = vld [vmem:[#allocation3 + $0x10] sm:$0xf] }
0x259d   :  { %8575 = vmatprep.subr.bf16.mxu0 %v10060_v57 }
0x25a0   :  { %8577 = vmatpush1.bf16.msra.mxu0 %v10064_v63 }
0x25a1   :  { %8579 = vmatprep.subr.bf16.mxu0 %v10067_v20 }
0x25a4   :  { %8581 = vmatpush1.bf16.msra.mxu0 %v10070_v26 }
0x25a5   :  { %8583 = vmatprep.subr.bf16.mxu0 %v10073_v28 }
0x25a8   :  { %8585 = vmatpush1.bf16.msra.mxu0 %v10076_v31 }
0x25a9   :  { %8599 = vmatprep.subr.bf16.mxu0 %v8598_v18 }
0x266e   :  { %v5611_v52 = vpop.f32.mrb[40].mxu0 }
0x266f   :  { %v5613_v2 = vpop.f32.mrb[41].mxu0 }
0x2670   :  { %v5618_v8 = vcombine.low %v5611_v52, %v5613_v2  ;;  %v5974_v52 = vld [vmem:[#allocation10 + $0x48] sm:$0xff]  ;;  %v5976_v2 = vld [vmem:[#allocation10 + $0x58] sm:$0xff] }
0x2672   :  { %v5625_v45 = vrot.slane %v5618_v8, %v9907_v1  ;;  %v8604_v8 = vpack.c.bf16 %v5971_v60, %v5969_v42  ;;  %v4554_v60 = vld [vmem:[#allocation8 + $0x60] sm:$0xff] }
0x2674   :  { %v5627_v55 = vadd.f32 %v5625_v45, %v5528_v14  ;;  %v8606_v45 = vpack.c.bf16 %v5976_v2, %v5974_v52  ;;  %v5973_v14 = vld [vmem:[#allocation10 + $0x40] sm:$0xff]  ;;  %v4556_v52 = vld [vmem:[#allocation8 + $0x70] sm:$0xff] }
0x2676   :  { %v7501_v51 = vmul.f32 -1.442695, %v5627_v55 }
0x2678   :  { %8957 = vpow2.f32 %v7501_v51  ;;  %v5978_v51 = vld [vmem:[#allocation10 + $0x68] sm:$0xff] }
0x2679   :  { %8959 = vtanh.f32 %v5627_v55  ;;  %v5975_v55 = vld [vmem:[#allocation10 + $0x50] sm:$0xff] }
0x2682   :  { %v8958_v57 = vpop.eup %8957 }
0x2683   :  { %v5631_v63 = vadd.f32 1.0, %v8958_v57  ;;  %v8960_v20 = vpop.eup %8959  ;;  %v5980_v57 = vld [vmem:[#allocation10 + $0x78] sm:$0xff] }
0x2684   :  { %v5637_v58 = vrot.slane %v8960_v20, 2  ;;  %v8610_v20 = vpack.c.bf16 %v5980_v57, %v5978_v51 }
0x2685   :  { %8961 = vrcp.f32 %v5631_v63  ;;  %v8608_v63 = vpack.c.bf16 %v5975_v55, %v5973_v14  ;;  %v9269_v14 = vmov 0.0|0.0  }
0x268f   :  { %v8962_v26 = vpop.eup %8961 }
0x2690   :  { %5647 = vrot.lane.b32.xlu1 %v8962_v26, %s9260_s21  ;;  %v5639_v28 = vmul.f32 %v8962_v26, %v5637_v58  ;;  %v5635_v31 = vmul.f32 %v8962_v26, %v5426_v39  ;;  %v5972_v39 = vld [vmem:[#allocation10 + $0x38] sm:$0xff]  ;;  %v5977_v58 = vld [vmem:[#allocation10 + $0x60] sm:$0xff]  ;;  %v5979_v26 = vld [vmem:[#allocation10 + $0x70] sm:$0xff] }
0x2691   :  { %v8602_v41 = vpack.c.bf16 %v5972_v39, %v5970_v38  ;;  %v4555_v39 = vld [vmem:[#allocation8 + $0x68] sm:$0xff] }
0x2692   :  { %5641 = vrot.lane.b32.xlu0 %v5639_v28, %s9260_s21  ;;  %v8612_v28 = vpack.c.bf16 %v5979_v26, %v5977_v58 }
0x2702   :  { %v5648_v47 = vpop.permute.xlu1 %5647 }
0x2703   :  { %v5649_v6 = vrot.slane %v5648_v47, 2 }
0x2704   :  { %v5642_v21 = vpop.permute.xlu0 %5641 }
0x2705   :  { %v10211_v15 = vadd.f32 %v5642_v21, %v5635_v31 }
0x2707   :  { %8963 = vtanh.f32 %v10211_v15 }
0x2708   :  { %8965 = vpow2.f32 %v7482_v5 }
0x2711   :  { %v8964_v10 = vpop.eup %8963 }
0x2712   :  { %5652 = vrot.lane.b32.xlu0 %v8964_v10, %s9260_s21  ;;  %v8966_v62 = vpop.eup %8965 }
0x2713   :  { %v4517_v19 = vadd.f32 1.0, %v8966_v62  ;;  %v4548_v62 = vld [vmem:[#allocation8 + $0x30] sm:$0xff] }
0x2784   :  { %v5653_v16 = vpop.permute.xlu0 %5652 }
0x2785   :  { %v10215_v4 = vmul.f32 %v5653_v16, %v5649_v6 }
0x2787   :  { %7504 = vmatmul.mubr.msk.f32.vlgmr.msra.gmra.mrb[42].mxu0 %vm245_vm2, %v10215_v4 }
0x2788   :  { %6045 = vmatprep.mubr.f32.mxu0 %v9259_v0  ;;  %8601 = vmatpush1.bf16.msra.mxu0 %v8600_v40 }
0x2789   :  { %8603 = vmatprep.subr.bf16.mxu0 %v8602_v41 }
0x278c   :  { %8605 = vmatpush1.bf16.msra.mxu0 %v8604_v8 }
0x278d   :  { %8607 = vmatprep.subr.bf16.mxu0 %v8606_v45 }
0x2790   :  { %8609 = vmatpush1.bf16.msra.mxu0 %v8608_v63 }
0x2791   :  { %8611 = vmatprep.subr.bf16.mxu0 %v8610_v20 }
0x2794   :  { %8613 = vmatpush1.bf16.msra.mxu0 %v8612_v28 }
0x2795   :  { %8627 = vmatprep.subr.bf16.mxu0 %v8598_v18  ;;  %v8424_v18 = vpack.c.bf16 %v4552_v29, %v4550_v36 }
0x285a   :  { %v5829_v33 = vpop.f32.mrb[42].mxu0 }
0x285b   :  { %v5831_v9 = vpop.f32.mrb[43].mxu0 }
0x285c   :  { %v5836_v12 = vcombine.low %v5829_v33, %v5831_v9  ;;  %v4542_v33 = vld [vmem:[#allocation8] sm:$0xff]  ;;  %v4544_v9 = vld [vmem:[#allocation8 + $0x10] sm:$0xff] }
0x285e   :  { %v5843_v34 = vrot.slane %v5836_v12, %v9907_v1  ;;  %v4547_v12 = vld [vmem:[#allocation8 + $0x28] sm:$0xff] }
0x2860   :  { %v5845_v13 = vadd.f32 %v5843_v34, %v5746_v49  ;;  %v4549_v34 = vld [vmem:[#allocation8 + $0x38] sm:$0xff]  ;;  %v8416_v49 = vpack.c.bf16 %v4544_v9, %v4542_v33 }
0x2861   :  { %v4790_v33 = vld [vmem:[%s10523_s7 + $0x28] sm:$0xff] }
0x2862   :  { %v7505_v46 = vmul.f32 -1.442695, %v5845_v13 }
0x2864   :  { %8967 = vpow2.f32 %v7505_v46  ;;  %v4546_v46 = vld [vmem:[#allocation8 + $0x20] sm:$0xff] }
0x2865   :  { %8969 = vtanh.f32 %v5845_v13  ;;  %v8418_v13 = vpack.c.bf16 %v4549_v34, %v4547_v12  ;;  %v4791_v12 = vld [vmem:[%s10523_s7 + $0x30] sm:$0xff]  ;;  %v4792_v34 = vld [vmem:[%s10523_s7 + $0x38] sm:$0xff] }
0x2866   :  { %8971 = vtanh.f32 %v4513_v54  ;;  %v4545_v54 = vld [vmem:[#allocation8 + $0x18] sm:$0xff] }
0x2867   :  { %8973 = vrcp.f32 %v4517_v19  ;;  %v4551_v19 = vld [vmem:[#allocation8 + $0x48] sm:$0xff] }
0x286e   :  { %v8968_v48 = vpop.eup %8967 }
0x286f   :  { %v5849_v59 = vadd.f32 1.0, %v8968_v48  ;;  %v8970_v3 = vpop.eup %8969  ;;  %v4553_v48 = vld [vmem:[#allocation8 + $0x58] sm:$0xff] }
0x2870   :  { %v8972_v53 = vpop.eup %8971  ;;  %v5855_v11 = vrot.slane %v8970_v3, 2  ;;  %v8422_v3 = vpack.c.bf16 %v4553_v48, %v4551_v19  ;;  %v4558_v48 = vld [vmem:[#allocation11] sm:$0x3] }
0x2871   :  { %8975 = vrcp.f32 %v5849_v59  ;;  %v10225_v17 = vpop.eup %8973  ;;  %v4523_v22 = vrot.slane %v8972_v53, 2  ;;  %v8420_v59 = vpack.c.bf16 %v4548_v62, %v4546_v46  ;;  %v6403_v46 = vld [vmem:[#allocation13 + $0x10] sm:$0xff]  ;;  %v6404_v62 = vld [vmem:[#allocation13 + $0x18] sm:$0xff] }
0x2872   :  { %v4521_v2 = vmul.f32 %v10225_v17, %v10107_v43  ;;  %v10376_v19 = vpack.c.bf16 %v6404_v62, %v6403_v46 }
0x2873   :  { %v4525_v27 = vmul.f32 %v10225_v17, %v4523_v22  ;;  %v5964_v22 = vld [vmem:[#allocation3 + $0x18] sm:$0xf] }
0x287b   :  { %v8976_v23 = vpop.eup %8975 }
0x287c   :  { %5865 = vrot.lane.b32.xlu0 %v8976_v23, %s9260_s21  ;;  %v5857_v24 = vmul.f32 %v8976_v23, %v5855_v11  ;;  %v5853_v31 = vmul.f32 %v8976_v23, %v10211_v15  ;;  %v4543_v15 = vld [vmem:[#allocation8 + $0x8] sm:$0xff] }
0x287d   :  { %v8414_v5 = vpack.c.bf16 %v4545_v54, %v4543_v15  ;;  %v4789_v54 = vld [vmem:[%s10523_s7 + $0x20] sm:$0xff] }
0x287e   :  { %5859 = vrot.lane.b32.xlu1 %v5857_v24, %s9260_s21 }
0x287f   :  { %8415 = vmatprep.subr.bf16.mxu1 %v8414_v5  ;;  %v10283_v5 = vpack.c.bf16 %v4790_v33, %v4789_v54 }
0x2880   :  { %4527 = vrot.lane.b32.xlu0 %v4525_v27, %s9260_s21  ;;  %8417 = vmatpush1.bf16.msra.mxu1 %v8416_v49  ;;  %v10294_v49 = vpack.c.bf16 %v4792_v34, %v4791_v12 }
0x2881   :  { %8419 = vmatprep.subr.bf16.mxu1 %v8418_v13 }
0x2884   :  { %4533 = vrot.lane.b32.xlu0 %v10225_v17, %s9260_s21  ;;  %8421 = vmatpush1.bf16.msra.mxu1 %v8420_v59  ;;  %v4563_v59 = vrot.slane %v4558_v48, %v9503_v30 }
0x2885   :  { %8423 = vmatprep.subr.bf16.mxu1 %v8422_v3  ;;  %v4567_v3 = vrot.slane %v4558_v48, %v9510_v37 }
0x2888   :  { %8425 = vmatpush1.bf16.msra.mxu1 %v8424_v18 }
0x28ee   :  { %v5866_v6 = vpop.permute.xlu0 %5865 }
0x28ef   :  { %v5867_v16 = vrot.slane %v5866_v6, 2 }
0x28f0   :  { %v5860_v21 = vpop.permute.xlu1 %5859 }
0x28f1   :  { %v10234_v10 = vadd.f32 %v5860_v21, %v5853_v31  ;;  %v4786_v31 = vld [vmem:[%s10523_s7 + $0x8] sm:$0xff] }
0x28f3   :  { %8977 = vtanh.f32 %v10234_v10 }
0x28fd   :  { %v8978_v47 = vpop.eup %8977 }
0x28fe   :  { %5870 = vrot.lane.b32.xlu1 %v8978_v47, %s9260_s21 }
0x2970   :  { %v5871_v25 = vpop.permute.xlu1 %5870 }
0x2971   :  { %v10238_v32 = vmul.f32 %v5871_v25, %v5867_v16  ;;  %v4788_v25 = vld [vmem:[%s10523_s7 + $0x18] sm:$0xff] }
0x2973   :  { %7508 = vmatmul.mubr.msk.f32.vlgmr.msra.gmra.mrb[44].mxu0 %vm245_vm2, %v10238_v32 }
0x2974   :  { %8629 = vmatpush1.bf16.msra.mxu0 %v8600_v40  ;;  %6263 = vmatprep.mubr.f32.mxu0 %v9259_v0  ;;  %v4557_v40 = vld [vmem:[#allocation8 + $0x78] sm:$0xff] }
0x2975   :  { %8631 = vmatprep.subr.bf16.mxu0 %v8602_v41  ;;  %v4528_v41 = vpop.permute.xlu0 %4527  ;;  %v8426_v42 = vpack.c.bf16 %v4557_v40, %v4555_v39 }
0x2977   :  { %8427 = vmatprep.subr.bf16.mxu1 %v8426_v42 }
0x2978   :  { %8633 = vmatpush1.bf16.msra.mxu0 %v8604_v8  ;;  %v8428_v8 = vpack.c.bf16 %v4556_v52, %v4554_v60 }
0x2979   :  { %8635 = vmatprep.subr.bf16.mxu0 %v8606_v45  ;;  %v4530_v45 = vadd.f32 %v4528_v41, %v4521_v2 }
0x297a   :  { %8429 = vmatpush1.bf16.msra.mxu1 %v8428_v8 }
0x297b   :  { %8446 = vmatprep.subr.bf16.mxu1 %v9269_v14 }
0x297c   :  { %8637 = vmatpush1.bf16.msra.mxu0 %v8608_v63 }
0x297d   :  { %8639 = vmatprep.subr.bf16.mxu0 %v8610_v20  ;;  %v4534_v20 = vpop.permute.xlu0 %4533 }
0x297e   :  { %v4535_v21 = vrot.slane %v4534_v20, 2 }
0x2980   :  { %8641 = vmatpush1.bf16.msra.mxu0 %v8612_v28  ;;  %v4785_v28 = vld [vmem:[%s10523_s7] sm:$0xff] }
0x2981   :  { %8654 = vmatprep.subr.bf16.mxu0 %v9269_v14  ;;  %v10261_v6 = vpack.c.bf16 %v4786_v31, %v4785_v28 }
0x2a46   :  { %v6047_v53 = vpop.f32.mrb[44].mxu0 }
0x2a47   :  { %v6049_v11 = vpop.f32.mrb[45].mxu0 }
0x2a48   :  { %v6054_v23 = vcombine.low %v6047_v53, %v6049_v11 }
0x2a4a   :  { %v6061_v24 = vrot.slane %v6054_v23, %v9907_v1 }
0x2a4c   :  { %v6063_v27 = vadd.f32 %v6061_v24, %v5964_v22 }
0x2a4e   :  { %v7509_v7 = vmul.f32 -1.442695, %v6063_v27 }
0x2a50   :  { %8979 = vpow2.f32 %v7509_v7 }
0x2a51   :  { %8981 = vtanh.f32 %v6063_v27  ;;  %v10405_v27 = vld [vmem:[%s10525_s9] ss:$0 sm:$0xff]  ;;  %s9271_s9 = smov 32  }
0x2a5a   :  { %v8980_v50 = vpop.eup %8979 }
0x2a5b   :  { %v6067_v38 = vadd.f32 1.0, %v8980_v50  ;;  %v8982_v55 = vpop.eup %8981 }
0x2a5c   :  { %v6073_v51 = vrot.slane %v8982_v55, 2 }
0x2a5d   :  { %8983 = vrcp.f32 %v6067_v38 }
0x2a5e   :  { %8985 = vtanh.f32 %v4530_v45 }
0x2a67   :  { %v8984_v57 = vpop.eup %8983 }
0x2a68   :  { %6083 = vrot.lane.b32.xlu0 %v8984_v57, %s9260_s21  ;;  %v6075_v63 = vmul.f32 %v8984_v57, %v6073_v51  ;;  %v8986_v43 = vpop.eup %8985  ;;  %v6071_v17 = vmul.f32 %v8984_v57, %v10234_v10  ;;  %v4787_v10 = vld [vmem:[%s10523_s7 + $0x10] sm:$0xff] }
0x2a69   :  { %v10271_v15 = vpack.c.bf16 %v4788_v25, %v4787_v10 }
0x2a6a   :  { %6077 = vrot.lane.b32.xlu1 %v6075_v63, %s9260_s21 }
0x2a6e   :  { %4538 = vrot.lane.b32.xlu1 %v8986_v43, %s9260_s21 }
0x2adc   :  { %v6078_v58 = vpop.permute.xlu1 %6077 }
0x2add   :  { %v10252_v26 = vadd.f32 %v6078_v58, %v6071_v17 }
0x2adf   :  { %8987 = vtanh.f32 %v10252_v26 }
0x2ae0   :  { %v4539_v47 = vpop.permute.xlu1 %4538 }
0x2ae1   :  { %v4541_v16 = vmul.f32 %v4539_v47, %v4535_v21 }
0x2ae3   :  { %7483 = vmatmul.mubr.msk.f32.vlgmr.msra.gmra.mrb[30].mxu1 %vm245_vm2, %v4541_v16 }
0x2ae4   :  { %8448 = vmatpush3.bf16.msra.mxu1 %v10261_v6  ;;  %7672 = vmatprep.mubr.msk.f32.mxu1 %vm9270_vm3, %v9259_v0 }
0x2ae5   :  { %8449 = vmatprep.subr.bf16.mxu1 %v9269_v14 }
0x2ae8   :  { %8451 = vmatpush3.bf16.msra.mxu1 %v10271_v15 }
0x2ae9   :  { %v8988_v9 = vpop.eup %8987  ;;  %8452 = vmatprep.subr.bf16.mxu1 %v9269_v14 }
0x2aea   :  { %6088 = vrot.lane.b32.xlu1 %v8988_v9, %s9260_s21 }
0x2aec   :  { %8454 = vmatpush3.bf16.msra.mxu1 %v10283_v5 }
0x2aed   :  { %8455 = vmatprep.subr.bf16.mxu1 %v9269_v14 }
0x2af0   :  { %8457 = vmatpush3.bf16.msra.mxu1 %v10294_v49 }
0x2af1   :  { %8474 = vmatprep.subr.bf16.mxu1 %v9269_v14 }
0x2af3   :  { %7673 = vmatmul.mubr.msk.f32.vlgmr.msra.gmra.mrb[32].mxu1 %vm245_vm2, %v10145_v35  ;;  %v6084_v35 = vpop.permute.xlu0 %6083 }
0x2af4   :  { %8476 = vmatpush3.bf16.msra.mxu1 %v10261_v6  ;;  %7691 = vmatprep.mubr.msk.f32.mxu1 %vm9270_vm3, %v9259_v0 }
0x2af5   :  { %8477 = vmatprep.subr.bf16.mxu1 %v9269_v14 }
0x2af8   :  { %8479 = vmatpush3.bf16.msra.mxu1 %v10271_v15 }
0x2af9   :  { %8480 = vmatprep.subr.bf16.mxu1 %v9269_v14 }
0x2afc   :  { %8482 = vmatpush3.bf16.msra.mxu1 %v10283_v5 }
0x2afd   :  { %8483 = vmatprep.subr.bf16.mxu1 %v9269_v14 }
0x2b00   :  { %8485 = vmatpush3.bf16.msra.mxu1 %v10294_v49 }
0x2b01   :  { %8502 = vmatprep.subr.bf16.mxu1 %v9269_v14 }
0x2b03   :  { %7692 = vmatmul.mubr.msk.f32.vlgmr.msra.gmra.mrb[34].mxu1 %vm245_vm2, %v10162_v56  ;;  %v6401_v56 = vld [vmem:[#allocation13] sm:$0xff] }
0x2b04   :  { %8504 = vmatpush3.bf16.msra.mxu1 %v10261_v6  ;;  %7710 = vmatprep.mubr.msk.f32.mxu1 %vm9270_vm3, %v9259_v0 }
0x2b05   :  { %8505 = vmatprep.subr.bf16.mxu1 %v9269_v14 }
0x2b08   :  { %8507 = vmatpush3.bf16.msra.mxu1 %v10271_v15 }
0x2b09   :  { %8508 = vmatprep.subr.bf16.mxu1 %v9269_v14 }
0x2b0c   :  { %8510 = vmatpush3.bf16.msra.mxu1 %v10283_v5 }
0x2b0d   :  { %8511 = vmatprep.subr.bf16.mxu1 %v9269_v14 }
0x2b10   :  { %8513 = vmatpush3.bf16.msra.mxu1 %v10294_v49 }
0x2b11   :  { %8530 = vmatprep.subr.bf16.mxu1 %v9269_v14 }
0x2b13   :  { %7711 = vmatmul.mubr.msk.f32.vlgmr.msra.gmra.mrb[36].mxu1 %vm245_vm2, %v10179_v61  ;;  %v6402_v61 = vld [vmem:[#allocation13 + $0x8] sm:$0xff] }
0x2b14   :  { %8532 = vmatpush3.bf16.msra.mxu1 %v10261_v6  ;;  %7729 = vmatprep.mubr.msk.f32.mxu1 %vm9270_vm3, %v9259_v0 }
0x2b15   :  { %8533 = vmatprep.subr.bf16.mxu1 %v9269_v14 }
0x2b18   :  { %8535 = vmatpush3.bf16.msra.mxu1 %v10271_v15 }
0x2b19   :  { %8536 = vmatprep.subr.bf16.mxu1 %v9269_v14 }
0x2b1c   :  { %8538 = vmatpush3.bf16.msra.mxu1 %v10283_v5 }
0x2b1d   :  { %8539 = vmatprep.subr.bf16.mxu1 %v9269_v14 }
0x2b20   :  { %8541 = vmatpush3.bf16.msra.mxu1 %v10294_v49 }
0x2b21   :  { %8558 = vmatprep.subr.bf16.mxu1 %v9269_v14 }
0x2b23   :  { %7730 = vmatmul.mubr.msk.f32.vlgmr.msra.gmra.mrb[38].mxu1 %vm245_vm2, %v10196_v44  ;;  %v6085_v44 = vrot.slane %v6084_v35, 2 }
0x2b24   :  { %8560 = vmatpush3.bf16.msra.mxu1 %v10261_v6  ;;  %7748 = vmatprep.mubr.msk.f32.mxu1 %vm9270_vm3, %v9259_v0 }
0x2b25   :  { %8561 = vmatprep.subr.bf16.mxu1 %v9269_v14 }
0x2b28   :  { %8563 = vmatpush3.bf16.msra.mxu1 %v10271_v15 }
0x2b29   :  { %8564 = vmatprep.subr.bf16.mxu1 %v9269_v14 }
0x2b2c   :  { %8566 = vmatpush3.bf16.msra.mxu1 %v10283_v5 }
0x2b2d   :  { %8567 = vmatprep.subr.bf16.mxu1 %v9269_v14 }
0x2b30   :  { %8569 = vmatpush3.bf16.msra.mxu1 %v10294_v49 }
0x2b31   :  { %8586 = vmatprep.subr.bf16.mxu1 %v9269_v14 }
0x2b33   :  { %7749 = vmatmul.mubr.msk.f32.vlgmr.msra.gmra.mrb[40].mxu1 %vm245_vm2, %v10215_v4 }
0x2b34   :  { %8588 = vmatpush3.bf16.msra.mxu1 %v10261_v6  ;;  %7767 = vmatprep.mubr.msk.f32.mxu1 %vm9270_vm3, %v9259_v0 }
0x2b35   :  { %8589 = vmatprep.subr.bf16.mxu1 %v9269_v14 }
0x2b38   :  { %8591 = vmatpush3.bf16.msra.mxu1 %v10271_v15 }
0x2b39   :  { %8592 = vmatprep.subr.bf16.mxu1 %v9269_v14 }
0x2b3c   :  { %8594 = vmatpush3.bf16.msra.mxu1 %v10283_v5 }
0x2b3d   :  { %8595 = vmatprep.subr.bf16.mxu1 %v9269_v14 }
0x2b40   :  { %8597 = vmatpush3.bf16.msra.mxu1 %v10294_v49 }
0x2b41   :  { %8614 = vmatprep.subr.bf16.mxu1 %v9269_v14 }
0x2b43   :  { %7768 = vmatmul.mubr.msk.f32.vlgmr.msra.gmra.mrb[42].mxu1 %vm245_vm2, %v10238_v32  ;;  %v10371_v32 = vpack.c.bf16 %v6402_v61, %v6401_v56 }
0x2b44   :  { %8616 = vmatpush3.bf16.msra.mxu1 %v10261_v6  ;;  %7786 = vmatprep.mubr.msk.f32.mxu1 %vm9270_vm3, %v9259_v0 }
0x2b45   :  { %8617 = vmatprep.subr.bf16.mxu1 %v9269_v14 }
0x2b48   :  { %8619 = vmatpush3.bf16.msra.mxu1 %v10271_v15 }
0x2b49   :  { %8620 = vmatprep.subr.bf16.mxu1 %v9269_v14 }
0x2b4c   :  { %8622 = vmatpush3.bf16.msra.mxu1 %v10283_v5 }
0x2b4d   :  { %8623 = vmatprep.subr.bf16.mxu1 %v9269_v14 }
0x2b50   :  { %8625 = vmatpush3.bf16.msra.mxu1 %v10294_v49 }
0x2b51   :  { %8642 = vmatprep.subr.bf16.mxu1 %v9269_v14 }
0x2b5c   :  { %v6089_v4 = vpop.permute.xlu1 %6088 }
0x2b5d   :  { %v6091_v13 = vmul.f32 %v6089_v4, %v6085_v44 }
0x2b5f   :  { %7787 = vmatmul.mubr.msk.f32.vlgmr.msra.gmra.mrb[44].mxu1 %vm245_vm2, %v6091_v13  ;;  %7512 = vmatmul.mubr.msk.f32.vlgmr.msra.gmra.mrb[46].mxu0 %vm245_vm2, %v6091_v13 }
0x2b60   :  { %8656 = vmatpush3.bf16.msra.mxu0 %v10371_v32  ;;  %7816 = vmatprep.mubr.msk.f32.mxu0 %vm9270_vm3, %v9259_v0 }
0x2b61   :  { %8657 = vmatprep.subr.bf16.mxu0 %v9269_v14  ;;  %8644 = vmatpush3.bf16.msra.mxu1 %v10261_v6 }
0x2b62   :  { %8645 = vmatprep.subr.bf16.mxu1 %v9269_v14  ;;  %7805 = vmatprep.mubr.msk.f32.mxu1 %vm9270_vm3, %v9259_v0 }
0x2b64   :  { %8659 = vmatpush3.bf16.msra.mxu0 %v10376_v19 }
0x2b65   :  { %8647 = vmatpush3.bf16.msra.mxu1 %v10271_v15  ;;  %8666 = vmatprep.subr.bf16.mxu0 %v9269_v14 }
0x2b66   :  { %8648 = vmatprep.subr.bf16.mxu1 %v9269_v14 }
0x2b67   :  { %7817 = vmatmul.mubr.f32.vlgmr.msra.gmra.mrb[48].mxu0 %v9259_v0 }
0x2b68   :  { %8668 = vmatpush3.bf16.msra.mxu0 %v10371_v32  ;;  %7838 = vmatprep.mubr.msk.f32.mxu0 %vm9270_vm3, %v9259_v0 }
0x2b69   :  { %8650 = vmatpush3.bf16.msra.mxu1 %v10283_v5  ;;  %8669 = vmatprep.subr.bf16.mxu0 %v9269_v14 }
0x2b6a   :  { %8651 = vmatprep.subr.bf16.mxu1 %v9269_v14 }
0x2b6c   :  { %8671 = vmatpush3.bf16.msra.mxu0 %v10376_v19 }
0x2b6d   :  { %8653 = vmatpush3.bf16.msra.mxu1 %v10294_v49  ;;  %8678 = vmatprep.subr.bf16.mxu0 %v9269_v14 }
0x2b6e   :  { %8660 = vmatprep.subr.bf16.mxu1 %v9269_v14 }
0x2bb6   :  { %v4639_v53 = vpop.f32.mrb[30].mxu1 }
0x2bb7   :  { %v4640_v11 = vadd.f32 %v4639_v53, %v4563_v59  ;;  %v4641_v23 = vpop.f32.mrb[31].mxu1 }
0x2bb8   :  { %v4642_v24 = vadd.f32 %v4641_v23, %v4567_v3 }
0x2bba   :  { %v4646_v22 = vcombine.low %v4640_v11, %v4642_v24 }
0x2bbc   :  { %7484 = vst.sshfl [vmem:[#allocation3 + $0x1c] sm:$0x33 pattern:$0x76325410] %v4646_v22 }
0x2bc3   :  { %v6182_v28 = vld [vmem:[#allocation3 + $0x1c] sm:$0xf] }
0x2bc6   :  { %v4869_v7 = vpop.f32.mrb[32].mxu1 }
0x2bc7   :  { %v4870_v36 = vadd.f32 %v10405_v27, %v4869_v7  ;;  %v7674_v29 = vpop.f32.mrb[33].mxu1 }
0x2bc9   :  { %4873 = vst [vmem:[#allocation4] sm:$0x3] %v4870_v36 }
0x2bd0   :  { %v6400_v47 = vld [vmem:[#allocation4] sm:$0x3] }
0x2bd6   :  { %v5086_v18 = vpop.f32.mrb[34].mxu1 }
0x2bd7   :  { %v5087_v30 = vadd.f32 %v10405_v27, %v5086_v18  ;;  %v7693_v37 = vpop.f32.mrb[35].mxu1 }
0x2bd9   :  { %5091 = vst [vmem:[#allocation4 + $0x2] sm:$0x3] %v5087_v30 }
0x2be0   :  { %v6503_v30 = vld [vmem:[#allocation4 + $0x2] sm:$0x3] }
0x2be6   :  { %v5304_v50 = vpop.f32.mrb[36].mxu1 }
0x2be7   :  { %v5305_v38 = vadd.f32 %v10405_v27, %v5304_v50  ;;  %v7712_v39 = vpop.f32.mrb[37].mxu1 }
0x2be9   :  { %5309 = vst [vmem:[#allocation4 + $0x4] sm:$0x3] %v5305_v38 }
0x2bf6   :  { %v5522_v40 = vpop.f32.mrb[38].mxu1 }
0x2bf7   :  { %v5523_v41 = vadd.f32 %v10405_v27, %v5522_v40  ;;  %v7731_v42 = vpop.f32.mrb[39].mxu1 }
0x2bf9   :  { %5527 = vst [vmem:[#allocation4 + $0x6] sm:$0x3] %v5523_v41 }
0x2c06   :  { %v5740_v60 = vpop.f32.mrb[40].mxu1 }
0x2c07   :  { %v5741_v52 = vadd.f32 %v10405_v27, %v5740_v60  ;;  %v7750_v2 = vpop.f32.mrb[41].mxu1 }
0x2c09   :  { %5745 = vst [vmem:[#allocation4 + $0x8] sm:$0x3] %v5741_v52 }
0x2c16   :  { %v5958_v8 = vpop.f32.mrb[42].mxu1 }
0x2c17   :  { %v5959_v45 = vadd.f32 %v10405_v27, %v5958_v8  ;;  %v7769_v55 = vpop.f32.mrb[43].mxu1 }
0x2c19   :  { %5963 = vst [vmem:[#allocation4 + $0xa] sm:$0x3] %v5959_v45 }
0x2c32   :  { %v6176_v51 = vpop.f32.mrb[44].mxu1  ;;  %v6265_v57 = vpop.f32.mrb[46].mxu0 }
0x2c33   :  { %v6177_v63 = vadd.f32 %v10405_v27, %v6176_v51  ;;  %v7788_v43 = vpop.f32.mrb[45].mxu1  ;;  %v6267_v17 = vpop.f32.mrb[47].mxu0 }
0x2c34   :  { %v6272_v20 = vcombine.low %v6265_v57, %v6267_v17  ;;  %v6604_v43 = vld [vmem:[#allocation4 + $0x4] sm:$0x3] }
0x2c35   :  { %6181 = vst [vmem:[#allocation4 + $0xc] sm:$0x3] %v6177_v63 }
0x2c36   :  { %v6279_v58 = vrot.slane %v6272_v20, %v9907_v1 }
0x2c38   :  { %v6281_v31 = vadd.f32 %v6279_v58, %v6182_v28 }
0x2c3a   :  { %v7513_v21 = vmul.f32 -1.442695, %v6281_v31  ;;  %v6474_v6 = vpop.f32.mrb[48].mxu0 }
0x2c3b   :  { %v6478_v16 = vadd.f32 %v6474_v6, %v6400_v47  ;;  %v7818_v10 = vpop.f32.mrb[49].mxu0 }
0x2c3c   :  { %8989 = vpow2.f32 %v7513_v21 }
0x2c3d   :  { %8991 = vtanh.f32 %v6478_v16  ;;  %v7516_v12 = vmul.f32 -1.442695, %v6478_v16 }
0x2c3e   :  { %8993 = vtanh.f32 %v6281_v31 }
0x2c46   :  { %v8990_v25 = vpop.eup %8989 }
0x2c47   :  { %v8992_v15 = vpop.eup %8991  ;;  %v6285_v54 = vadd.f32 1.0, %v8990_v25 }
0x2c48   :  { %6488 = vrot.lane.b32.xlu0 %v8992_v15, %s9260_s21  ;;  %v8994_v33 = vpop.eup %8993 }
0x2c49   :  { %8995 = vrcp.f32 %v6285_v54  ;;  %v6291_v5 = vrot.slane %v8994_v33, 2 }
0x2c4a   :  { %8997 = vpow2.f32 %v7516_v12  ;;  %v6705_v12 = vld [vmem:[#allocation4 + $0x6] sm:$0x3] }
0x2c53   :  { %v8996_v9 = vpop.eup %8995 }
0x2c54   :  { %v6293_v1 = vmul.f32 %v8996_v9, %v6291_v5  ;;  %v8998_v34 = vpop.eup %8997  ;;  %v6289_v46 = vmul.f32 %v8996_v9, %v10252_v26 }
0x2c55   :  { %v6482_v49 = vadd.f32 1.0, %v8998_v34 }
0x2c56   :  { %6295 = vrot.lane.b32.xlu0 %v6293_v1, %s9260_s21 }
0x2c57   :  { %8999 = vrcp.f32 %v6482_v49 }
0x2c5a   :  { %6301 = vrot.lane.b32.xlu0 %v8996_v9, %s9260_s21 }
0x2c61   :  { %v9000_v35 = vpop.eup %8999 }
0x2c62   :  { %v6486_v44 = vmul.f32 0.0, %v9000_v35 }
0x2cba   :  { %v6489_v56 = vpop.permute.xlu0 %6488 }
0x2cbb   :  { %v6491_v61 = vmul.f32 %v9000_v35, %v6489_v56 }
0x2cbd   :  { %6493 = vrot.lane.b32.xlu1 %v6491_v61, %s9271_s9 }
0x2cc8   :  { %v6296_v4 = vpop.permute.xlu0 %6295 }
0x2cc9   :  { %v6298_v48 = vadd.f32 %v6296_v4, %v6289_v46 }
0x2ccc   :  { %v6302_v53 = vpop.permute.xlu0 %6301 }
0x2ccd   :  { %v6303_v24 = vrot.slane %v6302_v53, 2 }
0x2d2f   :  { %v6494_v13 = vpop.permute.xlu1 %6493 }
0x2d30   :  { %v6496_v62 = vadd.f32 %v6494_v13, %v6486_v44 }
0x2d32   :  { %9001 = vtanh.f32 %v6496_v62 }
0x2d33   :  { %9003 = vtanh.f32 %v6298_v48 }
0x2d3c   :  { %v9002_v59 = vpop.eup %9001 }
0x2d3d   :  { %6499 = vrot.lane.b32.xlu1 %v9002_v59, %s9260_s21  ;;  %v9004_v3 = vpop.eup %9003 }
0x2d41   :  { %6306 = vrot.lane.b32.xlu1 %v9004_v3, %s9260_s21 }
0x2daf   :  { %v6500_v11 = vpop.permute.xlu1 %6499 }
0x2db0   :  { %v6502_v23 = vmul.f32 %v9000_v35, %v6500_v11 }
0x2db2   :  { %6505 = vrot.lane.b32.xlu0 %v6502_v23, %s9271_s9 }
0x2db3   :  { %v6307_v22 = vpop.permute.xlu1 %6306 }
0x2db4   :  { %v6309_v7 = vmul.f32 %v6307_v22, %v6303_v24  ;;  %v6806_v22 = vld [vmem:[#allocation4 + $0x8] sm:$0x3] }
0x2db6   :  { %7806 = vmatmul.mubr.msk.f32.vlgmr.msra.gmra.mrb[46].mxu1 %vm245_vm2, %v6309_v7 }
0x2db7   :  { %8662 = vmatpush3.bf16.msra.mxu1 %v10371_v32  ;;  %7827 = vmatprep.mubr.msk.f32.mxu1 %vm9270_vm3, %v9259_v0 }
0x2db8   :  { %8663 = vmatprep.subr.bf16.mxu1 %v9269_v14 }
0x2dbb   :  { %8665 = vmatpush3.bf16.msra.mxu1 %v10376_v19 }
0x2dbc   :  { %8672 = vmatprep.subr.bf16.mxu1 %v9269_v14 }
0x2e24   :  { %v6506_v26 = vpop.permute.xlu0 %6505 }
0x2e25   :  { %7828 = vmatmul.mubr.msk.f32.vlgmr.msra.gmra.mrb[48].mxu1 %vm6405_vm4, %v6506_v26 }
0x2e26   :  { %8674 = vmatpush3.bf16.msra.mxu1 %v10371_v32  ;;  %7849 = vmatprep.mubr.msk.f32.mxu1 %vm9270_vm3, %v9259_v0 }
0x2e27   :  { %8675 = vmatprep.subr.bf16.mxu1 %v9269_v14 }
0x2e2a   :  { %8677 = vmatpush3.bf16.msra.mxu1 %v10376_v19 }
0x2e2b   :  { %8684 = vmatprep.subr.bf16.mxu1 %v9269_v14 }
0x2e89   :  { %v6394_v36 = vpop.f32.mrb[46].mxu1 }
0x2e8a   :  { %v6395_v29 = vadd.f32 %v10405_v27, %v6394_v36  ;;  %v7807_v18 = vpop.f32.mrb[47].mxu1 }
0x2e8c   :  { %6399 = vst [vmem:[#allocation4 + $0xe] sm:$0x3] %v6395_v29 }
0x2ef8   :  { %v6575_v37 = vpop.f32.mrb[48].mxu1 }
0x2ef9   :  { %v6579_v50 = vadd.f32 %v6575_v37, %v6503_v30  ;;  %v7829_v38 = vpop.f32.mrb[49].mxu1 }
0x2efb   :  { %9005 = vtanh.f32 %v6579_v50  ;;  %v7518_v40 = vmul.f32 -1.442695, %v6579_v50 }
0x2efd   :  { %9007 = vpow2.f32 %v7518_v40 }
0x2f05   :  { %v9006_v39 = vpop.eup %9005 }
0x2f06   :  { %6589 = vrot.lane.b32.xlu1 %v9006_v39, %s9260_s21 }
0x2f07   :  { %v9008_v41 = vpop.eup %9007 }
0x2f08   :  { %v6583_v42 = vadd.f32 1.0, %v9008_v41 }
0x2f0a   :  { %9009 = vrcp.f32 %v6583_v42 }
0x2f14   :  { %v9010_v60 = vpop.eup %9009 }
0x2f15   :  { %v6587_v27 = vmul.f32 %v9010_v60, %v6496_v62 }
0x2f78   :  { %v6590_v52 = vpop.permute.xlu1 %6589 }
0x2f79   :  { %v6592_v2 = vmul.f32 %v9010_v60, %v6590_v52 }
0x2f7b   :  { %6594 = vrot.lane.b32.xlu0 %v6592_v2, %s9271_s9 }
0x2fed   :  { %v6595_v8 = vpop.permute.xlu0 %6594 }
0x2fee   :  { %v6597_v45 = vadd.f32 %v6595_v8, %v6587_v27  ;;  %v6907_v8 = vld [vmem:[#allocation4 + $0xa] sm:$0x3] }
0x2ff0   :  { %9011 = vtanh.f32 %v6597_v45 }
0x2ffa   :  { %v9012_v55 = vpop.eup %9011 }
0x2ffb   :  { %6600 = vrot.lane.b32.xlu1 %v9012_v55, %s9260_s21 }
0x306d   :  { %v6601_v51 = vpop.permute.xlu1 %6600 }
0x306e   :  { %v6603_v57 = vmul.f32 %v9010_v60, %v6601_v51 }
0x3070   :  { %6606 = vrot.lane.b32.xlu0 %v6603_v57, %s9271_s9 }
0x30e2   :  { %v6607_v63 = vpop.permute.xlu0 %6606 }
0x30e3   :  { %7839 = vmatmul.mubr.msk.f32.vlgmr.msra.gmra.mrb[50].mxu0 %vm6405_vm4, %v6607_v63 }
0x30e4   :  { %8680 = vmatpush3.bf16.msra.mxu0 %v10371_v32  ;;  %7860 = vmatprep.mubr.msk.f32.mxu0 %vm9270_vm3, %v9259_v0 }
0x30e5   :  { %8681 = vmatprep.subr.bf16.mxu0 %v9269_v14 }
0x30e8   :  { %8683 = vmatpush3.bf16.msra.mxu0 %v10376_v19 }
0x30e9   :  { %8690 = vmatprep.subr.bf16.mxu0 %v9269_v14 }
0x31b6   :  { %v6676_v17 = vpop.f32.mrb[50].mxu0 }
0x31b7   :  { %v6680_v20 = vadd.f32 %v6676_v17, %v6604_v43  ;;  %v7840_v58 = vpop.f32.mrb[51].mxu0 }
0x31b9   :  { %9013 = vtanh.f32 %v6680_v20  ;;  %v7520_v31 = vmul.f32 -1.442695, %v6680_v20 }
0x31bb   :  { %9015 = vpow2.f32 %v7520_v31 }
0x31c3   :  { %v9014_v28 = vpop.eup %9013 }
0x31c4   :  { %6690 = vrot.lane.b32.xlu1 %v9014_v28, %s9260_s21 }
0x31c5   :  { %v9016_v21 = vpop.eup %9015 }
0x31c6   :  { %v6684_v47 = vadd.f32 1.0, %v9016_v21 }
0x31c8   :  { %9017 = vrcp.f32 %v6684_v47 }
0x31d2   :  { %v9018_v6 = vpop.eup %9017 }
0x31d3   :  { %v6688_v25 = vmul.f32 %v9018_v6, %v6597_v45 }
0x3236   :  { %v6691_v16 = vpop.permute.xlu1 %6690 }
0x3237   :  { %v6693_v10 = vmul.f32 %v9018_v6, %v6691_v16 }
0x3239   :  { %6695 = vrot.lane.b32.xlu0 %v6693_v10, %s9271_s9  ;;  %v7008_v10 = vld [vmem:[#allocation4 + $0xc] sm:$0x3] }
0x32ab   :  { %v6696_v15 = vpop.permute.xlu0 %6695 }
0x32ac   :  { %v6698_v54 = vadd.f32 %v6696_v15, %v6688_v25 }
0x32ae   :  { %9019 = vtanh.f32 %v6698_v54 }
0x32b8   :  { %v9020_v33 = vpop.eup %9019 }
0x32b9   :  { %6701 = vrot.lane.b32.xlu1 %v9020_v33, %s9260_s21 }
0x332b   :  { %v6702_v5 = vpop.permute.xlu1 %6701 }
0x332c   :  { %v6704_v9 = vmul.f32 %v9018_v6, %v6702_v5 }
0x332e   :  { %6707 = vrot.lane.b32.xlu0 %v6704_v9, %s9271_s9 }
0x33a0   :  { %v6708_v1 = vpop.permute.xlu0 %6707 }
0x33a1   :  { %7850 = vmatmul.mubr.msk.f32.vlgmr.msra.gmra.mrb[50].mxu1 %vm6405_vm4, %v6708_v1 }
0x33a2   :  { %8686 = vmatpush3.bf16.msra.mxu1 %v10371_v32  ;;  %7871 = vmatprep.mubr.msk.f32.mxu1 %vm9270_vm3, %v9259_v0 }
0x33a3   :  { %8687 = vmatprep.subr.bf16.mxu1 %v9269_v14 }
0x33a6   :  { %8689 = vmatpush3.bf16.msra.mxu1 %v10376_v19 }
0x33a7   :  { %8696 = vmatprep.subr.bf16.mxu1 %v9269_v14 }
0x3474   :  { %v6777_v34 = vpop.f32.mrb[50].mxu1 }
0x3475   :  { %v6781_v49 = vadd.f32 %v6777_v34, %v6705_v12  ;;  %v7851_v35 = vpop.f32.mrb[51].mxu1 }
0x3477   :  { %9021 = vtanh.f32 %v6781_v49  ;;  %v7522_v61 = vmul.f32 -1.442695, %v6781_v49 }
0x3479   :  { %9023 = vpow2.f32 %v7522_v61 }
0x3481   :  { %v9022_v56 = vpop.eup %9021 }
0x3482   :  { %6791 = vrot.lane.b32.xlu1 %v9022_v56, %s9260_s21 }
0x3483   :  { %v9024_v44 = vpop.eup %9023 }
0x3484   :  { %v6785_v4 = vadd.f32 1.0, %v9024_v44 }
0x3486   :  { %9025 = vrcp.f32 %v6785_v4 }
0x3490   :  { %v9026_v13 = vpop.eup %9025 }
0x3491   :  { %v6789_v48 = vmul.f32 %v9026_v13, %v6698_v54 }
0x34f4   :  { %v6792_v46 = vpop.permute.xlu1 %6791 }
0x34f5   :  { %v6794_v62 = vmul.f32 %v9026_v13, %v6792_v46 }
0x34f7   :  { %6796 = vrot.lane.b32.xlu0 %v6794_v62, %s9271_s9  ;;  %v7109_v62 = vld [vmem:[#allocation4 + $0xe] sm:$0x3] }
0x3569   :  { %v6797_v59 = vpop.permute.xlu0 %6796 }
0x356a   :  { %v6799_v3 = vadd.f32 %v6797_v59, %v6789_v48 }
0x356c   :  { %9027 = vtanh.f32 %v6799_v3 }
0x3576   :  { %v9028_v53 = vpop.eup %9027 }
0x3577   :  { %6802 = vrot.lane.b32.xlu1 %v9028_v53, %s9260_s21 }
0x35e9   :  { %v6803_v11 = vpop.permute.xlu1 %6802 }
0x35ea   :  { %v6805_v23 = vmul.f32 %v9026_v13, %v6803_v11 }
0x35ec   :  { %6808 = vrot.lane.b32.xlu0 %v6805_v23, %s9271_s9 }
0x365e   :  { %v6809_v24 = vpop.permute.xlu0 %6808 }
0x365f   :  { %7861 = vmatmul.mubr.msk.f32.vlgmr.msra.gmra.mrb[52].mxu0 %vm6405_vm4, %v6809_v24 }
0x3660   :  { %8692 = vmatpush3.bf16.msra.mxu0 %v10371_v32  ;;  %7882 = vmatprep.mubr.msk.f32.mxu0 %vm9270_vm3, %v9259_v0 }
0x3661   :  { %8693 = vmatprep.subr.bf16.mxu0 %v9269_v14 }
0x3664   :  { %8695 = vmatpush3.bf16.msra.mxu0 %v10376_v19 }
0x3665   :  { %8702 = vmatprep.subr.bf16.mxu0 %v9269_v14 }
0x3732   :  { %v6878_v7 = vpop.f32.mrb[52].mxu0 }
0x3733   :  { %v6882_v26 = vadd.f32 %v6878_v7, %v6806_v22  ;;  %v7862_v36 = vpop.f32.mrb[53].mxu0 }
0x3735   :  { %9029 = vtanh.f32 %v6882_v26  ;;  %v7524_v18 = vmul.f32 -1.442695, %v6882_v26 }
0x3737   :  { %9031 = vpow2.f32 %v7524_v18  ;;  %v7210_v18 = vld [vmem:[#allocation14] sm:$0xff] }
0x373f   :  { %v9030_v29 = vpop.eup %9029 }
0x3740   :  { %6892 = vrot.lane.b32.xlu1 %v9030_v29, %s9260_s21 }
0x3741   :  { %v9032_v30 = vpop.eup %9031 }
0x3742   :  { %v6886_v37 = vadd.f32 1.0, %v9032_v30  ;;  %v7211_v30 = vld [vmem:[#allocation14 + $0x8] sm:$0xff] }
0x3744   :  { %9033 = vrcp.f32 %v6886_v37  ;;  %v7212_v37 = vld [vmem:[#allocation14 + $0x10] sm:$0xff] }
0x374e   :  { %v9034_v50 = vpop.eup %9033 }
0x374f   :  { %v6890_v40 = vmul.f32 %v9034_v50, %v6799_v3 }
0x37b2   :  { %v6893_v38 = vpop.permute.xlu1 %6892 }
0x37b3   :  { %v6895_v39 = vmul.f32 %v9034_v50, %v6893_v38  ;;  %v7213_v38 = vld [vmem:[#allocation14 + $0x18] sm:$0xff] }
0x37b5   :  { %6897 = vrot.lane.b32.xlu0 %v6895_v39, %s9271_s9  ;;  %v8706_v39 = vpack.c.bf16 %v7213_v38, %v7212_v37 }
0x3827   :  { %v6898_v41 = vpop.permute.xlu0 %6897 }
0x3828   :  { %v6900_v42 = vadd.f32 %v6898_v41, %v6890_v40 }
0x382a   :  { %9035 = vtanh.f32 %v6900_v42 }
0x3834   :  { %v9036_v60 = vpop.eup %9035 }
0x3835   :  { %6903 = vrot.lane.b32.xlu1 %v9036_v60, %s9260_s21 }
0x38a7   :  { %v6904_v52 = vpop.permute.xlu1 %6903 }
0x38a8   :  { %v6906_v2 = vmul.f32 %v9034_v50, %v6904_v52  ;;  %v8703_v50 = vpack.c.bf16 %v7211_v30, %v7210_v18  ;;  %v7531_v52 = vld [vmem:[#allocation16] ss:$0 sm:$0xff] }
0x38aa   :  { %6909 = vrot.lane.b32.xlu0 %v6906_v2, %s9271_s9 }
0x391c   :  { %v6910_v27 = vpop.permute.xlu0 %6909 }
0x391d   :  { %7872 = vmatmul.mubr.msk.f32.vlgmr.msra.gmra.mrb[52].mxu1 %vm6405_vm4, %v6910_v27 }
0x391e   :  { %8698 = vmatpush3.bf16.msra.mxu1 %v10371_v32  ;;  %7893 = vmatprep.mubr.msk.f32.mxu1 %vm9270_vm3, %v9259_v0 }
0x391f   :  { %8699 = vmatprep.subr.bf16.mxu1 %v9269_v14 }
0x3922   :  { %8701 = vmatpush3.bf16.msra.mxu1 %v10376_v19 }
0x3923   :  { %8708 = vmatprep.subr.bf16.mxu1 %v9269_v14 }
0x39f0   :  { %v6979_v45 = vpop.f32.mrb[52].mxu1 }
0x39f1   :  { %v6983_v55 = vadd.f32 %v6979_v45, %v6907_v8  ;;  %v7873_v51 = vpop.f32.mrb[53].mxu1 }
0x39f3   :  { %9037 = vtanh.f32 %v6983_v55  ;;  %v7526_v63 = vmul.f32 -1.442695, %v6983_v55 }
0x39f5   :  { %9039 = vpow2.f32 %v7526_v63 }
0x39fd   :  { %v9038_v57 = vpop.eup %9037 }
0x39fe   :  { %6993 = vrot.lane.b32.xlu1 %v9038_v57, %s9260_s21 }
0x39ff   :  { %v9040_v32 = vpop.eup %9039 }
0x3a00   :  { %v6987_v43 = vadd.f32 1.0, %v9040_v32 }
0x3a02   :  { %9041 = vrcp.f32 %v6987_v43 }
0x3a0c   :  { %v9042_v17 = vpop.eup %9041 }
0x3a0d   :  { %v6991_v19 = vmul.f32 %v9042_v17, %v6900_v42 }
0x3a70   :  { %v6994_v20 = vpop.permute.xlu1 %6993 }
0x3a71   :  { %v6996_v58 = vmul.f32 %v9042_v17, %v6994_v20 }
0x3a73   :  { %6998 = vrot.lane.b32.xlu0 %v6996_v58, %s9271_s9 }
0x3ae5   :  { %v6999_v28 = vpop.permute.xlu0 %6998 }
0x3ae6   :  { %v7001_v31 = vadd.f32 %v6999_v28, %v6991_v19 }
0x3ae8   :  { %9043 = vtanh.f32 %v7001_v31 }
0x3af2   :  { %v9044_v21 = vpop.eup %9043 }
0x3af3   :  { %7004 = vrot.lane.b32.xlu1 %v9044_v21, %s9260_s21 }
0x3b65   :  { %v7005_v47 = vpop.permute.xlu1 %7004 }
0x3b66   :  { %v7007_v6 = vmul.f32 %v9042_v17, %v7005_v47 }
0x3b68   :  { %7010 = vrot.lane.b32.xlu0 %v7007_v6, %s9271_s9 }
0x3bda   :  { %v7011_v16 = vpop.permute.xlu0 %7010 }
0x3bdb   :  { %7883 = vmatmul.mubr.msk.f32.vlgmr.msra.gmra.mrb[54].mxu0 %vm6405_vm4, %v7011_v16 }
0x3bdc   :  { %7904 = vmatprep.mubr.msk.f32.mxu0 %vm9270_vm3, %v9259_v0  ;;  %8704 = vmatpush3.bf16.msra.mxu0 %v8703_v50 }
0x3bdd   :  { %8705 = vmatprep.subr.bf16.mxu0 %v9269_v14 }
0x3be0   :  { %8707 = vmatpush3.bf16.msra.mxu0 %v8706_v39 }
0x3cae   :  { %v7080_v25 = vpop.f32.mrb[54].mxu0 }
0x3caf   :  { %v7084_v15 = vadd.f32 %v7080_v25, %v7008_v10  ;;  %v7884_v54 = vpop.f32.mrb[55].mxu0 }
0x3cb1   :  { %9045 = vtanh.f32 %v7084_v15  ;;  %v7528_v5 = vmul.f32 -1.442695, %v7084_v15 }
0x3cb3   :  { %9047 = vpow2.f32 %v7528_v5 }
0x3cbb   :  { %v9046_v33 = vpop.eup %9045 }
0x3cbc   :  { %7094 = vrot.lane.b32.xlu1 %v9046_v33, %s9260_s21 }
0x3cbd   :  { %v9048_v9 = vpop.eup %9047 }
0x3cbe   :  { %v7088_v1 = vadd.f32 1.0, %v9048_v9 }
0x3cc0   :  { %9049 = vrcp.f32 %v7088_v1 }
0x3cca   :  { %v9050_v12 = vpop.eup %9049 }
0x3ccb   :  { %v7092_v35 = vmul.f32 %v9050_v12, %v7001_v31 }
0x3d2e   :  { %v7095_v34 = vpop.permute.xlu1 %7094 }
0x3d2f   :  { %v7097_v49 = vmul.f32 %v9050_v12, %v7095_v34 }
0x3d31   :  { %7099 = vrot.lane.b32.xlu0 %v7097_v49, %s9271_s9 }
0x3da3   :  { %v7100_v56 = vpop.permute.xlu0 %7099 }
0x3da4   :  { %v7102_v61 = vadd.f32 %v7100_v56, %v7092_v35 }
0x3da6   :  { %9051 = vtanh.f32 %v7102_v61 }
0x3db0   :  { %v9052_v44 = vpop.eup %9051 }
0x3db1   :  { %7105 = vrot.lane.b32.xlu1 %v9052_v44, %s9260_s21 }
0x3e23   :  { %v7106_v4 = vpop.permute.xlu1 %7105 }
0x3e24   :  { %v7108_v13 = vmul.f32 %v9050_v12, %v7106_v4 }
0x3e26   :  { %7111 = vrot.lane.b32.xlu0 %v7108_v13, %s9271_s9 }
0x3e98   :  { %v7112_v46 = vpop.permute.xlu0 %7111 }
0x3e99   :  { %7894 = vmatmul.mubr.msk.f32.vlgmr.msra.gmra.mrb[54].mxu1 %vm6405_vm4, %v7112_v46 }
0x3e9a   :  { %7915 = vmatprep.mubr.msk.f32.mxu1 %vm9270_vm3, %v9259_v0  ;;  %8710 = vmatpush3.bf16.msra.mxu1 %v8703_v50 }
0x3e9b   :  { %8711 = vmatprep.subr.bf16.mxu1 %v9269_v14 }
0x3e9e   :  { %8713 = vmatpush3.bf16.msra.mxu1 %v8706_v39 }
0x3f6c   :  { %v7181_v48 = vpop.f32.mrb[54].mxu1 }
0x3f6d   :  { %v7185_v59 = vadd.f32 %v7181_v48, %v7109_v62  ;;  %v7895_v3 = vpop.f32.mrb[55].mxu1 }
0x3f6f   :  { %9053 = vtanh.f32 %v7185_v59  ;;  %v7530_v11 = vmul.f32 -1.442695, %v7185_v59 }
0x3f71   :  { %9055 = vpow2.f32 %v7530_v11 }
0x3f79   :  { %v9054_v53 = vpop.eup %9053 }
0x3f7a   :  { %7195 = vrot.lane.b32.xlu1 %v9054_v53, %s9260_s21 }
0x3f7b   :  { %v9056_v23 = vpop.eup %9055 }
0x3f7c   :  { %v7189_v24 = vadd.f32 1.0, %v9056_v23 }
0x3f7e   :  { %9057 = vrcp.f32 %v7189_v24 }
0x3f88   :  { %v9058_v22 = vpop.eup %9057 }
0x3f89   :  { %v7193_v36 = vmul.f32 %v9058_v22, %v7102_v61 }
0x3fec   :  { %v7196_v7 = vpop.permute.xlu1 %7195 }
0x3fed   :  { %v7198_v26 = vmul.f32 %v9058_v22, %v7196_v7 }
0x3fef   :  { %7200 = vrot.lane.b32.xlu0 %v7198_v26, %s9271_s9 }
0x4061   :  { %v7201_v0 = vpop.permute.xlu0 %7200 }
0x4062   :  { %v7203_v29 = vadd.f32 %v7201_v0, %v7193_v36 }
0x4064   :  { %9059 = vtanh.f32 %v7203_v29 }
0x406e   :  { %v9060_v40 = vpop.eup %9059 }
0x406f   :  { %7206 = vrot.lane.b32.xlu1 %v9060_v40, %s9260_s21  ;;  %s9216_s21 = scalar_lea.vmem %s7380_s8, 32 }
0x4070   :  { %p9217_p0 = scmp.ne.s32.totalorder %s7380_s8, %s9216_s21  ;;  %p9222_p2 = scmp.lt.s32.totalorder %s9216_s21, %s9216_s21 }
0x4072   :  { %p9223_p3 = por %p9222_p2, %p9221_p1 }
0x4074   :  { %p9224_p4 = pnand %p9223_p3, %p9217_p0 }
0x40e1   :  { %v7207_v41 = vpop.permute.xlu1 %7206 }
0x40e2   :  { %v7209_v42 = vmul.f32 %v9058_v22, %v7207_v41 }
0x40e4   :  { %7222 = vrot.lane.b32.xlu0 %v7209_v42, %s9271_s9 }
0x4156   :  { %v7223_v60 = vpop.permute.xlu0 %7222 }
0x4157   :  { %7905 = vmatmul.mubr.msk.f32.vlgmr.msra.gmra.mrb[56].mxu0 %vm6405_vm4, %v7223_v60 }
0x422a   :  { %v7292_v2 = vpop.f32.mrb[56].mxu0 }
0x422b   :  { %v7293_v27 = vadd.f32 %v7531_v52, %v7292_v2  ;;  %v7906_v8 = vpop.f32.mrb[57].mxu0 }
0x422d   :  { %v7296_v45 = vmax.f32 %v7293_v27, 0.0 }
0x422f   :  { %7916 = vmatmul.mubr.msk.f32.vlgmr.msra.gmra.mrb[56].mxu1 %vm6405_vm4, %v7296_v45 }
0x4302   :  { %v7366_v14 = vpop.f32.mrb[56].mxu1 }
0x4303   :  { %v7367_v55 = vadd.f32 %v7531_v52, %v7366_v14  ;;  %v7917_v51 = vpop.f32.mrb[57].mxu1 }
0x4305   :  { %v7370_v57 = vmax.f32 %v7367_v55, 0.0 }
0x4307   :  { %7372 = vst.msk [vmem:[#allocation17] sm:$0x3] %vm7371_vm5, %v7370_v57 }
0x4308   :  { %9227 = shalt.err (!%p9224_p4)
}
0x4309   :  { %s9228_s6 = scalar_lea.hbm %s10528_s12, 32 }
0x430a   :  { %p9229_p5 = scmp.ne.s32.totalorder %s10528_s12, %s9228_s6  ;;  %p9232_p6 = scmp.lt.u32.totalorder %s9228_s6, %s10528_s12 }
0x430c   :  { %p9234_p7 = pnand %p9232_p6, %p9229_p5 }
0x430e   :  { %9237 = shalt.err (!%p9234_p7)
}
0x430f   :  { %7382 = dma.vmem_to_hbm [thread:$0]  %s7380_s8, 32, %s10528_s12, [#allocation7]  }
0x4310   :  { %9246 = dma.done.wait [#allocation7], 32  }
0x4311   :  { %9247 = vsyncadd [#allocation7], 4294967264 }
0x4312   :  { %7386 = vsyncpa [#allocation6], 1 }
0x4313   :  { %7387 = vsyncpa [#allocation9], 1 }
0x4314   :  { %7388 = vsyncpa [#allocation12], 1 }
0x4315   :  { %7389 = vsyncpa [#allocation15], 1 }
0x4316   :  { %7390 = vsyncpa [#allocation7], 1 }

</bundles_post_ra>
